<compile_context>
chip_gen: v7x
topology: tpu7x:2x2x1
jax: 0.10.0
libtpu: 0.0.40
codegen_flags: <defaults>
</compile_context>

<pallas_src>
import functools
import math

import jax
import jax.numpy as jnp
from jax.experimental import pallas as pl
from jax.experimental.pallas import tpu as pltpu


# --------------------------- in-kernel math helpers --------------------------

def _erf_approx(x):
    # Abramowitz & Stegun 7.1.26, max abs error ~1.5e-7 (effectively exact in
    # f32).  Uses only exp/mul/add/where, all guaranteed to lower on Mosaic.
    a1, a2, a3, a4, a5 = (0.254829592, -0.284496736, 1.421413741,
                          -1.453152027, 1.061405429)
    p = 0.3275911
    ax = jnp.abs(x)
    t = 1.0 / (1.0 + p * ax)
    poly = ((((a5 * t + a4) * t + a3) * t + a2) * t + a1) * t
    y = 1.0 - poly * jnp.exp(-(ax * ax))
    return jnp.where(x >= 0, y, -y)


def _gelu_exact(x):
    # torch.nn.functional.gelu default = exact (erf) GELU
    return 0.5 * x * (1.0 + _erf_approx(x * 0.7071067811865476))


def _ln(x, g, b, eps):
    mean = jnp.mean(x, axis=-1, keepdims=True)
    var = jnp.mean(jnp.square(x - mean), axis=-1, keepdims=True)
    y = (x - mean) * jax.lax.rsqrt(var + eps)
    return y * g.astype(jnp.float32) + b.astype(jnp.float32)


# ----------------------------- Pallas kernels --------------------------------

def _layernorm_kernel(x_ref, g_ref, b_ref, o_ref, *, eps):
    x = x_ref[...].astype(jnp.float32)
    o_ref[...] = _ln(x, g_ref[...], b_ref[...], eps).astype(o_ref.dtype)


def layer_norm(x, gamma, beta, eps=1e-12, rows_per_block=8):
    """LayerNorm over the last (hidden) dim; x: [M, H], M divisible by 8."""
    M, H = x.shape
    return pl.pallas_call(
        functools.partial(_layernorm_kernel, eps=eps),
        out_shape=jax.ShapeDtypeStruct((M, H), x.dtype),
        grid=(M // rows_per_block,),
        in_specs=[
            pl.BlockSpec((rows_per_block, H), lambda i: (i, 0)),
            pl.BlockSpec((1, H), lambda i: (0, 0)),
            pl.BlockSpec((1, H), lambda i: (0, 0)),
        ],
        out_specs=pl.BlockSpec((rows_per_block, H), lambda i: (i, 0)),
        compiler_params=pltpu.CompilerParams(
            dimension_semantics=("parallel",)),
    )(x, gamma.reshape(1, H), beta.reshape(1, H))


def _encoder_layer_kernel(h_ref, mask_ref,
                          wqkv_ref, bqkv_ref, wo_ref, bo_ref,
                          ln1g_ref, ln1b_ref,
                          wff1_ref, bff1_ref, wff2_ref, bff2_ref,
                          ln2g_ref, ln2b_ref,
                          o_ref, *, num_heads, head_dim, scale, eps):
    x = h_ref[0].astype(jnp.float32)                      # [S, H]
    mask = mask_ref[0].astype(jnp.float32)                # [1, S] additive
    hidden = num_heads * head_dim

    # ---- fused QKV projection: one MXU matmul on the concatenated weight ----
    qkv = jnp.dot(x, wqkv_ref[...], preferred_element_type=jnp.float32)
    qkv = qkv + bqkv_ref[...].astype(jnp.float32)         # [S, 3H]

    # ---- per-head attention (static lane slices; no layout transposes) ----
    ctx_heads = []
    for hix in range(num_heads):
        lo = hix * head_dim
        qh = qkv[:, lo:lo + head_dim]                               # [S, D]
        kh = qkv[:, hidden + lo:hidden + lo + head_dim]             # [S, D]
        vh = qkv[:, 2 * hidden + lo:2 * hidden + lo + head_dim]     # [S, D]
        s = jax.lax.dot_general(qh, kh, (((1,), (1,)), ((), ())),
                                preferred_element_type=jnp.float32) * scale
        s = s + mask                                                # bcast over q
        m = jnp.max(s, axis=-1, keepdims=True)
        p = jnp.exp(s - m)
        denom = jnp.sum(p, axis=-1, keepdims=True)
        attn = p * pl.reciprocal(denom, approx=True)
        ctx_heads.append(jnp.dot(attn, vh, preferred_element_type=jnp.float32))
    ctx = jnp.concatenate(ctx_heads, axis=-1)                       # [S, H]

    # ---- output projection + residual + LayerNorm (fused epilogue) ----
    attn_out = jnp.dot(ctx, wo_ref[...], preferred_element_type=jnp.float32)
    attn_out = attn_out + bo_ref[...].astype(jnp.float32)
    y = _ln(x + attn_out, ln1g_ref[...], ln1b_ref[...], eps)

    # ---- feed-forward (GELU) + residual + LayerNorm (fused epilogue) ----
    ff = jnp.dot(y, wff1_ref[...], preferred_element_type=jnp.float32)
    ff = _gelu_exact(ff + bff1_ref[...].astype(jnp.float32))
    ff = jnp.dot(ff, wff2_ref[...], preferred_element_type=jnp.float32)
    ff = ff + bff2_ref[...].astype(jnp.float32)
    z = _ln(y + ff, ln2g_ref[...], ln2b_ref[...], eps)

    o_ref[0] = z.astype(o_ref.dtype)


def encoder_layer(h, add_mask, lp, *, num_heads, head_dim, scale, eps):
    """One full transformer encoder layer in a single pallas_call.

    h: [B, S, H], add_mask: [B, 1, S] additive (0 / -1e9).
    """
    B, S, H = h.shape
    F = lp["w_ff1"].shape[1]

    def full_spec(shape):
        n = len(shape)
        return pl.BlockSpec(shape, lambda b, _n=n: (0,) * _n)

    kernel = functools.partial(_encoder_layer_kernel, num_heads=num_heads,
                               head_dim=head_dim, scale=scale, eps=eps)
    return pl.pallas_call(
        kernel,
        out_shape=jax.ShapeDtypeStruct((B, S, H), h.dtype),
        grid=(B,),
        in_specs=[
            pl.BlockSpec((1, S, H), lambda b: (b, 0, 0)),
            pl.BlockSpec((1, 1, S), lambda b: (b, 0, 0)),
            full_spec((H, 3 * H)), full_spec((1, 3 * H)),
            full_spec((H, H)), full_spec((1, H)),
            full_spec((1, H)), full_spec((1, H)),
            full_spec((H, F)), full_spec((1, F)),
            full_spec((F, H)), full_spec((1, H)),
            full_spec((1, H)), full_spec((1, H)),
        ],
        out_specs=pl.BlockSpec((1, S, H), lambda b: (b, 0, 0)),
        compiler_params=pltpu.CompilerParams(
            dimension_semantics=("parallel",)),
    )(h, add_mask,
      lp["w_qkv"], lp["b_qkv"].reshape(1, 3 * H),
      lp["wo"], lp["bo"].reshape(1, H),
      lp["ln1_g"].reshape(1, H), lp["ln1_b"].reshape(1, H),
      lp["w_ff1"], lp["b_ff1"].reshape(1, F),
      lp["w_ff2"], lp["b_ff2"].reshape(1, H),
      lp["ln2_g"].reshape(1, H), lp["ln2_b"].reshape(1, H))


def _cls_head_kernel(x_ref, wd_ref, bd_ref, wo_ref, bo_ref, o_ref):
    x = x_ref[...].astype(jnp.float32)                    # [B, H]
    y = jnp.dot(x, wd_ref[...], preferred_element_type=jnp.float32)
    y = _gelu_exact(y + bd_ref[...].astype(jnp.float32))
    z = jnp.dot(y, wo_ref[...], preferred_element_type=jnp.float32)
    z = z + bo_ref[...].astype(jnp.float32)
    o_ref[...] = z.astype(o_ref.dtype)


def cls_head(x_cls, wd, bd, wo_pad, bo_pad):
    """Fused Electra classification head; output is padded to 128 lanes."""
    B, H = x_cls.shape
    Npad = wo_pad.shape[1]
    return pl.pallas_call(
        _cls_head_kernel,
        out_shape=jax.ShapeDtypeStruct((B, Npad), x_cls.dtype),
        grid=(1,),
        in_specs=[
            pl.BlockSpec((B, H), lambda i: (0, 0)),
            pl.BlockSpec((H, H), lambda i: (0, 0)),
            pl.BlockSpec((1, H), lambda i: (0, 0)),
            pl.BlockSpec((H, Npad), lambda i: (0, 0)),
            pl.BlockSpec((1, Npad), lambda i: (0, 0)),
        ],
        out_specs=pl.BlockSpec((B, Npad), lambda i: (0, 0)),
    )(x_cls, wd, bd.reshape(1, H), wo_pad, bo_pad.reshape(1, Npad))


# ------------------------------ model (glue) ---------------------------------

class Config:
    hidden_size = 128
    num_heads = 2
    head_dim = 64
    intermediate_size = 256
    num_layers = 2
    vocab_size = 128
    max_position = 64
    type_vocab_size = 2
    classes_number = 4
    dropout = 0.1  # inference no-op
    layer_norm_eps = 1e-12


def init_params(key, cfg):
    H, F = cfg.hidden_size, cfg.intermediate_size

    def dense(k, fan_in, fan_out):
        kw, _ = jax.random.split(k)
        w = jax.random.normal(kw, (fan_in, fan_out), jnp.float32) * 0.02
        b = jnp.zeros((fan_out,), jnp.float32)
        return w, b

    keys = jax.random.split(key, 8 + cfg.num_layers)
    params = {
        "word_emb": jax.random.normal(keys[0], (cfg.vocab_size, H),
                                      jnp.float32) * 0.02,
        "pos_emb": jax.random.normal(keys[1], (cfg.max_position, H),
                                     jnp.float32) * 0.02,
        "type_emb": jax.random.normal(keys[2], (cfg.type_vocab_size, H),
                                      jnp.float32) * 0.02,
        "emb_ln_g": jnp.ones((H,), jnp.float32),
        "emb_ln_b": jnp.zeros((H,), jnp.float32),
        "layers": [],
    }
    for li in range(cfg.num_layers):
        lk = jax.random.split(keys[3 + li], 6)
        wq, bq = dense(lk[0], H, H)
        wk, bk = dense(lk[1], H, H)
        wv, bv = dense(lk[2], H, H)
        wo, bo = dense(lk[3], H, H)
        w1, b1 = dense(lk[4], H, F)
        w2, b2 = dense(lk[5], F, H)
        params["layers"].append({
            # fused QKV weight: one [H, 3H] matmul instead of three [H, H]
            "w_qkv": jnp.concatenate([wq, wk, wv], axis=1),
            "b_qkv": jnp.concatenate([bq, bk, bv], axis=0),
            "wo": wo, "bo": bo,
            "ln1_g": jnp.ones((H,), jnp.float32),
            "ln1_b": jnp.zeros((H,), jnp.float32),
            "w_ff1": w1, "b_ff1": b1, "w_ff2": w2, "b_ff2": b2,
            "ln2_g": jnp.ones((H,), jnp.float32),
            "ln2_b": jnp.zeros((H,), jnp.float32),
        })
    hk1, hk2 = jax.random.split(keys[3 + cfg.num_layers])
    params["cls_dense_w"], params["cls_dense_b"] = dense(hk1, H, H)
    w_out, b_out = dense(hk2, H, cfg.classes_number)
    # pad the 4-wide classifier to 128 lanes -> lane-dense (unmasked) stores
    n_pad = 128
    params["cls_out_w_pad"] = (jnp.zeros((H, n_pad), jnp.float32)
                               .at[:, :cfg.classes_number].set(w_out))
    params["cls_out_b_pad"] = (jnp.zeros((n_pad,), jnp.float32)
                               .at[:cfg.classes_number].set(b_out))
    return params


def news_clf_forward(params, input_ids, attention_mask, token_type_ids, cfg):
    B, S = input_ids.shape
    H, NH, HD = cfg.hidden_size, cfg.num_heads, cfg.head_dim

    # ---- embeddings (gathers stay as XLA glue; LayerNorm is a Pallas kernel) ----
    # TODO(synk): token/position/type embedding gathers are left to XLA; a
    # Pallas DMA-gather adds nothing at these sizes.
    pos_ids = jnp.arange(S, dtype=jnp.int32)
    emb = (jnp.take(params["word_emb"], input_ids, axis=0)
           + jnp.take(params["pos_emb"], pos_ids, axis=0)[None, :, :]
           + jnp.take(params["type_emb"], token_type_ids, axis=0))
    h = layer_norm(emb.reshape(B * S, H), params["emb_ln_g"],
                   params["emb_ln_b"], eps=cfg.layer_norm_eps)
    h = h.reshape(B, S, H)

    # additive attention mask: 0 where attended, -1e9 where masked
    add_mask = ((1.0 - attention_mask.astype(jnp.float32)) * -1e9).reshape(B, 1, S)

    scale = 1.0 / math.sqrt(HD)          # Python float -> compile-time constant

    # one fused Pallas kernel per transformer layer
    for lp in params["layers"]:
        h = encoder_layer(h, add_mask, lp, num_heads=NH, head_dim=HD,
                          scale=scale, eps=cfg.layer_norm_eps)

    # ---- ElectraClassificationHead (dropout is identity at inference) ----
    x = h[:, 0, :]                                        # CLS token [B, H]
    logits_pad = cls_head(x, params["cls_dense_w"], params["cls_dense_b"],
                          params["cls_out_w_pad"], params["cls_out_b_pad"])
    return logits_pad[:, :cfg.classes_number]             # [B, classes_number]


# --------------------------------- main ---------------------------------------

if __name__ == "__main__":
    cfg = Config()
    B, S = 2, 8

    key = jax.random.PRNGKey(0)
    k_params, k_ids, k_types = jax.random.split(key, 3)

    params = init_params(k_params, cfg)

    input_ids = jax.random.randint(k_ids, (B, S), 0, cfg.vocab_size,
                                   dtype=jnp.int32)
    token_type_ids = jax.random.randint(k_types, (B, S), 0,
                                        cfg.type_vocab_size, dtype=jnp.int32)
    # second example has its last two positions padded (masked out)
    attention_mask = jnp.array([[1] * S,
                                [1] * (S - 2) + [0, 0]], dtype=jnp.int32)

    forward = jax.jit(functools.partial(news_clf_forward, cfg=cfg))
    logits = forward(params, input_ids, attention_mask, token_type_ids)
    jax.block_until_ready(logits)

    assert logits.shape == (B, cfg.classes_number)
    assert bool(jnp.all(jnp.isfinite(logits)))
    print("KERNEL_OK")
</pallas_src>

<mosaic_0001>
module attributes {stable_mosaic.version = 11 : i64} {
  func.func @_layernorm_kernel(%arg0: i32, %arg1: memref<8x128xf32, #tpu.memory_space<vmem>>, %arg2: memref<1x128xf32, #tpu.memory_space<vmem>>, %arg3: memref<1x128xf32, #tpu.memory_space<vmem>>, %arg4: memref<8x128xf32, #tpu.memory_space<vmem>>) attributes {dimension_semantics = [#tpu.dimension_semantics<parallel>], iteration_bounds = array<i64: 2>, scalar_prefetch = 0 : i64, scratch_operands = 0 : i64, tpu.core_type = #tpu.core_type<tc>, window_params = [{transform_indices = @transform_0, window_bounds = array<i64: 8, 128>}, {pipeline_mode = #tpu.pipeline_mode<synchronous>, transform_indices = @transform_1, window_bounds = array<i64: 1, 128>}, {pipeline_mode = #tpu.pipeline_mode<synchronous>, transform_indices = @transform_2, window_bounds = array<i64: 1, 128>}, {transform_indices = @transform_3, window_bounds = array<i64: 8, 128>}]} {
    %c0 = arith.constant 0 : index
    %c0_0 = arith.constant 0 : index
    %0 = vector.load %arg1[%c0, %c0_0] : memref<8x128xf32, #tpu.memory_space<vmem>>, vector<8x128xf32>
    %c0_1 = arith.constant 0 : index
    %c0_2 = arith.constant 0 : index
    %1 = vector.load %arg2[%c0_1, %c0_2] : memref<1x128xf32, #tpu.memory_space<vmem>>, vector<1x128xf32>
    %c0_3 = arith.constant 0 : index
    %c0_4 = arith.constant 0 : index
    %2 = vector.load %arg3[%c0_3, %c0_4] : memref<1x128xf32, #tpu.memory_space<vmem>>, vector<1x128xf32>
    %cst = arith.constant dense<0.000000e+00> : vector<8xf32>
    %3 = vector.multi_reduction <add>, %0, %cst [1] : vector<8x128xf32> to vector<8xf32>
    %4 = vector.shape_cast %3 : vector<8xf32> to vector<8x1xf32>
    %cst_5 = arith.constant 1.280000e+02 : f32
    %5 = vector.broadcast %cst_5 : f32 to vector<8x1xf32>
    %6 = arith.divf %4, %5 : vector<8x1xf32>
    %7 = vector.broadcast %6 : vector<8x1xf32> to vector<8x128xf32>
    %8 = arith.subf %0, %7 : vector<8x128xf32>
    %9 = arith.mulf %8, %8 : vector<8x128xf32>
    %cst_6 = arith.constant dense<0.000000e+00> : vector<8xf32>
    %10 = vector.multi_reduction <add>, %9, %cst_6 [1] : vector<8x128xf32> to vector<8xf32>
    %11 = vector.shape_cast %10 : vector<8xf32> to vector<8x1xf32>
    %cst_7 = arith.constant 1.280000e+02 : f32
    %12 = vector.broadcast %cst_7 : f32 to vector<8x1xf32>
    %13 = arith.divf %11, %12 : vector<8x1xf32>
    %14 = vector.broadcast %6 : vector<8x1xf32> to vector<8x128xf32>
    %15 = arith.subf %0, %14 : vector<8x128xf32>
    %cst_8 = arith.constant 9.99999996E-13 : f32
    %16 = vector.broadcast %cst_8 : f32 to vector<8x1xf32>
    %17 = arith.addf %13, %16 : vector<8x1xf32>
    %18 = math.rsqrt %17 : vector<8x1xf32>
    %19 = vector.broadcast %18 : vector<8x1xf32> to vector<8x128xf32>
    %20 = arith.mulf %15, %19 : vector<8x128xf32>
    %21 = vector.broadcast %1 : vector<1x128xf32> to vector<8x128xf32>
    %22 = arith.mulf %20, %21 : vector<8x128xf32>
    %23 = vector.broadcast %2 : vector<1x128xf32> to vector<8x128xf32>
    %24 = arith.addf %22, %23 : vector<8x128xf32>
    %c0_9 = arith.constant 0 : index
    %c0_10 = arith.constant 0 : index
    %25 = vector.load %arg4[%c0_9, %c0_10] : memref<8x128xf32, #tpu.memory_space<vmem>>, vector<8x128xf32>
    tpu.vector_store %arg4[%c0_9, %c0_10], %24 {strides = array<i32>} : memref<8x128xf32, #tpu.memory_space<vmem>>, vector<8x128xf32>,
    return
  }
  func.func @transform_0(%arg0: i32) -> (i32, i32) {
    %c0_i32 = arith.constant 0 : i32
    %c0_i32_0 = arith.constant 0 : i32
    return %arg0, %c0_i32 : i32, i32
  }
  func.func @transform_1(%arg0: i32) -> (i32, i32) {
    %c0_i32 = arith.constant 0 : i32
    %c0_i32_0 = arith.constant 0 : i32
    %c0_i32_1 = arith.constant 0 : i32
    return %c0_i32, %c0_i32_0 : i32, i32
  }
  func.func @transform_2(%arg0: i32) -> (i32, i32) {
    %c0_i32 = arith.constant 0 : i32
    %c0_i32_0 = arith.constant 0 : i32
    %c0_i32_1 = arith.constant 0 : i32
    return %c0_i32, %c0_i32_0 : i32, i32
  }
  func.func @transform_3(%arg0: i32) -> (i32, i32) {
    %c0_i32 = arith.constant 0 : i32
    %c0_i32_0 = arith.constant 0 : i32
    return %arg0, %c0_i32 : i32, i32
  }
}

module attributes {stable_mosaic.version = 11 : i64} {
  func.func @_cls_head_kernel(%arg0: i32, %arg1: memref<2x128xf32, #tpu.memory_space<vmem>>, %arg2: memref<128x128xf32, #tpu.memory_space<vmem>>, %arg3: memref<1x128xf32, #tpu.memory_space<vmem>>, %arg4: memref<128x128xf32, #tpu.memory_space<vmem>>, %arg5: memref<1x128xf32, #tpu.memory_space<vmem>>, %arg6: memref<2x128xf32, #tpu.memory_space<vmem>>) attributes {dimension_semantics = [#tpu.dimension_semantics<arbitrary>], iteration_bounds = array<i64: 1>, scalar_prefetch = 0 : i64, scratch_operands = 0 : i64, tpu.core_type = #tpu.core_type<tc>, window_params = [{pipeline_mode = #tpu.pipeline_mode<synchronous>, transform_indices = @transform_0, window_bounds = array<i64: 2, 128>}, {pipeline_mode = #tpu.pipeline_mode<synchronous>, transform_indices = @transform_1, window_bounds = array<i64: 128, 128>}, {pipeline_mode = #tpu.pipeline_mode<synchronous>, transform_indices = @transform_2, window_bounds = array<i64: 1, 128>}, {pipeline_mode = #tpu.pipeline_mode<synchronous>, transform_indices = @transform_3, window_bounds = array<i64: 128, 128>}, {pipeline_mode = #tpu.pipeline_mode<synchronous>, transform_indices = @transform_4, window_bounds = array<i64: 1, 128>}, {pipeline_mode = #tpu.pipeline_mode<synchronous>, transform_indices = @transform_5, window_bounds = array<i64: 2, 128>}]} {
    %c0 = arith.constant 0 : index
    %c0_0 = arith.constant 0 : index
    %0 = vector.load %arg1[%c0, %c0_0] : memref<2x128xf32, #tpu.memory_space<vmem>>, vector<2x128xf32>
    %c0_1 = arith.constant 0 : index
    %c0_2 = arith.constant 0 : index
    %1 = vector.load %arg2[%c0_1, %c0_2] : memref<128x128xf32, #tpu.memory_space<vmem>>, vector<128x128xf32>
    %cst = arith.constant dense<0.000000e+00> : vector<2x128xf32>
    %2 = tpu.matmul %0, %1, %cst {dimension_numbers = #tpu.dot_dimension_numbers<[1], [0], [0], [1], [0, 0, 1, 1], [], []>} : vector<2x128xf32>, vector<128x128xf32>, vector<2x128xf32> -> vector<2x128xf32>
    %c0_3 = arith.constant 0 : index
    %c0_4 = arith.constant 0 : index
    %3 = vector.load %arg3[%c0_3, %c0_4] : memref<1x128xf32, #tpu.memory_space<vmem>>, vector<1x128xf32>
    %4 = vector.broadcast %3 : vector<1x128xf32> to vector<2x128xf32>
    %5 = arith.addf %2, %4 : vector<2x128xf32>
    %cst_5 = arith.constant 5.000000e-01 : f32
    %6 = vector.broadcast %cst_5 : f32 to vector<2x128xf32>
    %7 = arith.mulf %6, %5 : vector<2x128xf32>
    %cst_6 = arith.constant 0.707106769 : f32
    %8 = vector.broadcast %cst_6 : f32 to vector<2x128xf32>
    %9 = arith.mulf %5, %8 : vector<2x128xf32>
    %10 = math.absf %9 : vector<2x128xf32>
    %cst_7 = arith.constant 0.327591091 : f32
    %11 = vector.broadcast %cst_7 : f32 to vector<2x128xf32>
    %12 = arith.mulf %11, %10 : vector<2x128xf32>
    %cst_8 = arith.constant 1.000000e+00 : f32
    %13 = vector.broadcast %cst_8 : f32 to vector<2x128xf32>
    %14 = arith.addf %13, %12 : vector<2x128xf32>
    %cst_9 = arith.constant 1.000000e+00 : f32
    %15 = vector.broadcast %cst_9 : f32 to vector<2x128xf32>
    %16 = arith.divf %15, %14 : vector<2x128xf32>
    %cst_10 = arith.constant 1.06140542 : f32
    %17 = vector.broadcast %cst_10 : f32 to vector<2x128xf32>
    %18 = arith.mulf %17, %16 : vector<2x128xf32>
    %cst_11 = arith.constant -1.45315206 : f32
    %19 = vector.broadcast %cst_11 : f32 to vector<2x128xf32>
    %20 = arith.addf %18, %19 : vector<2x128xf32>
    %21 = arith.mulf %20, %16 : vector<2x128xf32>
    %cst_12 = arith.constant 1.42141378 : f32
    %22 = vector.broadcast %cst_12 : f32 to vector<2x128xf32>
    %23 = arith.addf %21, %22 : vector<2x128xf32>
    %24 = arith.mulf %23, %16 : vector<2x128xf32>
    %cst_13 = arith.constant -0.284496725 : f32
    %25 = vector.broadcast %cst_13 : f32 to vector<2x128xf32>
    %26 = arith.addf %24, %25 : vector<2x128xf32>
    %27 = arith.mulf %26, %16 : vector<2x128xf32>
    %cst_14 = arith.constant 0.254829586 : f32
    %28 = vector.broadcast %cst_14 : f32 to vector<2x128xf32>
    %29 = arith.addf %27, %28 : vector<2x128xf32>
    %30 = arith.mulf %29, %16 : vector<2x128xf32>
    %31 = arith.mulf %10, %10 : vector<2x128xf32>
    %cst_15 = arith.constant 0.000000e+00 : f32
    %32 = vector.broadcast %cst_15 : f32 to vector<2x128xf32>
    %33 = arith.subf %32, %31 : vector<2x128xf32>
    %34 = math.exp %33 : vector<2x128xf32>
    %35 = arith.mulf %30, %34 : vector<2x128xf32>
    %cst_16 = arith.constant 1.000000e+00 : f32
    %36 = vector.broadcast %cst_16 : f32 to vector<2x128xf32>
    %37 = arith.subf %36, %35 : vector<2x128xf32>
    %cst_17 = arith.constant 0.000000e+00 : f32
    %38 = vector.broadcast %cst_17 : f32 to vector<2x128xf32>
    %39 = arith.cmpf oge, %9, %38 : vector<2x128xf32>
    %cst_18 = arith.constant 0.000000e+00 : f32
    %40 = vector.broadcast %cst_18 : f32 to vector<2x128xf32>
    %41 = arith.subf %40, %37 : vector<2x128xf32>
    %42 = arith.select %39, %37, %41 : vector<2x128xi1>, vector<2x128xf32>
    %cst_19 = arith.constant 1.000000e+00 : f32
    %43 = vector.broadcast %cst_19 : f32 to vector<2x128xf32>
    %44 = arith.addf %43, %42 : vector<2x128xf32>
    %45 = arith.mulf %7, %44 : vector<2x128xf32>
    %c0_20 = arith.constant 0 : index
    %c0_21 = arith.constant 0 : index
    %46 = vector.load %arg4[%c0_20, %c0_21] : memref<128x128xf32, #tpu.memory_space<vmem>>, vector<128x128xf32>
    %cst_22 = arith.constant dense<0.000000e+00> : vector<2x128xf32>
    %47 = tpu.matmul %45, %46, %cst_22 {dimension_numbers = #tpu.dot_dimension_numbers<[1], [0], [0], [1], [0, 0, 1, 1], [], []>} : vector<2x128xf32>, vector<128x128xf32>, vector<2x128xf32> -> vector<2x128xf32>
    %c0_23 = arith.constant 0 : index
    %c0_24 = arith.constant 0 : index
    %48 = vector.load %arg5[%c0_23, %c0_24] : memref<1x128xf32, #tpu.memory_space<vmem>>, vector<1x128xf32>
    %49 = vector.broadcast %48 : vector<1x128xf32> to vector<2x128xf32>
    %50 = arith.addf %47, %49 : vector<2x128xf32>
    %c0_25 = arith.constant 0 : index
    %c0_26 = arith.constant 0 : index
    %51 = vector.load %arg6[%c0_25, %c0_26] : memref<2x128xf32, #tpu.memory_space<vmem>>, vector<2x128xf32>
    tpu.vector_store %arg6[%c0_25, %c0_26], %50 {strides = array<i32>} : memref<2x128xf32, #tpu.memory_space<vmem>>, vector<2x128xf32>,
    return
  }
  func.func @transform_0(%arg0: i32) -> (i32, i32) {
    %c0_i32 = arith.constant 0 : i32
    %c0_i32_0 = arith.constant 0 : i32
    %c0_i32_1 = arith.constant 0 : i32
    return %c0_i32, %c0_i32_0 : i32, i32
  }
  func.func @transform_1(%arg0: i32) -> (i32, i32) {
    %c0_i32 = arith.constant 0 : i32
    %c0_i32_0 = arith.constant 0 : i32
    %c0_i32_1 = arith.constant 0 : i32
    return %c0_i32, %c0_i32_0 : i32, i32
  }
  func.func @transform_2(%arg0: i32) -> (i32, i32) {
    %c0_i32 = arith.constant 0 : i32
    %c0_i32_0 = arith.constant 0 : i32
    %c0_i32_1 = arith.constant 0 : i32
    return %c0_i32, %c0_i32_0 : i32, i32
  }
  func.func @transform_3(%arg0: i32) -> (i32, i32) {
    %c0_i32 = arith.constant 0 : i32
    %c0_i32_0 = arith.constant 0 : i32
    %c0_i32_1 = arith.constant 0 : i32
    return %c0_i32, %c0_i32_0 : i32, i32
  }
  func.func @transform_4(%arg0: i32) -> (i32, i32) {
    %c0_i32 = arith.constant 0 : i32
    %c0_i32_0 = arith.constant 0 : i32
    %c0_i32_1 = arith.constant 0 : i32
    return %c0_i32, %c0_i32_0 : i32, i32
  }
  func.func @transform_5(%arg0: i32) -> (i32, i32) {
    %c0_i32 = arith.constant 0 : i32
    %c0_i32_0 = arith.constant 0 : i32
    %c0_i32_1 = arith.constant 0 : i32
    return %c0_i32, %c0_i32_0 : i32, i32
  }
}

module attributes {stable_mosaic.version = 11 : i64} {
  func.func @_encoder_layer_kernel(%arg0: i32, %arg1: memref<1x8x128xf32, #tpu.memory_space<vmem>>, %arg2: memref<1x1x8xf32, #tpu.memory_space<vmem>>, %arg3: memref<128x384xf32, #tpu.memory_space<vmem>>, %arg4: memref<1x384xf32, #tpu.memory_space<vmem>>, %arg5: memref<128x128xf32, #tpu.memory_space<vmem>>, %arg6: memref<1x128xf32, #tpu.memory_space<vmem>>, %arg7: memref<1x128xf32, #tpu.memory_space<vmem>>, %arg8: memref<1x128xf32, #tpu.memory_space<vmem>>, %arg9: memref<128x256xf32, #tpu.memory_space<vmem>>, %arg10: memref<1x256xf32, #tpu.memory_space<vmem>>, %arg11: memref<256x128xf32, #tpu.memory_space<vmem>>, %arg12: memref<1x128xf32, #tpu.memory_space<vmem>>, %arg13: memref<1x128xf32, #tpu.memory_space<vmem>>, %arg14: memref<1x128xf32, #tpu.memory_space<vmem>>, %arg15: memref<1x8x128xf32, #tpu.memory_space<vmem>>) attributes {dimension_semantics = [#tpu.dimension_semantics<parallel>], iteration_bounds = array<i64: 2>, scalar_prefetch = 0 : i64, scratch_operands = 0 : i64, tpu.core_type = #tpu.core_type<tc>, window_params = [{transform_indices = @transform_0, window_bounds = array<i64: 1, 8, 128>}, {transform_indices = @transform_1, window_bounds = array<i64: 1, 1, 8>}, {pipeline_mode = #tpu.pipeline_mode<synchronous>, transform_indices = @transform_2, window_bounds = array<i64: 128, 384>}, {pipeline_mode = #tpu.pipeline_mode<synchronous>, transform_indices = @transform_3, window_bounds = array<i64: 1, 384>}, {pipeline_mode = #tpu.pipeline_mode<synchronous>, transform_indices = @transform_4, window_bounds = array<i64: 128, 128>}, {pipeline_mode = #tpu.pipeline_mode<synchronous>, transform_indices = @transform_5, window_bounds = array<i64: 1, 128>}, {pipeline_mode = #tpu.pipeline_mode<synchronous>, transform_indices = @transform_6, window_bounds = array<i64: 1, 128>}, {pipeline_mode = #tpu.pipeline_mode<synchronous>, transform_indices = @transform_7, window_bounds = array<i64: 1, 128>}, {pipeline_mode = #tpu.pipeline_mode<synchronous>, transform_indices = @transform_8, window_bounds = array<i64: 128, 256>}, {pipeline_mode = #tpu.pipeline_mode<synchronous>, transform_indices = @transform_9, window_bounds = array<i64: 1, 256>}, {pipeline_mode = #tpu.pipeline_mode<synchronous>, transform_indices = @transform_10, window_bounds = array<i64: 256, 128>}, {pipeline_mode = #tpu.pipeline_mode<synchronous>, transform_indices = @transform_11, window_bounds = array<i64: 1, 128>}, {pipeline_mode = #tpu.pipeline_mode<synchronous>, transform_indices = @transform_12, window_bounds = array<i64: 1, 128>}, {pipeline_mode = #tpu.pipeline_mode<synchronous>, transform_indices = @transform_13, window_bounds = array<i64: 1, 128>}, {transform_indices = @transform_14, window_bounds = array<i64: 1, 8, 128>}]} {
    %c0 = arith.constant 0 : index
    %c0_0 = arith.constant 0 : index
    %c0_1 = arith.constant 0 : index
    %0 = vector.load %arg1[%c0, %c0_0, %c0_1] : memref<1x8x128xf32, #tpu.memory_space<vmem>>, vector<1x8x128xf32>
    %1 = vector.shape_cast %0 : vector<1x8x128xf32> to vector<8x128xf32>
    %c0_2 = arith.constant 0 : index
    %c0_3 = arith.constant 0 : index
    %c0_4 = arith.constant 0 : index
    %2 = vector.load %arg2[%c0_2, %c0_3, %c0_4] : memref<1x1x8xf32, #tpu.memory_space<vmem>>, vector<1x1x8xf32>
    %3 = vector.shape_cast %2 : vector<1x1x8xf32> to vector<1x8xf32>
    %c0_5 = arith.constant 0 : index
    %c0_6 = arith.constant 0 : index
    %4 = vector.load %arg3[%c0_5, %c0_6] : memref<128x384xf32, #tpu.memory_space<vmem>>, vector<128x384xf32>
    %cst = arith.constant dense<0.000000e+00> : vector<8x384xf32>
    %5 = tpu.matmul %1, %4, %cst {dimension_numbers = #tpu.dot_dimension_numbers<[1], [0], [0], [1], [0, 0, 1, 1], [], []>} : vector<8x128xf32>, vector<128x384xf32>, vector<8x384xf32> -> vector<8x384xf32>
    %c0_7 = arith.constant 0 : index
    %c0_8 = arith.constant 0 : index
    %6 = vector.load %arg4[%c0_7, %c0_8] : memref<1x384xf32, #tpu.memory_space<vmem>>, vector<1x384xf32>
    %7 = vector.broadcast %6 : vector<1x384xf32> to vector<8x384xf32>
    %8 = arith.addf %5, %7 : vector<8x384xf32>
    %9 = vector.extract_strided_slice %8 {offsets = [0, 0], sizes = [8, 64], strides = [1, 1]} : vector<8x384xf32> to vector<8x64xf32>
    %10 = vector.extract_strided_slice %8 {offsets = [0, 128], sizes = [8, 64], strides = [1, 1]} : vector<8x384xf32> to vector<8x64xf32>
    %11 = vector.extract_strided_slice %8 {offsets = [0, 256], sizes = [8, 64], strides = [1, 1]} : vector<8x384xf32> to vector<8x64xf32>
    %cst_9 = arith.constant dense<0.000000e+00> : vector<8x8xf32>
    %12 = tpu.matmul %9, %10, %cst_9 {dimension_numbers = #tpu.dot_dimension_numbers<[1], [1], [0], [0], [0, 0, 1, 0], [], []>} : vector<8x64xf32>, vector<8x64xf32>, vector<8x8xf32> -> vector<8x8xf32>
    %cst_10 = arith.constant 1.250000e-01 : f32
    %13 = vector.broadcast %cst_10 : f32 to vector<8x8xf32>
    %14 = arith.mulf %12, %13 : vector<8x8xf32>
    %15 = vector.broadcast %3 : vector<1x8xf32> to vector<8x8xf32>
    %16 = arith.addf %14, %15 : vector<8x8xf32>
    %cst_11 = arith.constant dense<0xFF800000> : vector<8xf32>
    %17 = vector.multi_reduction <maximumf>, %16, %cst_11 [1] : vector<8x8xf32> to vector<8xf32>
    %18 = vector.shape_cast %17 : vector<8xf32> to vector<8x1xf32>
    %19 = vector.broadcast %18 : vector<8x1xf32> to vector<8x8xf32>
    %20 = arith.subf %16, %19 : vector<8x8xf32>
    %21 = math.exp %20 : vector<8x8xf32>
    %cst_12 = arith.constant dense<0.000000e+00> : vector<8xf32>
    %22 = vector.multi_reduction <add>, %21, %cst_12 [1] : vector<8x8xf32> to vector<8xf32>
    %23 = vector.shape_cast %22 : vector<8xf32> to vector<8x1xf32>
    %24 = tpu.reciprocal %23 {approx = true} : vector<8x1xf32> -> vector<8x1xf32>
    %25 = vector.broadcast %24 : vector<8x1xf32> to vector<8x8xf32>
    %26 = arith.mulf %21, %25 : vector<8x8xf32>
    %cst_13 = arith.constant dense<0.000000e+00> : vector<8x64xf32>
    %27 = tpu.matmul %26, %11, %cst_13 {dimension_numbers = #tpu.dot_dimension_numbers<[1], [0], [0], [1], [0, 0, 1, 1], [], []>} : vector<8x8xf32>, vector<8x64xf32>, vector<8x64xf32> -> vector<8x64xf32>
    %28 = vector.extract_strided_slice %8 {offsets = [0, 64], sizes = [8, 64], strides = [1, 1]} : vector<8x384xf32> to vector<8x64xf32>
    %29 = vector.extract_strided_slice %8 {offsets = [0, 192], sizes = [8, 64], strides = [1, 1]} : vector<8x384xf32> to vector<8x64xf32>
    %30 = vector.extract_strided_slice %8 {offsets = [0, 320], sizes = [8, 64], strides = [1, 1]} : vector<8x384xf32> to vector<8x64xf32>
    %cst_14 = arith.constant dense<0.000000e+00> : vector<8x8xf32>
    %31 = tpu.matmul %28, %29, %cst_14 {dimension_numbers = #tpu.dot_dimension_numbers<[1], [1], [0], [0], [0, 0, 1, 0], [], []>} : vector<8x64xf32>, vector<8x64xf32>, vector<8x8xf32> -> vector<8x8xf32>
    %cst_15 = arith.constant 1.250000e-01 : f32
    %32 = vector.broadcast %cst_15 : f32 to vector<8x8xf32>
    %33 = arith.mulf %31, %32 : vector<8x8xf32>
    %34 = vector.broadcast %3 : vector<1x8xf32> to vector<8x8xf32>
    %35 = arith.addf %33, %34 : vector<8x8xf32>
    %cst_16 = arith.constant dense<0xFF800000> : vector<8xf32>
    %36 = vector.multi_reduction <maximumf>, %35, %cst_16 [1] : vector<8x8xf32> to vector<8xf32>
    %37 = vector.shape_cast %36 : vector<8xf32> to vector<8x1xf32>
    %38 = vector.broadcast %37 : vector<8x1xf32> to vector<8x8xf32>
    %39 = arith.subf %35, %38 : vector<8x8xf32>
    %40 = math.exp %39 : vector<8x8xf32>
    %cst_17 = arith.constant dense<0.000000e+00> : vector<8xf32>
    %41 = vector.multi_reduction <add>, %40, %cst_17 [1] : vector<8x8xf32> to vector<8xf32>
    %42 = vector.shape_cast %41 : vector<8xf32> to vector<8x1xf32>
    %43 = tpu.reciprocal %42 {approx = true} : vector<8x1xf32> -> vector<8x1xf32>
    %44 = vector.broadcast %43 : vector<8x1xf32> to vector<8x8xf32>
    %45 = arith.mulf %40, %44 : vector<8x8xf32>
    %cst_18 = arith.constant dense<0.000000e+00> : vector<8x64xf32>
    %46 = tpu.matmul %45, %30, %cst_18 {dimension_numbers = #tpu.dot_dimension_numbers<[1], [0], [0], [1], [0, 0, 1, 1], [], []>} : vector<8x8xf32>, vector<8x64xf32>, vector<8x64xf32> -> vector<8x64xf32>
    %47 = tpu.concatenate %27, %46 in 1 : vector<8x64xf32>, vector<8x64xf32> -> vector<8x128xf32>
    %c0_19 = arith.constant 0 : index
    %c0_20 = arith.constant 0 : index
    %48 = vector.load %arg5[%c0_19, %c0_20] : memref<128x128xf32, #tpu.memory_space<vmem>>, vector<128x128xf32>
    %cst_21 = arith.constant dense<0.000000e+00> : vector<8x128xf32>
    %49 = tpu.matmul %47, %48, %cst_21 {dimension_numbers = #tpu.dot_dimension_numbers<[1], [0], [0], [1], [0, 0, 1, 1], [], []>} : vector<8x128xf32>, vector<128x128xf32>, vector<8x128xf32> -> vector<8x128xf32>
    %c0_22 = arith.constant 0 : index
    %c0_23 = arith.constant 0 : index
    %50 = vector.load %arg6[%c0_22, %c0_23] : memref<1x128xf32, #tpu.memory_space<vmem>>, vector<1x128xf32>
    %51 = vector.broadcast %50 : vector<1x128xf32> to vector<8x128xf32>
    %52 = arith.addf %49, %51 : vector<8x128xf32>
    %53 = arith.addf %1, %52 : vector<8x128xf32>
    %c0_24 = arith.constant 0 : index
    %c0_25 = arith.constant 0 : index
    %54 = vector.load %arg7[%c0_24, %c0_25] : memref<1x128xf32, #tpu.memory_space<vmem>>, vector<1x128xf32>
    %c0_26 = arith.constant 0 : index
    %c0_27 = arith.constant 0 : index
    %55 = vector.load %arg8[%c0_26, %c0_27] : memref<1x128xf32, #tpu.memory_space<vmem>>, vector<1x128xf32>
    %cst_28 = arith.constant dense<0.000000e+00> : vector<8xf32>
    %56 = vector.multi_reduction <add>, %53, %cst_28 [1] : vector<8x128xf32> to vector<8xf32>
    %57 = vector.shape_cast %56 : vector<8xf32> to vector<8x1xf32>
    %cst_29 = arith.constant 1.280000e+02 : f32
    %58 = vector.broadcast %cst_29 : f32 to vector<8x1xf32>
    %59 = arith.divf %57, %58 : vector<8x1xf32>
    %60 = vector.broadcast %59 : vector<8x1xf32> to vector<8x128xf32>
    %61 = arith.subf %53, %60 : vector<8x128xf32>
    %62 = arith.mulf %61, %61 : vector<8x128xf32>
    %cst_30 = arith.constant dense<0.000000e+00> : vector<8xf32>
    %63 = vector.multi_reduction <add>, %62, %cst_30 [1] : vector<8x128xf32> to vector<8xf32>
    %64 = vector.shape_cast %63 : vector<8xf32> to vector<8x1xf32>
    %cst_31 = arith.constant 1.280000e+02 : f32
    %65 = vector.broadcast %cst_31 : f32 to vector<8x1xf32>
    %66 = arith.divf %64, %65 : vector<8x1xf32>
    %67 = vector.broadcast %59 : vector<8x1xf32> to vector<8x128xf32>
    %68 = arith.subf %53, %67 : vector<8x128xf32>
    %cst_32 = arith.constant 9.99999996E-13 : f32
    %69 = vector.broadcast %cst_32 : f32 to vector<8x1xf32>
    %70 = arith.addf %66, %69 : vector<8x1xf32>
    %71 = math.rsqrt %70 : vector<8x1xf32>
    %72 = vector.broadcast %71 : vector<8x1xf32> to vector<8x128xf32>
    %73 = arith.mulf %68, %72 : vector<8x128xf32>
    %74 = vector.broadcast %54 : vector<1x128xf32> to vector<8x128xf32>
    %75 = arith.mulf %73, %74 : vector<8x128xf32>
    %76 = vector.broadcast %55 : vector<1x128xf32> to vector<8x128xf32>
    %77 = arith.addf %75, %76 : vector<8x128xf32>
    %c0_33 = arith.constant 0 : index
    %c0_34 = arith.constant 0 : index
    %78 = vector.load %arg9[%c0_33, %c0_34] : memref<128x256xf32, #tpu.memory_space<vmem>>, vector<128x256xf32>
    %cst_35 = arith.constant dense<0.000000e+00> : vector<8x256xf32>
    %79 = tpu.matmul %77, %78, %cst_35 {dimension_numbers = #tpu.dot_dimension_numbers<[1], [0], [0], [1], [0, 0, 1, 1], [], []>} : vector<8x128xf32>, vector<128x256xf32>, vector<8x256xf32> -> vector<8x256xf32>
    %c0_36 = arith.constant 0 : index
    %c0_37 = arith.constant 0 : index
    %80 = vector.load %arg10[%c0_36, %c0_37] : memref<1x256xf32, #tpu.memory_space<vmem>>, vector<1x256xf32>
    %81 = vector.broadcast %80 : vector<1x256xf32> to vector<8x256xf32>
    %82 = arith.addf %79, %81 : vector<8x256xf32>
    %cst_38 = arith.constant 5.000000e-01 : f32
    %83 = vector.broadcast %cst_38 : f32 to vector<8x256xf32>
    %84 = arith.mulf %83, %82 : vector<8x256xf32>
    %cst_39 = arith.constant 0.707106769 : f32
    %85 = vector.broadcast %cst_39 : f32 to vector<8x256xf32>
    %86 = arith.mulf %82, %85 : vector<8x256xf32>
    %87 = math.absf %86 : vector<8x256xf32>
    %cst_40 = arith.constant 0.327591091 : f32
    %88 = vector.broadcast %cst_40 : f32 to vector<8x256xf32>
    %89 = arith.mulf %88, %87 : vector<8x256xf32>
    %cst_41 = arith.constant 1.000000e+00 : f32
    %90 = vector.broadcast %cst_41 : f32 to vector<8x256xf32>
    %91 = arith.addf %90, %89 : vector<8x256xf32>
    %cst_42 = arith.constant 1.000000e+00 : f32
    %92 = vector.broadcast %cst_42 : f32 to vector<8x256xf32>
    %93 = arith.divf %92, %91 : vector<8x256xf32>
    %cst_43 = arith.constant 1.06140542 : f32
    %94 = vector.broadcast %cst_43 : f32 to vector<8x256xf32>
    %95 = arith.mulf %94, %93 : vector<8x256xf32>
    %cst_44 = arith.constant -1.45315206 : f32
    %96 = vector.broadcast %cst_44 : f32 to vector<8x256xf32>
    %97 = arith.addf %95, %96 : vector<8x256xf32>
    %98 = arith.mulf %97, %93 : vector<8x256xf32>
    %cst_45 = arith.constant 1.42141378 : f32
    %99 = vector.broadcast %cst_45 : f32 to vector<8x256xf32>
    %100 = arith.addf %98, %99 : vector<8x256xf32>
    %101 = arith.mulf %100, %93 : vector<8x256xf32>
    %cst_46 = arith.constant -0.284496725 : f32
    %102 = vector.broadcast %cst_46 : f32 to vector<8x256xf32>
    %103 = arith.addf %101, %102 : vector<8x256xf32>
    %104 = arith.mulf %103, %93 : vector<8x256xf32>
    %cst_47 = arith.constant 0.254829586 : f32
    %105 = vector.broadcast %cst_47 : f32 to vector<8x256xf32>
    %106 = arith.addf %104, %105 : vector<8x256xf32>
    %107 = arith.mulf %106, %93 : vector<8x256xf32>
    %108 = arith.mulf %87, %87 : vector<8x256xf32>
    %cst_48 = arith.constant 0.000000e+00 : f32
    %109 = vector.broadcast %cst_48 : f32 to vector<8x256xf32>
    %110 = arith.subf %109, %108 : vector<8x256xf32>
    %111 = math.exp %110 : vector<8x256xf32>
    %112 = arith.mulf %107, %111 : vector<8x256xf32>
    %cst_49 = arith.constant 1.000000e+00 : f32
    %113 = vector.broadcast %cst_49 : f32 to vector<8x256xf32>
    %114 = arith.subf %113, %112 : vector<8x256xf32>
    %cst_50 = arith.constant 0.000000e+00 : f32
    %115 = vector.broadcast %cst_50 : f32 to vector<8x256xf32>
    %116 = arith.cmpf oge, %86, %115 : vector<8x256xf32>
    %cst_51 = arith.constant 0.000000e+00 : f32
    %117 = vector.broadcast %cst_51 : f32 to vector<8x256xf32>
    %118 = arith.subf %117, %114 : vector<8x256xf32>
    %119 = arith.select %116, %114, %118 : vector<8x256xi1>, vector<8x256xf32>
    %cst_52 = arith.constant 1.000000e+00 : f32
    %120 = vector.broadcast %cst_52 : f32 to vector<8x256xf32>
    %121 = arith.addf %120, %119 : vector<8x256xf32>
    %122 = arith.mulf %84, %121 : vector<8x256xf32>
    %c0_53 = arith.constant 0 : index
    %c0_54 = arith.constant 0 : index
    %123 = vector.load %arg11[%c0_53, %c0_54] : memref<256x128xf32, #tpu.memory_space<vmem>>, vector<256x128xf32>
    %cst_55 = arith.constant dense<0.000000e+00> : vector<8x128xf32>
    %124 = tpu.matmul %122, %123, %cst_55 {dimension_numbers = #tpu.dot_dimension_numbers<[1], [0], [0], [1], [0, 0, 1, 1], [], []>} : vector<8x256xf32>, vector<256x128xf32>, vector<8x128xf32> -> vector<8x128xf32>
    %c0_56 = arith.constant 0 : index
    %c0_57 = arith.constant 0 : index
    %125 = vector.load %arg12[%c0_56, %c0_57] : memref<1x128xf32, #tpu.memory_space<vmem>>, vector<1x128xf32>
    %126 = vector.broadcast %125 : vector<1x128xf32> to vector<8x128xf32>
    %127 = arith.addf %124, %126 : vector<8x128xf32>
    %128 = arith.addf %77, %127 : vector<8x128xf32>
    %c0_58 = arith.constant 0 : index
    %c0_59 = arith.constant 0 : index
    %129 = vector.load %arg13[%c0_58, %c0_59] : memref<1x128xf32, #tpu.memory_space<vmem>>, vector<1x128xf32>
    %c0_60 = arith.constant 0 : index
    %c0_61 = arith.constant 0 : index
    %130 = vector.load %arg14[%c0_60, %c0_61] : memref<1x128xf32, #tpu.memory_space<vmem>>, vector<1x128xf32>
    %cst_62 = arith.constant dense<0.000000e+00> : vector<8xf32>
    %131 = vector.multi_reduction <add>, %128, %cst_62 [1] : vector<8x128xf32> to vector<8xf32>
    %132 = vector.shape_cast %131 : vector<8xf32> to vector<8x1xf32>
    %cst_63 = arith.constant 1.280000e+02 : f32
    %133 = vector.broadcast %cst_63 : f32 to vector<8x1xf32>
    %134 = arith.divf %132, %133 : vector<8x1xf32>
    %135 = vector.broadcast %134 : vector<8x1xf32> to vector<8x128xf32>
    %136 = arith.subf %128, %135 : vector<8x128xf32>
    %137 = arith.mulf %136, %136 : vector<8x128xf32>
    %cst_64 = arith.constant dense<0.000000e+00> : vector<8xf32>
    %138 = vector.multi_reduction <add>, %137, %cst_64 [1] : vector<8x128xf32> to vector<8xf32>
    %139 = vector.shape_cast %138 : vector<8xf32> to vector<8x1xf32>
    %cst_65 = arith.constant 1.280000e+02 : f32
    %140 = vector.broadcast %cst_65 : f32 to vector<8x1xf32>
    %141 = arith.divf %139, %140 : vector<8x1xf32>
    %142 = vector.broadcast %134 : vector<8x1xf32> to vector<8x128xf32>
    %143 = arith.subf %128, %142 : vector<8x128xf32>
    %cst_66 = arith.constant 9.99999996E-13 : f32
    %144 = vector.broadcast %cst_66 : f32 to vector<8x1xf32>
    %145 = arith.addf %141, %144 : vector<8x1xf32>
    %146 = math.rsqrt %145 : vector<8x1xf32>
    %147 = vector.broadcast %146 : vector<8x1xf32> to vector<8x128xf32>
    %148 = arith.mulf %143, %147 : vector<8x128xf32>
    %149 = vector.broadcast %129 : vector<1x128xf32> to vector<8x128xf32>
    %150 = arith.mulf %148, %149 : vector<8x128xf32>
    %151 = vector.broadcast %130 : vector<1x128xf32> to vector<8x128xf32>
    %152 = arith.addf %150, %151 : vector<8x128xf32>
    %c0_67 = arith.constant 0 : index
    %c0_68 = arith.constant 0 : index
    %c0_69 = arith.constant 0 : index
    %153 = vector.load %arg15[%c0_67, %c0_68, %c0_69] : memref<1x8x128xf32, #tpu.memory_space<vmem>>, vector<1x8x128xf32>
    %154 = vector.shape_cast %153 : vector<1x8x128xf32> to vector<8x128xf32>
    %155 = vector.shape_cast %152 : vector<8x128xf32> to vector<1x8x128xf32>
    tpu.vector_store %arg15[%c0_67, %c0_68, %c0_69], %155 {strides = array<i32>} : memref<1x8x128xf32, #tpu.memory_space<vmem>>, vector<1x8x128xf32>,
    return
  }
  func.func @transform_0(%arg0: i32) -> (i32, i32, i32) {
    %c0_i32 = arith.constant 0 : i32
    %c0_i32_0 = arith.constant 0 : i32
    %c0_i32_1 = arith.constant 0 : i32
    return %arg0, %c0_i32, %c0_i32_0 : i32, i32, i32
  }
  func.func @transform_1(%arg0: i32) -> (i32, i32, i32) {
    %c0_i32 = arith.constant 0 : i32
    %c0_i32_0 = arith.constant 0 : i32
    %c0_i32_1 = arith.constant 0 : i32
    return %arg0, %c0_i32, %c0_i32_0 : i32, i32, i32
  }
  func.func @transform_2(%arg0: i32) -> (i32, i32) {
    %c0_i32 = arith.constant 0 : i32
    %c0_i32_0 = arith.constant 0 : i32
    %c0_i32_1 = arith.constant 0 : i32
    return %c0_i32, %c0_i32_0 : i32, i32
  }
  func.func @transform_3(%arg0: i32) -> (i32, i32) {
    %c0_i32 = arith.constant 0 : i32
    %c0_i32_0 = arith.constant 0 : i32
    %c0_i32_1 = arith.constant 0 : i32
    return %c0_i32, %c0_i32_0 : i32, i32
  }
  func.func @transform_4(%arg0: i32) -> (i32, i32) {
    %c0_i32 = arith.constant 0 : i32
    %c0_i32_0 = arith.constant 0 : i32
    %c0_i32_1 = arith.constant 0 : i32
    return %c0_i32, %c0_i32_0 : i32, i32
  }
  func.func @transform_5(%arg0: i32) -> (i32, i32) {
    %c0_i32 = arith.constant 0 : i32
    %c0_i32_0 = arith.constant 0 : i32
    %c0_i32_1 = arith.constant 0 : i32
    return %c0_i32, %c0_i32_0 : i32, i32
  }
  func.func @transform_6(%arg0: i32) -> (i32, i32) {
    %c0_i32 = arith.constant 0 : i32
    %c0_i32_0 = arith.constant 0 : i32
    %c0_i32_1 = arith.constant 0 : i32
    return %c0_i32, %c0_i32_0 : i32, i32
  }
  func.func @transform_7(%arg0: i32) -> (i32, i32) {
    %c0_i32 = arith.constant 0 : i32
    %c0_i32_0 = arith.constant 0 : i32
    %c0_i32_1 = arith.constant 0 : i32
    return %c0_i32, %c0_i32_0 : i32, i32
  }
  func.func @transform_8(%arg0: i32) -> (i32, i32) {
    %c0_i32 = arith.constant 0 : i32
    %c0_i32_0 = arith.constant 0 : i32
    %c0_i32_1 = arith.constant 0 : i32
    return %c0_i32, %c0_i32_0 : i32, i32
  }
  func.func @transform_9(%arg0: i32) -> (i32, i32) {
    %c0_i32 = arith.constant 0 : i32
    %c0_i32_0 = arith.constant 0 : i32
    %c0_i32_1 = arith.constant 0 : i32
    return %c0_i32, %c0_i32_0 : i32, i32
  }
  func.func @transform_10(%arg0: i32) -> (i32, i32) {
    %c0_i32 = arith.constant 0 : i32
    %c0_i32_0 = arith.constant 0 : i32
    %c0_i32_1 = arith.constant 0 : i32
    return %c0_i32, %c0_i32_0 : i32, i32
  }
  func.func @transform_11(%arg0: i32) -> (i32, i32) {
    %c0_i32 = arith.constant 0 : i32
    %c0_i32_0 = arith.constant 0 : i32
    %c0_i32_1 = arith.constant 0 : i32
    return %c0_i32, %c0_i32_0 : i32, i32
  }
  func.func @transform_12(%arg0: i32) -> (i32, i32) {
    %c0_i32 = arith.constant 0 : i32
    %c0_i32_0 = arith.constant 0 : i32
    %c0_i32_1 = arith.constant 0 : i32
    return %c0_i32, %c0_i32_0 : i32, i32
  }
  func.func @transform_13(%arg0: i32) -> (i32, i32) {
    %c0_i32 = arith.constant 0 : i32
    %c0_i32_0 = arith.constant 0 : i32
    %c0_i32_1 = arith.constant 0 : i32
    return %c0_i32, %c0_i32_0 : i32, i32
  }
  func.func @transform_14(%arg0: i32) -> (i32, i32, i32) {
    %c0_i32 = arith.constant 0 : i32
    %c0_i32_0 = arith.constant 0 : i32
    %c0_i32_1 = arith.constant 0 : i32
    return %arg0, %c0_i32, %c0_i32_0 : i32, i32, i32
  }
}

module attributes {stable_mosaic.version = 11 : i64} {
  func.func @_encoder_layer_kernel(%arg0: i32, %arg1: memref<1x8x128xf32, #tpu.memory_space<vmem>>, %arg2: memref<1x1x8xf32, #tpu.memory_space<vmem>>, %arg3: memref<128x384xf32, #tpu.memory_space<vmem>>, %arg4: memref<1x384xf32, #tpu.memory_space<vmem>>, %arg5: memref<128x128xf32, #tpu.memory_space<vmem>>, %arg6: memref<1x128xf32, #tpu.memory_space<vmem>>, %arg7: memref<1x128xf32, #tpu.memory_space<vmem>>, %arg8: memref<1x128xf32, #tpu.memory_space<vmem>>, %arg9: memref<128x256xf32, #tpu.memory_space<vmem>>, %arg10: memref<1x256xf32, #tpu.memory_space<vmem>>, %arg11: memref<256x128xf32, #tpu.memory_space<vmem>>, %arg12: memref<1x128xf32, #tpu.memory_space<vmem>>, %arg13: memref<1x128xf32, #tpu.memory_space<vmem>>, %arg14: memref<1x128xf32, #tpu.memory_space<vmem>>, %arg15: memref<1x8x128xf32, #tpu.memory_space<vmem>>) attributes {dimension_semantics = [#tpu.dimension_semantics<parallel>], iteration_bounds = array<i64: 2>, scalar_prefetch = 0 : i64, scratch_operands = 0 : i64, tpu.core_type = #tpu.core_type<tc>, window_params = [{transform_indices = @transform_0, window_bounds = array<i64: 1, 8, 128>}, {transform_indices = @transform_1, window_bounds = array<i64: 1, 1, 8>}, {pipeline_mode = #tpu.pipeline_mode<synchronous>, transform_indices = @transform_2, window_bounds = array<i64: 128, 384>}, {pipeline_mode = #tpu.pipeline_mode<synchronous>, transform_indices = @transform_3, window_bounds = array<i64: 1, 384>}, {pipeline_mode = #tpu.pipeline_mode<synchronous>, transform_indices = @transform_4, window_bounds = array<i64: 128, 128>}, {pipeline_mode = #tpu.pipeline_mode<synchronous>, transform_indices = @transform_5, window_bounds = array<i64: 1, 128>}, {pipeline_mode = #tpu.pipeline_mode<synchronous>, transform_indices = @transform_6, window_bounds = array<i64: 1, 128>}, {pipeline_mode = #tpu.pipeline_mode<synchronous>, transform_indices = @transform_7, window_bounds = array<i64: 1, 128>}, {pipeline_mode = #tpu.pipeline_mode<synchronous>, transform_indices = @transform_8, window_bounds = array<i64: 128, 256>}, {pipeline_mode = #tpu.pipeline_mode<synchronous>, transform_indices = @transform_9, window_bounds = array<i64: 1, 256>}, {pipeline_mode = #tpu.pipeline_mode<synchronous>, transform_indices = @transform_10, window_bounds = array<i64: 256, 128>}, {pipeline_mode = #tpu.pipeline_mode<synchronous>, transform_indices = @transform_11, window_bounds = array<i64: 1, 128>}, {pipeline_mode = #tpu.pipeline_mode<synchronous>, transform_indices = @transform_12, window_bounds = array<i64: 1, 128>}, {pipeline_mode = #tpu.pipeline_mode<synchronous>, transform_indices = @transform_13, window_bounds = array<i64: 1, 128>}, {transform_indices = @transform_14, window_bounds = array<i64: 1, 8, 128>}]} {
    %c0 = arith.constant 0 : index
    %c0_0 = arith.constant 0 : index
    %c0_1 = arith.constant 0 : index
    %0 = vector.load %arg1[%c0, %c0_0, %c0_1] : memref<1x8x128xf32, #tpu.memory_space<vmem>>, vector<1x8x128xf32>
    %1 = vector.shape_cast %0 : vector<1x8x128xf32> to vector<8x128xf32>
    %c0_2 = arith.constant 0 : index
    %c0_3 = arith.constant 0 : index
    %c0_4 = arith.constant 0 : index
    %2 = vector.load %arg2[%c0_2, %c0_3, %c0_4] : memref<1x1x8xf32, #tpu.memory_space<vmem>>, vector<1x1x8xf32>
    %3 = vector.shape_cast %2 : vector<1x1x8xf32> to vector<1x8xf32>
    %c0_5 = arith.constant 0 : index
    %c0_6 = arith.constant 0 : index
    %4 = vector.load %arg3[%c0_5, %c0_6] : memref<128x384xf32, #tpu.memory_space<vmem>>, vector<128x384xf32>
    %cst = arith.constant dense<0.000000e+00> : vector<8x384xf32>
    %5 = tpu.matmul %1, %4, %cst {dimension_numbers = #tpu.dot_dimension_numbers<[1], [0], [0], [1], [0, 0, 1, 1], [], []>} : vector<8x128xf32>, vector<128x384xf32>, vector<8x384xf32> -> vector<8x384xf32>
    %c0_7 = arith.constant 0 : index
    %c0_8 = arith.constant 0 : index
    %6 = vector.load %arg4[%c0_7, %c0_8] : memref<1x384xf32, #tpu.memory_space<vmem>>, vector<1x384xf32>
    %7 = vector.broadcast %6 : vector<1x384xf32> to vector<8x384xf32>
    %8 = arith.addf %5, %7 : vector<8x384xf32>
    %9 = vector.extract_strided_slice %8 {offsets = [0, 0], sizes = [8, 64], strides = [1, 1]} : vector<8x384xf32> to vector<8x64xf32>
    %10 = vector.extract_strided_slice %8 {offsets = [0, 128], sizes = [8, 64], strides = [1, 1]} : vector<8x384xf32> to vector<8x64xf32>
    %11 = vector.extract_strided_slice %8 {offsets = [0, 256], sizes = [8, 64], strides = [1, 1]} : vector<8x384xf32> to vector<8x64xf32>
    %cst_9 = arith.constant dense<0.000000e+00> : vector<8x8xf32>
    %12 = tpu.matmul %9, %10, %cst_9 {dimension_numbers = #tpu.dot_dimension_numbers<[1], [1], [0], [0], [0, 0, 1, 0], [], []>} : vector<8x64xf32>, vector<8x64xf32>, vector<8x8xf32> -> vector<8x8xf32>
    %cst_10 = arith.constant 1.250000e-01 : f32
    %13 = vector.broadcast %cst_10 : f32 to vector<8x8xf32>
    %14 = arith.mulf %12, %13 : vector<8x8xf32>
    %15 = vector.broadcast %3 : vector<1x8xf32> to vector<8x8xf32>
    %16 = arith.addf %14, %15 : vector<8x8xf32>
    %cst_11 = arith.constant dense<0xFF800000> : vector<8xf32>
    %17 = vector.multi_reduction <maximumf>, %16, %cst_11 [1] : vector<8x8xf32> to vector<8xf32>
    %18 = vector.shape_cast %17 : vector<8xf32> to vector<8x1xf32>
    %19 = vector.broadcast %18 : vector<8x1xf32> to vector<8x8xf32>
    %20 = arith.subf %16, %19 : vector<8x8xf32>
    %21 = math.exp %20 : vector<8x8xf32>
    %cst_12 = arith.constant dense<0.000000e+00> : vector<8xf32>
    %22 = vector.multi_reduction <add>, %21, %cst_12 [1] : vector<8x8xf32> to vector<8xf32>
    %23 = vector.shape_cast %22 : vector<8xf32> to vector<8x1xf32>
    %24 = tpu.reciprocal %23 {approx = true} : vector<8x1xf32> -> vector<8x1xf32>
    %25 = vector.broadcast %24 : vector<8x1xf32> to vector<8x8xf32>
    %26 = arith.mulf %21, %25 : vector<8x8xf32>
    %cst_13 = arith.constant dense<0.000000e+00> : vector<8x64xf32>
    %27 = tpu.matmul %26, %11, %cst_13 {dimension_numbers = #tpu.dot_dimension_numbers<[1], [0], [0], [1], [0, 0, 1, 1], [], []>} : vector<8x8xf32>, vector<8x64xf32>, vector<8x64xf32> -> vector<8x64xf32>
    %28 = vector.extract_strided_slice %8 {offsets = [0, 64], sizes = [8, 64], strides = [1, 1]} : vector<8x384xf32> to vector<8x64xf32>
    %29 = vector.extract_strided_slice %8 {offsets = [0, 192], sizes = [8, 64], strides = [1, 1]} : vector<8x384xf32> to vector<8x64xf32>
    %30 = vector.extract_strided_slice %8 {offsets = [0, 320], sizes = [8, 64], strides = [1, 1]} : vector<8x384xf32> to vector<8x64xf32>
    %cst_14 = arith.constant dense<0.000000e+00> : vector<8x8xf32>
    %31 = tpu.matmul %28, %29, %cst_14 {dimension_numbers = #tpu.dot_dimension_numbers<[1], [1], [0], [0], [0, 0, 1, 0], [], []>} : vector<8x64xf32>, vector<8x64xf32>, vector<8x8xf32> -> vector<8x8xf32>
    %cst_15 = arith.constant 1.250000e-01 : f32
    %32 = vector.broadcast %cst_15 : f32 to vector<8x8xf32>
    %33 = arith.mulf %31, %32 : vector<8x8xf32>
    %34 = vector.broadcast %3 : vector<1x8xf32> to vector<8x8xf32>
    %35 = arith.addf %33, %34 : vector<8x8xf32>
    %cst_16 = arith.constant dense<0xFF800000> : vector<8xf32>
    %36 = vector.multi_reduction <maximumf>, %35, %cst_16 [1] : vector<8x8xf32> to vector<8xf32>
    %37 = vector.shape_cast %36 : vector<8xf32> to vector<8x1xf32>
    %38 = vector.broadcast %37 : vector<8x1xf32> to vector<8x8xf32>
    %39 = arith.subf %35, %38 : vector<8x8xf32>
    %40 = math.exp %39 : vector<8x8xf32>
    %cst_17 = arith.constant dense<0.000000e+00> : vector<8xf32>
    %41 = vector.multi_reduction <add>, %40, %cst_17 [1] : vector<8x8xf32> to vector<8xf32>
    %42 = vector.shape_cast %41 : vector<8xf32> to vector<8x1xf32>
    %43 = tpu.reciprocal %42 {approx = true} : vector<8x1xf32> -> vector<8x1xf32>
    %44 = vector.broadcast %43 : vector<8x1xf32> to vector<8x8xf32>
    %45 = arith.mulf %40, %44 : vector<8x8xf32>
    %cst_18 = arith.constant dense<0.000000e+00> : vector<8x64xf32>
    %46 = tpu.matmul %45, %30, %cst_18 {dimension_numbers = #tpu.dot_dimension_numbers<[1], [0], [0], [1], [0, 0, 1, 1], [], []>} : vector<8x8xf32>, vector<8x64xf32>, vector<8x64xf32> -> vector<8x64xf32>
    %47 = tpu.concatenate %27, %46 in 1 : vector<8x64xf32>, vector<8x64xf32> -> vector<8x128xf32>
    %c0_19 = arith.constant 0 : index
    %c0_20 = arith.constant 0 : index
    %48 = vector.load %arg5[%c0_19, %c0_20] : memref<128x128xf32, #tpu.memory_space<vmem>>, vector<128x128xf32>
    %cst_21 = arith.constant dense<0.000000e+00> : vector<8x128xf32>
    %49 = tpu.matmul %47, %48, %cst_21 {dimension_numbers = #tpu.dot_dimension_numbers<[1], [0], [0], [1], [0, 0, 1, 1], [], []>} : vector<8x128xf32>, vector<128x128xf32>, vector<8x128xf32> -> vector<8x128xf32>
    %c0_22 = arith.constant 0 : index
    %c0_23 = arith.constant 0 : index
    %50 = vector.load %arg6[%c0_22, %c0_23] : memref<1x128xf32, #tpu.memory_space<vmem>>, vector<1x128xf32>
    %51 = vector.broadcast %50 : vector<1x128xf32> to vector<8x128xf32>
    %52 = arith.addf %49, %51 : vector<8x128xf32>
    %53 = arith.addf %1, %52 : vector<8x128xf32>
    %c0_24 = arith.constant 0 : index
    %c0_25 = arith.constant 0 : index
    %54 = vector.load %arg7[%c0_24, %c0_25] : memref<1x128xf32, #tpu.memory_space<vmem>>, vector<1x128xf32>
    %c0_26 = arith.constant 0 : index
    %c0_27 = arith.constant 0 : index
    %55 = vector.load %arg8[%c0_26, %c0_27] : memref<1x128xf32, #tpu.memory_space<vmem>>, vector<1x128xf32>
    %cst_28 = arith.constant dense<0.000000e+00> : vector<8xf32>
    %56 = vector.multi_reduction <add>, %53, %cst_28 [1] : vector<8x128xf32> to vector<8xf32>
    %57 = vector.shape_cast %56 : vector<8xf32> to vector<8x1xf32>
    %cst_29 = arith.constant 1.280000e+02 : f32
    %58 = vector.broadcast %cst_29 : f32 to vector<8x1xf32>
    %59 = arith.divf %57, %58 : vector<8x1xf32>
    %60 = vector.broadcast %59 : vector<8x1xf32> to vector<8x128xf32>
    %61 = arith.subf %53, %60 : vector<8x128xf32>
    %62 = arith.mulf %61, %61 : vector<8x128xf32>
    %cst_30 = arith.constant dense<0.000000e+00> : vector<8xf32>
    %63 = vector.multi_reduction <add>, %62, %cst_30 [1] : vector<8x128xf32> to vector<8xf32>
    %64 = vector.shape_cast %63 : vector<8xf32> to vector<8x1xf32>
    %cst_31 = arith.constant 1.280000e+02 : f32
    %65 = vector.broadcast %cst_31 : f32 to vector<8x1xf32>
    %66 = arith.divf %64, %65 : vector<8x1xf32>
    %67 = vector.broadcast %59 : vector<8x1xf32> to vector<8x128xf32>
    %68 = arith.subf %53, %67 : vector<8x128xf32>
    %cst_32 = arith.constant 9.99999996E-13 : f32
    %69 = vector.broadcast %cst_32 : f32 to vector<8x1xf32>
    %70 = arith.addf %66, %69 : vector<8x1xf32>
    %71 = math.rsqrt %70 : vector<8x1xf32>
    %72 = vector.broadcast %71 : vector<8x1xf32> to vector<8x128xf32>
    %73 = arith.mulf %68, %72 : vector<8x128xf32>
    %74 = vector.broadcast %54 : vector<1x128xf32> to vector<8x128xf32>
    %75 = arith.mulf %73, %74 : vector<8x128xf32>
    %76 = vector.broadcast %55 : vector<1x128xf32> to vector<8x128xf32>
    %77 = arith.addf %75, %76 : vector<8x128xf32>
    %c0_33 = arith.constant 0 : index
    %c0_34 = arith.constant 0 : index
    %78 = vector.load %arg9[%c0_33, %c0_34] : memref<128x256xf32, #tpu.memory_space<vmem>>, vector<128x256xf32>
    %cst_35 = arith.constant dense<0.000000e+00> : vector<8x256xf32>
    %79 = tpu.matmul %77, %78, %cst_35 {dimension_numbers = #tpu.dot_dimension_numbers<[1], [0], [0], [1], [0, 0, 1, 1], [], []>} : vector<8x128xf32>, vector<128x256xf32>, vector<8x256xf32> -> vector<8x256xf32>
    %c0_36 = arith.constant 0 : index
    %c0_37 = arith.constant 0 : index
    %80 = vector.load %arg10[%c0_36, %c0_37] : memref<1x256xf32, #tpu.memory_space<vmem>>, vector<1x256xf32>
    %81 = vector.broadcast %80 : vector<1x256xf32> to vector<8x256xf32>
    %82 = arith.addf %79, %81 : vector<8x256xf32>
    %cst_38 = arith.constant 5.000000e-01 : f32
    %83 = vector.broadcast %cst_38 : f32 to vector<8x256xf32>
    %84 = arith.mulf %83, %82 : vector<8x256xf32>
    %cst_39 = arith.constant 0.707106769 : f32
    %85 = vector.broadcast %cst_39 : f32 to vector<8x256xf32>
    %86 = arith.mulf %82, %85 : vector<8x256xf32>
    %87 = math.absf %86 : vector<8x256xf32>
    %cst_40 = arith.constant 0.327591091 : f32
    %88 = vector.broadcast %cst_40 : f32 to vector<8x256xf32>
    %89 = arith.mulf %88, %87 : vector<8x256xf32>
    %cst_41 = arith.constant 1.000000e+00 : f32
    %90 = vector.broadcast %cst_41 : f32 to vector<8x256xf32>
    %91 = arith.addf %90, %89 : vector<8x256xf32>
    %cst_42 = arith.constant 1.000000e+00 : f32
    %92 = vector.broadcast %cst_42 : f32 to vector<8x256xf32>
    %93 = arith.divf %92, %91 : vector<8x256xf32>
    %cst_43 = arith.constant 1.06140542 : f32
    %94 = vector.broadcast %cst_43 : f32 to vector<8x256xf32>
    %95 = arith.mulf %94, %93 : vector<8x256xf32>
    %cst_44 = arith.constant -1.45315206 : f32
    %96 = vector.broadcast %cst_44 : f32 to vector<8x256xf32>
    %97 = arith.addf %95, %96 : vector<8x256xf32>
    %98 = arith.mulf %97, %93 : vector<8x256xf32>
    %cst_45 = arith.constant 1.42141378 : f32
    %99 = vector.broadcast %cst_45 : f32 to vector<8x256xf32>
    %100 = arith.addf %98, %99 : vector<8x256xf32>
    %101 = arith.mulf %100, %93 : vector<8x256xf32>
    %cst_46 = arith.constant -0.284496725 : f32
    %102 = vector.broadcast %cst_46 : f32 to vector<8x256xf32>
    %103 = arith.addf %101, %102 : vector<8x256xf32>
    %104 = arith.mulf %103, %93 : vector<8x256xf32>
    %cst_47 = arith.constant 0.254829586 : f32
    %105 = vector.broadcast %cst_47 : f32 to vector<8x256xf32>
    %106 = arith.addf %104, %105 : vector<8x256xf32>
    %107 = arith.mulf %106, %93 : vector<8x256xf32>
    %108 = arith.mulf %87, %87 : vector<8x256xf32>
    %cst_48 = arith.constant 0.000000e+00 : f32
    %109 = vector.broadcast %cst_48 : f32 to vector<8x256xf32>
    %110 = arith.subf %109, %108 : vector<8x256xf32>
    %111 = math.exp %110 : vector<8x256xf32>
    %112 = arith.mulf %107, %111 : vector<8x256xf32>
    %cst_49 = arith.constant 1.000000e+00 : f32
    %113 = vector.broadcast %cst_49 : f32 to vector<8x256xf32>
    %114 = arith.subf %113, %112 : vector<8x256xf32>
    %cst_50 = arith.constant 0.000000e+00 : f32
    %115 = vector.broadcast %cst_50 : f32 to vector<8x256xf32>
    %116 = arith.cmpf oge, %86, %115 : vector<8x256xf32>
    %cst_51 = arith.constant 0.000000e+00 : f32
    %117 = vector.broadcast %cst_51 : f32 to vector<8x256xf32>
    %118 = arith.subf %117, %114 : vector<8x256xf32>
    %119 = arith.select %116, %114, %118 : vector<8x256xi1>, vector<8x256xf32>
    %cst_52 = arith.constant 1.000000e+00 : f32
    %120 = vector.broadcast %cst_52 : f32 to vector<8x256xf32>
    %121 = arith.addf %120, %119 : vector<8x256xf32>
    %122 = arith.mulf %84, %121 : vector<8x256xf32>
    %c0_53 = arith.constant 0 : index
    %c0_54 = arith.constant 0 : index
    %123 = vector.load %arg11[%c0_53, %c0_54] : memref<256x128xf32, #tpu.memory_space<vmem>>, vector<256x128xf32>
    %cst_55 = arith.constant dense<0.000000e+00> : vector<8x128xf32>
    %124 = tpu.matmul %122, %123, %cst_55 {dimension_numbers = #tpu.dot_dimension_numbers<[1], [0], [0], [1], [0, 0, 1, 1], [], []>} : vector<8x256xf32>, vector<256x128xf32>, vector<8x128xf32> -> vector<8x128xf32>
    %c0_56 = arith.constant 0 : index
    %c0_57 = arith.constant 0 : index
    %125 = vector.load %arg12[%c0_56, %c0_57] : memref<1x128xf32, #tpu.memory_space<vmem>>, vector<1x128xf32>
    %126 = vector.broadcast %125 : vector<1x128xf32> to vector<8x128xf32>
    %127 = arith.addf %124, %126 : vector<8x128xf32>
    %128 = arith.addf %77, %127 : vector<8x128xf32>
    %c0_58 = arith.constant 0 : index
    %c0_59 = arith.constant 0 : index
    %129 = vector.load %arg13[%c0_58, %c0_59] : memref<1x128xf32, #tpu.memory_space<vmem>>, vector<1x128xf32>
    %c0_60 = arith.constant 0 : index
    %c0_61 = arith.constant 0 : index
    %130 = vector.load %arg14[%c0_60, %c0_61] : memref<1x128xf32, #tpu.memory_space<vmem>>, vector<1x128xf32>
    %cst_62 = arith.constant dense<0.000000e+00> : vector<8xf32>
    %131 = vector.multi_reduction <add>, %128, %cst_62 [1] : vector<8x128xf32> to vector<8xf32>
    %132 = vector.shape_cast %131 : vector<8xf32> to vector<8x1xf32>
    %cst_63 = arith.constant 1.280000e+02 : f32
    %133 = vector.broadcast %cst_63 : f32 to vector<8x1xf32>
    %134 = arith.divf %132, %133 : vector<8x1xf32>
    %135 = vector.broadcast %134 : vector<8x1xf32> to vector<8x128xf32>
    %136 = arith.subf %128, %135 : vector<8x128xf32>
    %137 = arith.mulf %136, %136 : vector<8x128xf32>
    %cst_64 = arith.constant dense<0.000000e+00> : vector<8xf32>
    %138 = vector.multi_reduction <add>, %137, %cst_64 [1] : vector<8x128xf32> to vector<8xf32>
    %139 = vector.shape_cast %138 : vector<8xf32> to vector<8x1xf32>
    %cst_65 = arith.constant 1.280000e+02 : f32
    %140 = vector.broadcast %cst_65 : f32 to vector<8x1xf32>
    %141 = arith.divf %139, %140 : vector<8x1xf32>
    %142 = vector.broadcast %134 : vector<8x1xf32> to vector<8x128xf32>
    %143 = arith.subf %128, %142 : vector<8x128xf32>
    %cst_66 = arith.constant 9.99999996E-13 : f32
    %144 = vector.broadcast %cst_66 : f32 to vector<8x1xf32>
    %145 = arith.addf %141, %144 : vector<8x1xf32>
    %146 = math.rsqrt %145 : vector<8x1xf32>
    %147 = vector.broadcast %146 : vector<8x1xf32> to vector<8x128xf32>
    %148 = arith.mulf %143, %147 : vector<8x128xf32>
    %149 = vector.broadcast %129 : vector<1x128xf32> to vector<8x128xf32>
    %150 = arith.mulf %148, %149 : vector<8x128xf32>
    %151 = vector.broadcast %130 : vector<1x128xf32> to vector<8x128xf32>
    %152 = arith.addf %150, %151 : vector<8x128xf32>
    %c0_67 = arith.constant 0 : index
    %c0_68 = arith.constant 0 : index
    %c0_69 = arith.constant 0 : index
    %153 = vector.load %arg15[%c0_67, %c0_68, %c0_69] : memref<1x8x128xf32, #tpu.memory_space<vmem>>, vector<1x8x128xf32>
    %154 = vector.shape_cast %153 : vector<1x8x128xf32> to vector<8x128xf32>
    %155 = vector.shape_cast %152 : vector<8x128xf32> to vector<1x8x128xf32>
    tpu.vector_store %arg15[%c0_67, %c0_68, %c0_69], %155 {strides = array<i32>} : memref<1x8x128xf32, #tpu.memory_space<vmem>>, vector<1x8x128xf32>,
    return
  }
  func.func @transform_0(%arg0: i32) -> (i32, i32, i32) {
    %c0_i32 = arith.constant 0 : i32
    %c0_i32_0 = arith.constant 0 : i32
    %c0_i32_1 = arith.constant 0 : i32
    return %arg0, %c0_i32, %c0_i32_0 : i32, i32, i32
  }
  func.func @transform_1(%arg0: i32) -> (i32, i32, i32) {
    %c0_i32 = arith.constant 0 : i32
    %c0_i32_0 = arith.constant 0 : i32
    %c0_i32_1 = arith.constant 0 : i32
    return %arg0, %c0_i32, %c0_i32_0 : i32, i32, i32
  }
  func.func @transform_2(%arg0: i32) -> (i32, i32) {
    %c0_i32 = arith.constant 0 : i32
    %c0_i32_0 = arith.constant 0 : i32
    %c0_i32_1 = arith.constant 0 : i32
    return %c0_i32, %c0_i32_0 : i32, i32
  }
  func.func @transform_3(%arg0: i32) -> (i32, i32) {
    %c0_i32 = arith.constant 0 : i32
    %c0_i32_0 = arith.constant 0 : i32
    %c0_i32_1 = arith.constant 0 : i32
    return %c0_i32, %c0_i32_0 : i32, i32
  }
  func.func @transform_4(%arg0: i32) -> (i32, i32) {
    %c0_i32 = arith.constant 0 : i32
    %c0_i32_0 = arith.constant 0 : i32
    %c0_i32_1 = arith.constant 0 : i32
    return %c0_i32, %c0_i32_0 : i32, i32
  }
  func.func @transform_5(%arg0: i32) -> (i32, i32) {
    %c0_i32 = arith.constant 0 : i32
    %c0_i32_0 = arith.constant 0 : i32
    %c0_i32_1 = arith.constant 0 : i32
    return %c0_i32, %c0_i32_0 : i32, i32
  }
  func.func @transform_6(%arg0: i32) -> (i32, i32) {
    %c0_i32 = arith.constant 0 : i32
    %c0_i32_0 = arith.constant 0 : i32
    %c0_i32_1 = arith.constant 0 : i32
    return %c0_i32, %c0_i32_0 : i32, i32
  }
  func.func @transform_7(%arg0: i32) -> (i32, i32) {
    %c0_i32 = arith.constant 0 : i32
    %c0_i32_0 = arith.constant 0 : i32
    %c0_i32_1 = arith.constant 0 : i32
    return %c0_i32, %c0_i32_0 : i32, i32
  }
  func.func @transform_8(%arg0: i32) -> (i32, i32) {
    %c0_i32 = arith.constant 0 : i32
    %c0_i32_0 = arith.constant 0 : i32
    %c0_i32_1 = arith.constant 0 : i32
    return %c0_i32, %c0_i32_0 : i32, i32
  }
  func.func @transform_9(%arg0: i32) -> (i32, i32) {
    %c0_i32 = arith.constant 0 : i32
    %c0_i32_0 = arith.constant 0 : i32
    %c0_i32_1 = arith.constant 0 : i32
    return %c0_i32, %c0_i32_0 : i32, i32
  }
  func.func @transform_10(%arg0: i32) -> (i32, i32) {
    %c0_i32 = arith.constant 0 : i32
    %c0_i32_0 = arith.constant 0 : i32
    %c0_i32_1 = arith.constant 0 : i32
    return %c0_i32, %c0_i32_0 : i32, i32
  }
  func.func @transform_11(%arg0: i32) -> (i32, i32) {
    %c0_i32 = arith.constant 0 : i32
    %c0_i32_0 = arith.constant 0 : i32
    %c0_i32_1 = arith.constant 0 : i32
    return %c0_i32, %c0_i32_0 : i32, i32
  }
  func.func @transform_12(%arg0: i32) -> (i32, i32) {
    %c0_i32 = arith.constant 0 : i32
    %c0_i32_0 = arith.constant 0 : i32
    %c0_i32_1 = arith.constant 0 : i32
    return %c0_i32, %c0_i32_0 : i32, i32
  }
  func.func @transform_13(%arg0: i32) -> (i32, i32) {
    %c0_i32 = arith.constant 0 : i32
    %c0_i32_0 = arith.constant 0 : i32
    %c0_i32_1 = arith.constant 0 : i32
    return %c0_i32, %c0_i32_0 : i32, i32
  }
  func.func @transform_14(%arg0: i32) -> (i32, i32, i32) {
    %c0_i32 = arith.constant 0 : i32
    %c0_i32_0 = arith.constant 0 : i32
    %c0_i32_1 = arith.constant 0 : i32
    return %arg0, %c0_i32, %c0_i32_0 : i32, i32, i32
  }
}

</mosaic_0001>

<bundles_post_ra>
// kernel: news_clf_forward.4
= control target key start
LH: loop header
LB: loop body
LE: loop exit
PB: predicated region body
PF: predicated region fallthrough
CT: control target
= control target key end

     0   :  { %s298_s12 = smov 0   ;;  %s321_s0 = inlined_call_operand.vmem [shape: f32[16,128], index: 0, kind: input, shape index: {}]   ;;  %s322_s1 = inlined_call_operand.vmem [shape: f32[1,128], index: 1, kind: input, shape index: {}]   ;;  %s323_s2 = inlined_call_operand.vmem [shape: f32[1,128], index: 2, kind: input, shape index: {}]   ;;  %s324_s3 = inlined_call_operand.vmem [shape: f32[16,128], index: 3, kind: output, shape index: {}]  }
   0x1 LB: > { %s249_s13 = sadd.s32 4294967295, %s276_s12   ;;  %p253_p0 = scmp.ge.s32.totalorder %s276_s12, 1  ;;  %s276_s12 = sphi %s298_s12, %s13_s12  }
   0x2   : > { %p136_p1 = scmp.lt.s32.totalorder %s276_s12, 3 }
   0x4   : > { %p137_p2 = pnand %p253_p0, %p136_p1 }
   0x5   : > { %p158_p3 = scmp.lt.s32.totalorder (!%p137_p2), %s249_s13, 1  ;;  %v256_v9 = vld [vmem:[%s322_s1] ss:$0 sm:$0xff] (!%p137_p2) }
   0x6   : > { %140 = sbr.rel (%p137_p2) target bundleno = 329 (0x149), region = 32  ;;  %v257_v11 = vld [vmem:[%s323_s2] ss:$0 sm:$0xff] (!%p137_p2) }
   0xd   : > { %s326_s13 = smov (!%p158_p3, %s249_s13), 1 }
   0xe   : > { %s254_s14 = sshll.u32 %s326_s13, 3 }
   0xf   : > { %s161_s17 = scalar_lea.vmem %s321_s0, %s254_s14  ;;  %s165_s24 = scalar_lea.vmem %s324_s3, %s254_s14 }
  0x10   : > { %v166_v0 = vld [vmem:[%s161_s17] sm:$0xff] }
  0x11   : > { %169 = vadd.xlane.f32.xlu0 %v166_v0 }
  0x9e   : > { %v170_v1 = vpop.xlane.xlu0 %169 }
  0x9f   : > { %v172_v2 = vmul.f32 0.0078125, %v170_v1 }
  0xa1   : > { %v173_v3 = vsub.f32 %v166_v0, %v172_v2 }
  0xa3   : > { %v174_v4 = vmul.f32 %v173_v3, %v173_v3 }
  0xa5   : > { %175 = vadd.xlane.f32.xlu0 %v174_v4 }
 0x132   : > { %v176_v5 = vpop.xlane.xlu0 %175 }
 0x133   : > { %v177_v6 = vmul.f32 0.0078125, %v176_v5 }
 0x135   : > { %v178_v7 = vadd.f32 1e-12, %v177_v6 }
 0x137   : > { %268 = vrsqrt.f32 %v178_v7 }
 0x141   : > { %v269_v8 = vpop.eup %268 }
 0x142   : > { %v180_v10 = vmul.f32 %v269_v8, %v173_v3 }
 0x144   : > { %v187_v12 = vmul.f32 %v256_v9, %v180_v10 }
 0x146   : > { %v194_v13 = vadd.f32 %v257_v11, %v187_v12 }
 0x148   : > { %195 = vst [vmem:[%s165_s24] sm:$0xff] %v194_v13 }
 0x149 PF: > { %s13_s12 = sadd.s32 1, %s276_s12  }
 0x14a   : > { %p10_p4 = scmp.ge.s32.totalorder %s13_s12, 4  }
 0x14c   :  { %12 = sbr.rel (!%p10_p4) target bundleno = 1 (0x1), region = 62 }

// kernel: news_clf_forward.7
= control target key start
LH: loop header
LB: loop body
LE: loop exit
PB: predicated region body
PF: predicated region fallthrough
CT: control target
= control target key end

     0   :  { %v436_v3 = vmov 0.0|0.0   ;;  %vm437_vm0 = vmmov 0   ;;  %v438_v6 = vmov 0.0   ;;  %s603_s0 = inlined_call_operand.vmem [shape: f32[2,128], index: 0, kind: input, shape index: {}]   ;;  %s604_s1 = inlined_call_operand.vmem [shape: f32[128,128], index: 1, kind: input, shape index: {}]   ;;  %s605_s2 = inlined_call_operand.vmem [shape: f32[1,128], index: 2, kind: input, shape index: {}]   ;;  %s606_s3 = inlined_call_operand.vmem [shape: f32[128,128], index: 3, kind: input, shape index: {}]   ;;  %s607_s4 = inlined_call_operand.vmem [shape: f32[1,128], index: 4, kind: input, shape index: {}]   ;;  %s608_s5 = inlined_call_operand.hbm [shape: f32[2,128], index: 5, kind: output, shape index: {}]  }
   0x1   :  { %v22_v0 = vld [vmem:[%s604_s1] sm:$0xff]  ;;  %v23_v1 = vld [vmem:[%s604_s1 + $0x8] sm:$0xff]  ;;  %v24_v2 = vld [vmem:[%s604_s1 + $0x10] sm:$0xff]  ;;  %356 = vmatprep.subr.bf16.mxu0 %v436_v3  ;;  %318 = vmatprep.mubr.msk.f32.mxu0 %vm437_vm0, %v438_v6 }
   0x2   :  { %v357_v4 = vpack.c.bf16 %v23_v1, %v22_v0  ;;  %v25_v5 = vld [vmem:[%s604_s1 + $0x18] sm:$0xff]  ;;  %380 = vmatprep.subr.bf16.mxu1 %v436_v3  ;;  %353 = vmatprep.mubr.msk.f32.mxu1 %vm437_vm0, %v438_v6  ;;  %v26_v8 = vld [vmem:[%s604_s1 + $0x20] sm:$0xff]  ;;  %v27_v9 = vld [vmem:[%s604_s1 + $0x28] sm:$0xff] }
   0x3   :  { %v360_v7 = vpack.c.bf16 %v25_v5, %v24_v2 }
   0x4   :  { %358 = vmatpush3.bf16.msra.mxu0 %v357_v4 }
   0x5   :  { %359 = vmatprep.subr.bf16.mxu0 %v436_v3 }
   0x6   :  { %10 = vsyncpa [#allocation3], 0  ;;  %v363_v10 = vpack.c.bf16 %v27_v9, %v26_v8  ;;  %v28_v11 = vld [vmem:[%s604_s1 + $0x30] sm:$0xff]  ;;  %v29_v12 = vld [vmem:[%s604_s1 + $0x38] sm:$0xff]  ;;  %s439_s8 = smov [#allocation2]  }
   0x7   :  { %v366_v13 = vpack.c.bf16 %v29_v12, %v28_v11  ;;  %v30_v14 = vld [vmem:[%s604_s1 + $0x40] sm:$0xff]  ;;  %v31_v15 = vld [vmem:[%s604_s1 + $0x48] sm:$0xff]  ;;  %v32_v17 = vld [vmem:[%s604_s1 + $0x50] sm:$0xff] }
   0x8   :  { %361 = vmatpush3.bf16.msra.mxu0 %v360_v7  ;;  %v369_v16 = vpack.c.bf16 %v31_v15, %v30_v14  ;;  %v33_v18 = vld [vmem:[%s604_s1 + $0x58] sm:$0xff]  ;;  %v34_v20 = vld [vmem:[%s604_s1 + $0x60] sm:$0xff]  ;;  %v35_v21 = vld [vmem:[%s604_s1 + $0x68] sm:$0xff] }
   0x9   :  { %362 = vmatprep.subr.bf16.mxu0 %v436_v3  ;;  %v372_v19 = vpack.c.bf16 %v33_v18, %v32_v17  ;;  %v375_v22 = vpack.c.bf16 %v35_v21, %v34_v20  ;;  %v36_v23 = vld [vmem:[%s604_s1 + $0x70] sm:$0xff]  ;;  %v37_v24 = vld [vmem:[%s604_s1 + $0x78] sm:$0xff]  ;;  %v21_v26 = vld [vmem:[%s603_s0] sm:$0x3]  ;;  %s242_s0 = sshll.u32 %s439_s8, 4  ;;  %s243_s0 = int_to_ptr.vmem [resolvable:$true] %s242_s0 }
   0xa   :  { %v378_v25 = vpack.c.bf16 %v37_v24, %v36_v23  ;;  %v142_v27 = vld [vmem:[%s606_s3] sm:$0xff]  ;;  %v143_v28 = vld [vmem:[%s606_s3 + $0x8] sm:$0xff]  ;;  %v144_v29 = vld [vmem:[%s606_s3 + $0x10] sm:$0xff]  ;;  %s412_s9 = scalar_lea.vmem %s243_s0, 32  ;;  %p417_p1 = scmp.lt.s32.totalorder %s243_s0, %s243_s0 }
   0xb   :  { %v381_v30 = vpack.c.bf16 %v143_v28, %v142_v27  ;;  %v145_v31 = vld [vmem:[%s606_s3 + $0x18] sm:$0xff]  ;;  %v146_v33 = vld [vmem:[%s606_s3 + $0x20] sm:$0xff]  ;;  %v147_v34 = vld [vmem:[%s606_s3 + $0x28] sm:$0xff]  ;;  %p413_p0 = scmp.ne.s32.totalorder %s243_s0, %s412_s9  ;;  %p418_p2 = scmp.lt.s32.totalorder %s412_s9, %s412_s9 }
   0xc   :  { %364 = vmatpush3.bf16.msra.mxu0 %v363_v10  ;;  %v384_v32 = vpack.c.bf16 %v145_v31, %v144_v29  ;;  %v387_v35 = vpack.c.bf16 %v147_v34, %v146_v33  ;;  %v148_v36 = vld [vmem:[%s606_s3 + $0x30] sm:$0xff]  ;;  %v149_v37 = vld [vmem:[%s606_s3 + $0x38] sm:$0xff]  ;;  %v150_v39 = vld [vmem:[%s606_s3 + $0x40] sm:$0xff] }
   0xd   :  { %365 = vmatprep.subr.bf16.mxu0 %v436_v3  ;;  %382 = vmatpush3.bf16.msra.mxu1 %v381_v30  ;;  %v390_v38 = vpack.c.bf16 %v149_v37, %v148_v36  ;;  %v151_v40 = vld [vmem:[%s606_s3 + $0x48] sm:$0xff]  ;;  %v152_v42 = vld [vmem:[%s606_s3 + $0x50] sm:$0xff]  ;;  %v153_v43 = vld [vmem:[%s606_s3 + $0x58] sm:$0xff]  ;;  %p419_p3 = por %p418_p2, %p417_p1 }
   0xe   :  { %383 = vmatprep.subr.bf16.mxu1 %v436_v3  ;;  %v393_v41 = vpack.c.bf16 %v151_v40, %v150_v39  ;;  %v396_v44 = vpack.c.bf16 %v153_v43, %v152_v42  ;;  %v154_v45 = vld [vmem:[%s606_s3 + $0x60] sm:$0xff]  ;;  %v155_v46 = vld [vmem:[%s606_s3 + $0x68] sm:$0xff]  ;;  %v156_v48 = vld [vmem:[%s606_s3 + $0x70] sm:$0xff] }
   0xf   :  { %v399_v47 = vpack.c.bf16 %v155_v46, %v154_v45  ;;  %v157_v49 = vld [vmem:[%s606_s3 + $0x78] sm:$0xff]  ;;  %v250_v51 = vld [vmem:[%s605_s2] ss:$0 sm:$0xff]  ;;  %p420_p4 = pnand %p419_p3, %p413_p0 }
  0x10   :  { %367 = vmatpush3.bf16.msra.mxu0 %v366_v13  ;;  %v402_v50 = vpack.c.bf16 %v157_v49, %v156_v48 }
  0x11   :  { %368 = vmatprep.subr.bf16.mxu0 %v436_v3  ;;  %385 = vmatpush3.bf16.msra.mxu1 %v384_v32 }
  0x12   :  { %386 = vmatprep.subr.bf16.mxu1 %v436_v3 }
  0x14   :  { %370 = vmatpush3.bf16.msra.mxu0 %v369_v16  ;;  %v251_v16 = vld [vmem:[%s607_s4] ss:$0 sm:$0xff] }
  0x15   :  { %371 = vmatprep.subr.bf16.mxu0 %v436_v3  ;;  %388 = vmatpush3.bf16.msra.mxu1 %v387_v35 }
  0x16   :  { %389 = vmatprep.subr.bf16.mxu1 %v436_v3 }
  0x18   :  { %373 = vmatpush3.bf16.msra.mxu0 %v372_v19 }
  0x19   :  { %374 = vmatprep.subr.bf16.mxu0 %v436_v3  ;;  %391 = vmatpush3.bf16.msra.mxu1 %v390_v38 }
  0x1a   :  { %392 = vmatprep.subr.bf16.mxu1 %v436_v3 }
  0x1c   :  { %376 = vmatpush3.bf16.msra.mxu0 %v375_v22 }
  0x1d   :  { %377 = vmatprep.subr.bf16.mxu0 %v436_v3  ;;  %394 = vmatpush3.bf16.msra.mxu1 %v393_v41 }
  0x1e   :  { %395 = vmatprep.subr.bf16.mxu1 %v436_v3 }
  0x20   :  { %379 = vmatpush3.bf16.msra.mxu0 %v378_v25 }
  0x21   :  { %397 = vmatpush3.bf16.msra.mxu1 %v396_v44 }
  0x22   :  { %398 = vmatprep.subr.bf16.mxu1 %v436_v3 }
  0x23   :  { %319 = vmatmul.mubr.f32.vlgmr.msra.gmra.mrb[0].mxu0 %v21_v26 }
  0x25   :  { %400 = vmatpush3.bf16.msra.mxu1 %v399_v47 }
  0x26   :  { %401 = vmatprep.subr.bf16.mxu1 %v436_v3 }
  0x29   :  { %403 = vmatpush3.bf16.msra.mxu1 %v402_v50 }
  0xf6   :  { %v111_v52 = vpop.f32.mrb[0].mxu0 }
  0xf7   :  { %v112_v53 = vadd.f32 %v250_v51, %v111_v52  ;;  %v320_v54 = vpop.f32.mrb[1].mxu0 }
  0xf9   :  { %v116_v55 = vmul.f32 0.70710677, %v112_v53  ;;  %v115_v13 = vmul.f32 0.5, %v112_v53 }
  0xfb   :  { %v117_v56 = vand.u32 2147483647, %v116_v55  ;;  %vm137_vm1 = vcmp.ge.f32.partialorder %v116_v55, 0.0 }
  0xfd   :  { %v118_v57 = vmul.f32 0.3275911, %v117_v56  ;;  %v131_v59 = vmul.f32 %v117_v56, %v117_v56 }
  0xff   :  { %v119_v58 = vadd.f32 1.0, %v118_v57  ;;  %v132_v61 = vsub.f32 0.0, %v131_v59 }
 0x101   :  { %408 = vrcp.f32 %v119_v58  ;;  %v133_v0 = vmul.f32 1.442695, %v132_v61 }
 0x103   :  { %410 = vpow2.f32 %v133_v0 }
 0x10b   :  { %v409_v60 = vpop.eup %408 }
 0x10c   :  { %v122_v62 = vmul.f32 1.0614054, %v409_v60 }
 0x10d   :  { %v411_v8 = vpop.eup %410 }
 0x10e   :  { %v123_v63 = vadd.f32 -1.4531521, %v122_v62 }
 0x110   :  { %v124_v1 = vmul.f32 %v409_v60, %v123_v63 }
 0x112   :  { %v125_v2 = vadd.f32 1.4214138, %v124_v1 }
 0x114   :  { %v126_v3 = vmul.f32 %v409_v60, %v125_v2 }
 0x116   :  { %v127_v4 = vadd.f32 -0.28449672, %v126_v3 }
 0x118   :  { %v128_v5 = vmul.f32 %v409_v60, %v127_v4 }
 0x11a   :  { %v129_v6 = vadd.f32 0.2548296, %v128_v5 }
 0x11c   :  { %v130_v7 = vmul.f32 %v409_v60, %v129_v6 }
 0x11e   :  { %v135_v9 = vmul.f32 %v411_v8, %v130_v7 }
 0x120   :  { %v136_v10 = vsub.f32 1.0, %v135_v9 }
 0x122   :  { %v138_v11 = vsub.f32 0.0, %v136_v10 }
 0x124   :  { %v139_v12 = vsel %vm137_vm1, %v136_v10, %v138_v11 }
 0x125   :  { %v140_v14 = vadd.f32 1.0, %v139_v12 }
 0x127   :  { %v141_v15 = vmul.f32 %v140_v14, %v115_v13 }
 0x129   :  { %354 = vmatmul.mubr.f32.vlgmr.msra.gmra.mrb[0].mxu1 %v141_v15 }
 0x1fc   :  { %v231_v17 = vpop.f32.mrb[0].mxu1 }
 0x1fd   :  { %v232_v18 = vadd.f32 %v251_v16, %v231_v17  ;;  %v355_v19 = vpop.f32.mrb[1].mxu1 }
 0x1ff   :  { %235 = vst [vmem:[#allocation2] sm:$0x3] %v232_v18 }
 0x200   :  { %423 = shalt.err (!%p420_p4)
}
 0x201   :  { %s424_s12 = scalar_lea.hbm %s608_s5, 32 }
 0x202   :  { %p425_p5 = scmp.ne.s32.totalorder %s608_s5, %s424_s12  ;;  %p428_p6 = scmp.lt.u32.totalorder %s424_s12, %s608_s5 }
 0x204   :  { %p430_p7 = pnand %p428_p6, %p425_p5 }
 0x206   :  { %433 = shalt.err (!%p430_p7)
}
 0x207   :  { %245 = dma.vmem_to_hbm [thread:$0]  %s243_s0, 32, %s608_s5, [#allocation3]  }
 0x208   :  { %434 = dma.done.wait [#allocation3], 32  }
 0x209   :  { %435 = vsyncadd [#allocation3], 4294967264 }
 0x20a   :  { %249 = vsyncpa [#allocation3], 1 }

// kernel: news_clf_forward.5
= control target key start
LH: loop header
LB: loop body
LE: loop exit
PB: predicated region body
PF: predicated region fallthrough
CT: control target
= control target key end

     0   :  { %19 = vsyncpa [#allocation3], 0  ;;  %s2518_s0 = inlined_call_operand.vmem [shape: f32[2,8,128], index: 0, kind: input, shape index: {}]   ;;  %s2519_s1 = inlined_call_operand.vmem [shape: f32[2,1,8], index: 1, kind: input, shape index: {}]   ;;  %s2520_s2 = inlined_call_operand.vmem [shape: f32[128,384], index: 2, kind: input, shape index: {}]   ;;  %s2521_s3 = inlined_call_operand.vmem [shape: f32[1,384], index: 3, kind: input, shape index: {}]   ;;  %s2522_s4 = inlined_call_operand.vmem [shape: f32[128,128], index: 4, kind: input, shape index: {}]   ;;  %s2523_s5 = inlined_call_operand.vmem [shape: f32[1,128], index: 5, kind: input, shape index: {}]   ;;  %s2524_s6 = inlined_call_operand.vmem [shape: f32[1,128], index: 6, kind: input, shape index: {}]   ;;  %s2525_s7 = inlined_call_operand.vmem [shape: f32[1,128], index: 7, kind: input, shape index: {}]   ;;  %s2526_s8 = inlined_call_operand.hbm [shape: f32[128,256], index: 8, kind: input, shape index: {}]   ;;  %s2527_s9 = inlined_call_operand.vmem [shape: f32[1,256], index: 9, kind: input, shape index: {}]   ;;  %s2528_s10 = inlined_call_operand.hbm [shape: f32[256,128], index: 10, kind: input, shape index: {}]   ;;  %s2529_s11 = inlined_call_operand.vmem [shape: f32[1,128], index: 11, kind: input, shape index: {}]   ;;  %s2530_s12 = inlined_call_operand.vmem [shape: f32[1,128], index: 12, kind: input, shape index: {}]   ;;  %s2531_s13 = inlined_call_operand.vmem [shape: f32[1,128], index: 13, kind: input, shape index: {}]   ;;  %s2532_s14 = inlined_call_operand.vmem [shape: f32[2,8,128], index: 14, kind: output, shape index: {}]  }
   0x1   :  { %20 = vsyncpa [#allocation5], 0  ;;  %s2122_s29 = smov 0  }
   0x2 LB: > { %2536 = sst [smem:[#allocation8_spill]] %s2035_s29  ;;  %s2037_s30 = smov [#allocation2]   ;;  %s2035_s29 = sphi %s2122_s29, %s26_s29  }
   0x3   : > { %s391_s15 = sshll.u32 %s2037_s30, 4  ;;  %s2128_s16 = sadd.s32 4294967295, %s2035_s29   ;;  %s392_s15 = int_to_ptr.vmem [resolvable:$true] %s391_s15 }
   0x4   : > { %p1573_p0 = scmp.ge.s32.totalorder %s2035_s29, 1  ;;  %p361_p1 = scmp.lt.s32.totalorder %s2035_s29, 3 }
   0x5   : > { %p2533_p3 = scmp.eq.s32.totalorder %s2128_s16, 0  ;;  %s2038_s18 = smov [#allocation4]  }
   0x6   : > { %p2132_p2 = pnand %p1573_p0, %p361_p1  ;;  %s407_s19 = sshll.u32 %s2038_s18, 4  ;;  %s2145_s19 = int_to_ptr.vmem [resolvable:$true] %s407_s19 }
   0x7   : > { %s1965_s23 = scalar_lea.hbm %s2526_s8, 4096 }
   0x8   : > { %s2537_s17 = scalar_select %p2132_p2, 1, 0 }
   0x9   : > { %p1916_p4 = pneg %p2132_p2  ;;  %p1966_p6 = scmp.ne.s32.totalorder %s2526_s8, %s1965_s23 }
   0xa   : > { %p1972_p10 = scmp.lt.u32.totalorder %s1965_s23, %s2526_s8 }
   0xb   : > { %p2141_p5 = pnand %p2533_p3, %p1916_p4 }
   0xd   : > { %p1967_p7 = pneg %p2141_p5 }
   0xf   : > { %p1968_p8 = pnand %p1967_p7, %p1966_p6 }
  0x11   : > { %p1969_p9 = pneg %p1968_p8 }
  0x13   : > { %p1974_p11 = pnand %p1972_p10, %p1969_p9 }
  0x15   : > { %1977 = shalt.err (!%p1974_p11)
}
  0x16   : > { %s1978_s28 = scalar_lea.vmem %s392_s15, 4096  ;;  %p1986_p1 = scmp.lt.s32.totalorder %s392_s15, %s392_s15 }
  0x17   : > { %p1979_p12 = scmp.ne.s32.totalorder %s392_s15, %s1978_s28  ;;  %p1987_p4 = scmp.lt.s32.totalorder %s1978_s28, %s1978_s28 }
  0x19   : > { %p1981_p13 = pnand %p1979_p12, %p1967_p7  ;;  %p1988_p3 = por %p1987_p4, %p1986_p1 }
  0x1b   : > { %p1982_p0 = pneg %p1981_p13 }
  0x1d   : > { %p1989_p2 = pnand %p1988_p3, %p1982_p0 }
  0x1f   : > { %1992 = shalt.err (!%p1989_p2)
}
  0x20   : > { %s2039_s30 = smov 256   ;;  %s2040_s18 = smov 16  }
  0x21   : > { %1919 = dma.hbm_to_vmem [thread:$0]  (!%p2141_p5), %s2526_s8, 4096, %s392_s15, [#allocation3], %s2039_s30, %s2039_s30, %s2040_s18  }
  0x22   : > { %s1993_s25 = scalar_lea.hbm %s2528_s10, 4096 }
  0x23   : > { %p1994_p6 = scmp.ne.s32.totalorder %s2528_s10, %s1993_s25  ;;  %p2000_p8 = scmp.lt.u32.totalorder %s1993_s25, %s2528_s10 }
  0x25   : > { %p1996_p2 = pnand %p1994_p6, %p1967_p7 }
  0x27   : > { %p1997_p3 = pneg %p1996_p2 }
  0x29   : > { %p2002_p9 = pnand %p2000_p8, %p1997_p3 }
  0x2b   : > { %2005 = shalt.err (!%p2002_p9)
}
  0x2c   : > { %s2006_s15 = scalar_lea.vmem %s2145_s19, 4096  ;;  %p2014_p13 = scmp.lt.s32.totalorder %s2145_s19, %s2145_s19 }
  0x2d   : > { %p2007_p10 = scmp.ne.s32.totalorder %s2145_s19, %s2006_s15  ;;  %p2015_p0 = scmp.lt.s32.totalorder %s2006_s15, %s2006_s15 }
  0x2f   : > { %p2009_p11 = pnand %p2007_p10, %p1967_p7  ;;  %p2016_p1 = por %p2015_p0, %p2014_p13 }
  0x31   : > { %p2010_p12 = pneg %p2009_p11 }
  0x33   : > { %p2017_p4 = pnand %p2016_p1, %p2010_p12 }
  0x35   : > { %2020 = shalt.err (!%p2017_p4)
}
  0x36   : > { %s2041_s29 = smov 128   ;;  %s2042_s30 = smov 8  }
  0x37   : > { %1922 = dma.hbm_to_vmem [thread:$0]  (!%p2141_p5), %s2528_s10, 4096, %s2145_s19, [#allocation5], %s2041_s29, %s2041_s29, %s2042_s30  }
  0x38   : > { %p2539_p6 = scmp.ne.s32.totalorder %s2537_s17, 0 }
  0x39   : > { %p2540_p7 = scmp.eq.s32.totalorder (!%p2539_p6), %s2128_s16, 0 }
  0x3a   : > { %445 = sbr.rel (%p2539_p6) target bundleno = 3037 (0xbdd), region = 76 }
  0x41   : > { %2026 = dma.done.wait (%p2540_p7), [#allocation3], 4096   ;;  %p2541_p2 = pmov %p2540_p7 }
  0x43   : > { %2028 = vsyncadd (%p2541_p2), [#allocation3], 4294963200  ;;  %p2542_p3 = pmov %p2541_p2 }
  0x44   : > { %p2543_p8 = pmov %p2541_p2 }
  0x45   : > { %2030 = dma.done.wait (%p2542_p3), [#allocation5], 4096  }
  0x46   : > { %2032 = vsyncadd (%p2543_p8), [#allocation5], 4294963200  ;;  %v2043_v0 = vmov 0.0   ;;  %v2044_v1 = vmov 0.0|0.0   ;;  %v510_v2 = vld [vmem:[%s2520_s2 + $0x8] sm:$0xff]  ;;  %v513_v3 = vld [vmem:[%s2520_s2 + $0x20] sm:$0xff] }
  0x47   : > { %638 = vmatprep.mubr.f32.mxu0 %v2043_v0  ;;  %1796 = vmatprep.subr.bf16.mxu1 %v2044_v1  ;;  %v509_v4 = vld [vmem:[%s2520_s2] sm:$0xff]  ;;  %v1764_v5 = vpack.c.bf16 %v513_v3, %v510_v2  ;;  %v512_v6 = vld [vmem:[%s2520_s2 + $0x18] sm:$0xff]  ;;  %v519_v8 = vld [vmem:[%s2520_s2 + $0x50] sm:$0xff]  ;;  %p496_p5 = scmp.lt.s32.totalorder %s2128_s16, 1  ;;  %vm2045_vm0 = vmmov 0   ;;  %vm715_vm1 = vcmask 523264  }
  0x48   : > { %v516_v7 = vld [vmem:[%s2520_s2 + $0x38] sm:$0xff]  ;;  %v1766_v9 = vpack.c.bf16 %v512_v6, %v509_v4  ;;  %v515_v11 = vld [vmem:[%s2520_s2 + $0x30] sm:$0xff]  ;;  %v518_v12 = vld [vmem:[%s2520_s2 + $0x48] sm:$0xff]  ;;  %1706 = vmatprep.mubr.msk.f32.mxu1 %vm2045_vm0, %v2043_v0  ;;  %s2046_s18 = smov 64   ;;  %vm800_vm2 = vcmask 64512  }
  0x49   : > { %v1768_v10 = vpack.c.bf16 %v519_v8, %v516_v7  ;;  %v522_v13 = vld [vmem:[%s2520_s2 + $0x68] sm:$0xff]  ;;  %1765 = vmatprep.subr.bf16.mxu0 %v1764_v5  ;;  %v525_v14 = vld [vmem:[%s2520_s2 + $0x80] sm:$0xff]  ;;  %v1770_v15 = vpack.c.bf16 %v518_v12, %v515_v11  ;;  %v524_v18 = vld [vmem:[%s2520_s2 + $0x78] sm:$0xff]  ;;  %s2546_s16 = smov (!%p496_p5, %s2128_s16), 1 }
  0x4a   : > { %1767 = vmatpush1.bf16.msra.mxu0 %v1766_v9  ;;  %v1772_v16 = vpack.c.bf16 %v525_v14, %v522_v13  ;;  %v521_v17 = vld [vmem:[%s2520_s2 + $0x60] sm:$0xff]  ;;  %v528_v19 = vld [vmem:[%s2520_s2 + $0x98] sm:$0xff]  ;;  %v531_v20 = vld [vmem:[%s2520_s2 + $0xb0] sm:$0xff]  ;;  %s1580_s28 = sshll.u32 %s2546_s16, 3  ;;  %v559_v13 = vlaneseq }
  0x4b   : > { %1769 = vmatprep.subr.bf16.mxu0 %v1768_v10  ;;  %v1774_v21 = vpack.c.bf16 %v524_v18, %v521_v17  ;;  %v1776_v22 = vpack.c.bf16 %v531_v20, %v528_v19  ;;  %v527_v23 = vld [vmem:[%s2520_s2 + $0x90] sm:$0xff]  ;;  %v530_v24 = vld [vmem:[%s2520_s2 + $0xa8] sm:$0xff]  ;;  %v537_v26 = vld [vmem:[%s2520_s2 + $0xe0] sm:$0xff]  ;;  %s499_s19 = scalar_lea.vmem %s2518_s0, %s1580_s28 }
  0x4c   : > { %v534_v25 = vld [vmem:[%s2520_s2 + $0xc8] sm:$0xff]  ;;  %v511_v27 = vld [vmem:[%s2520_s2 + $0x10] sm:$0xff]  ;;  %v517_v29 = vld [vmem:[%s2520_s2 + $0x40] sm:$0xff]  ;;  %v1778_v30 = vpack.c.bf16 %v530_v24, %v527_v23  ;;  %v2381_v14 = vshrl.u32 %v559_v13, 7 }
  0x4d   : > { %v514_v28 = vld [vmem:[%s2520_s2 + $0x28] sm:$0xff]  ;;  %v520_v32 = vld [vmem:[%s2520_s2 + $0x58] sm:$0xff]  ;;  %v1780_v33 = vpack.c.bf16 %v537_v26, %v534_v25  ;;  %v533_v34 = vld [vmem:[%s2520_s2 + $0xc0] sm:$0xff] }
  0x4e   : > { %1771 = vmatpush1.bf16.msra.mxu0 %v1770_v15  ;;  %v1797_v31 = vpack.c.bf16 %v514_v28, %v511_v27  ;;  %v536_v35 = vld [vmem:[%s2520_s2 + $0xd8] sm:$0xff]  ;;  %v543_v37 = vld [vmem:[%s2520_s2 + $0x110] sm:$0xff]  ;;  %v1800_v38 = vpack.c.bf16 %v520_v32, %v517_v29  ;;  %v526_v40 = vld [vmem:[%s2520_s2 + $0x88] sm:$0xff]  ;;  %v565_v15 = vsub.s32 1, %v2381_v14  ;;  %v561_v17 = vsub.s32 0, %v2381_v14 }
  0x4f   : > { %1773 = vmatprep.subr.bf16.mxu0 %v1772_v16  ;;  %v540_v36 = vld [vmem:[%s2520_s2 + $0xf8] sm:$0xff]  ;;  %v523_v39 = vld [vmem:[%s2520_s2 + $0x70] sm:$0xff]  ;;  %v1782_v41 = vpack.c.bf16 %v536_v35, %v533_v34  ;;  %v542_v44 = vld [vmem:[%s2520_s2 + $0x108] sm:$0xff]  ;;  %v569_v24 = vsub.s32 2, %v2381_v14 }
  0x50   : > { %1798 = vmatpush3.bf16.msra.mxu1 %v1797_v31  ;;  %v1784_v42 = vpack.c.bf16 %v543_v37, %v540_v36  ;;  %v539_v43 = vld [vmem:[%s2520_s2 + $0xf0] sm:$0xff]  ;;  %v546_v45 = vld [vmem:[%s2520_s2 + $0x128] sm:$0xff]  ;;  %v549_v46 = vld [vmem:[%s2520_s2 + $0x140] sm:$0xff]  ;;  %v1803_v47 = vpack.c.bf16 %v526_v40, %v523_v39 }
  0x51   : > { %1799 = vmatprep.subr.bf16.mxu1 %v2044_v1  ;;  %v529_v48 = vld [vmem:[%s2520_s2 + $0xa0] sm:$0xff]  ;;  %v532_v49 = vld [vmem:[%s2520_s2 + $0xb8] sm:$0xff]  ;;  %v1786_v50 = vpack.c.bf16 %v542_v44, %v539_v43  ;;  %v1788_v51 = vpack.c.bf16 %v549_v46, %v546_v45  ;;  %v555_v55 = vld [vmem:[%s2520_s2 + $0x170] sm:$0xff] }
  0x52   : > { %1775 = vmatpush1.bf16.msra.mxu0 %v1774_v21  ;;  %v545_v52 = vld [vmem:[%s2520_s2 + $0x120] sm:$0xff]  ;;  %v548_v53 = vld [vmem:[%s2520_s2 + $0x138] sm:$0xff]  ;;  %v1806_v56 = vpack.c.bf16 %v532_v49, %v529_v48  ;;  %v535_v57 = vld [vmem:[%s2520_s2 + $0xd0] sm:$0xff] }
  0x53   : > { %1777 = vmatprep.subr.bf16.mxu0 %v1776_v22  ;;  %v552_v54 = vld [vmem:[%s2520_s2 + $0x158] sm:$0xff]  ;;  %v538_v58 = vld [vmem:[%s2520_s2 + $0xe8] sm:$0xff]  ;;  %v1790_v59 = vpack.c.bf16 %v548_v53, %v545_v52  ;;  %v551_v61 = vld [vmem:[%s2520_s2 + $0x150] sm:$0xff] }
  0x54   : > { %1801 = vmatpush3.bf16.msra.mxu1 %v1800_v38  ;;  %v1792_v60 = vpack.c.bf16 %v555_v55, %v552_v54  ;;  %v554_v62 = vld [vmem:[%s2520_s2 + $0x168] sm:$0xff]  ;;  %v1809_v63 = vpack.c.bf16 %v538_v58, %v535_v57  ;;  %v541_v2 = vld [vmem:[%s2520_s2 + $0x100] sm:$0xff]  ;;  %v544_v3 = vld [vmem:[%s2520_s2 + $0x118] sm:$0xff] }
  0x55   : > { %1802 = vmatprep.subr.bf16.mxu1 %v2044_v1  ;;  %v1794_v4 = vpack.c.bf16 %v554_v62, %v551_v61  ;;  %v1812_v5 = vpack.c.bf16 %v544_v3, %v541_v2  ;;  %v547_v6 = vld [vmem:[%s2520_s2 + $0x130] sm:$0xff]  ;;  %v550_v7 = vld [vmem:[%s2520_s2 + $0x148] sm:$0xff]  ;;  %v2361_v8 = vld [vmem:[%s499_s19] sm:$0xff]  ;;  %s502_s19 = scalar_lea.vmem %s2519_s1, %s2546_s16 }
  0x56   : > { %1779 = vmatpush1.bf16.msra.mxu0 %v1778_v30  ;;  %v1815_v9 = vpack.c.bf16 %v550_v7, %v547_v6  ;;  %v553_v10 = vld [vmem:[%s2520_s2 + $0x160] sm:$0xff]  ;;  %v556_v11 = vld [vmem:[%s2520_s2 + $0x178] sm:$0xff]  ;;  %v1059_v62 = vld [vmem:[%s2522_s4 + $0x8] sm:$0xff] }
  0x57   : > { %1781 = vmatprep.subr.bf16.mxu0 %v1780_v33  ;;  %v1818_v12 = vpack.c.bf16 %v556_v11, %v553_v10  ;;  %v557_v16 = vld [vmem:[%s2521_s3] sm:$0x7]  ;;  %v1061_v3 = vld [vmem:[%s2522_s4 + $0x18] sm:$0xff]  ;;  %v1064_v7 = vld [vmem:[%s2522_s4 + $0x30] sm:$0xff] }
  0x58   : > { %1804 = vmatpush3.bf16.msra.mxu1 %v1803_v47  ;;  %v566_v18 = vrot.slane %v557_v16, %v565_v15  ;;  %v562_v20 = vrot.slane %v557_v16, %v561_v17  ;;  %v570_v25 = vrot.slane %v557_v16, %v569_v24  ;;  %v1584_v30 = vld [vmem:[%s502_s19] ss:$0 sm:$0xff]  ;;  %v1068_v16 = vld [vmem:[%s2522_s4 + $0x50] sm:$0xff]  ;;  %v1073_v24 = vld [vmem:[%s2522_s4 + $0x78] sm:$0xff] }
  0x59   : > { %1805 = vmatprep.subr.bf16.mxu1 %v2044_v1  ;;  %v1058_v61 = vld [vmem:[%s2522_s4] sm:$0xff] }
  0x5a   : > { %1783 = vmatpush1.bf16.msra.mxu0 %v1782_v41  ;;  %v1821_v2 = vpack.c.bf16 %v1059_v62, %v1058_v61  ;;  %v1066_v11 = vld [vmem:[%s2522_s4 + $0x40] sm:$0xff]  ;;  %v1197_v61 = vld [vmem:[#allocation2 + $0x88] sm:$0xff]  ;;  %v1199_v62 = vld [vmem:[#allocation2 + $0x98] sm:$0xff] }
  0x5b   : > { %1785 = vmatprep.subr.bf16.mxu0 %v1784_v42 }
  0x5c   : > { %1807 = vmatpush3.bf16.msra.mxu1 %v1806_v56 }
  0x5d   : > { %1808 = vmatprep.subr.bf16.mxu1 %v2044_v1 }
  0x5e   : > { %1787 = vmatpush1.bf16.msra.mxu0 %v1786_v50 }
  0x5f   : > { %1789 = vmatprep.subr.bf16.mxu0 %v1788_v51 }
  0x60   : > { %1810 = vmatpush3.bf16.msra.mxu1 %v1809_v63  ;;  %v1060_v63 = vld [vmem:[%s2522_s4 + $0x10] sm:$0xff] }
  0x61   : > { %1811 = vmatprep.subr.bf16.mxu1 %v2044_v1 }
  0x62   : > { %1791 = vmatpush1.bf16.msra.mxu0 %v1790_v59 }
  0x63   : > { %1793 = vmatprep.subr.bf16.mxu0 %v1792_v60 }
  0x64   : > { %1813 = vmatpush3.bf16.msra.mxu1 %v1812_v5  ;;  %v1063_v5 = vld [vmem:[%s2522_s4 + $0x28] sm:$0xff] }
  0x65   : > { %1814 = vmatprep.subr.bf16.mxu1 %v2044_v1 }
  0x66   : > { %1795 = vmatpush1.bf16.msra.mxu0 %v1794_v4  ;;  %v1824_v4 = vpack.c.bf16 %v1061_v3, %v1060_v63  ;;  %v1860_v63 = vpack.c.bf16 %v1199_v62, %v1197_v61  ;;  %v1198_v3 = vld [vmem:[#allocation2 + $0x90] sm:$0xff]  ;;  %v1358_v61 = vld [vmem:[#allocation4 + $0x48] sm:$0xff] }
  0x67   : > { %1820 = vmatprep.subr.bf16.mxu0 %v2044_v1 }
  0x68   : > { %1816 = vmatpush3.bf16.msra.mxu1 %v1815_v9  ;;  %v1065_v9 = vld [vmem:[%s2522_s4 + $0x38] sm:$0xff] }
  0x69   : > { %639 = vmatmul.mubr.f32.vlgmr.msra.gmra.mrb[0].mxu0 %v2361_v8  ;;  %1817 = vmatprep.subr.bf16.mxu1 %v2044_v1  ;;  %v1830_v10 = vpack.c.bf16 %v1065_v9, %v1064_v7  ;;  %v1202_v7 = vld [vmem:[#allocation2 + $0xb0] sm:$0xff] }
  0x6a   : > { %1761 = vmatprep.mubr.msk.f32.mxu0 %vm2045_vm0, %v2043_v0  ;;  %1822 = vmatpush3.bf16.msra.mxu0 %v1821_v2  ;;  %v1196_v2 = vld [vmem:[#allocation2 + $0x80] sm:$0xff] }
  0x6b   : > { %1823 = vmatprep.subr.bf16.mxu0 %v2044_v1 }
  0x6c   : > { %1819 = vmatpush3.bf16.msra.mxu1 %v1818_v12  ;;  %v1067_v12 = vld [vmem:[%s2522_s4 + $0x48] sm:$0xff] }
  0x6d   : > { %1709 = vmatprep.subr.mxu1 %v2043_v0  ;;  %v1833_v13 = vpack.c.bf16 %v1067_v12, %v1066_v11  ;;  %v1207_v11 = vld [vmem:[#allocation2 + $0xd8] sm:$0xff] }
  0x6e   : > { %1825 = vmatpush3.bf16.msra.mxu0 %v1824_v4  ;;  %v1201_v4 = vld [vmem:[#allocation2 + $0xa8] sm:$0xff] }
  0x6f   : > { %1707 = vmatmul.mubr.f32.vlgmr.msra.gmra.mrb[0].mxu1 %v2361_v8  ;;  %1826 = vmatprep.subr.bf16.mxu0 %v2044_v1 }
  0x70   : > { %1711 = vmatprep.mubr.msk.f32.mxu1 %vm2045_vm0, %v2043_v0 }
 0x13c   : > { %v640_v19 = vpop.f32.mrb[0].mxu0 }
 0x13d   : > { %v642_v21 = vpop.f32.mrb[1].mxu0  ;;  %v641_v23 = vadd.f32 %v640_v19, %v562_v20  ;;  %v1070_v20 = vld [vmem:[%s2522_s4 + $0x60] sm:$0xff] }
 0x13e   : > { %v643_v22 = vadd.f32 %v642_v21, %v566_v18  ;;  %v1069_v18 = vld [vmem:[%s2522_s4 + $0x58] sm:$0xff]  ;;  %v1071_v21 = vld [vmem:[%s2522_s4 + $0x68] sm:$0xff] }
 0x13f   : > { %v1836_v19 = vpack.c.bf16 %v1069_v18, %v1068_v16  ;;  %v1204_v16 = vld [vmem:[#allocation2 + $0xc0] sm:$0xff]  ;;  %v1206_v18 = vld [vmem:[#allocation2 + $0xd0] sm:$0xff] }
 0x140   : > { %887 = vrot.lane.b32.xlu1 %v643_v22, %s2046_s18  ;;  %1710 = vmatpush3.xpose.msk.msra.mxu1 %vm715_vm1, %v643_v22  ;;  %v1839_v22 = vpack.c.bf16 %v1071_v21, %v1070_v20  ;;  %v1211_v20 = vld [vmem:[#allocation2 + $0xf8] sm:$0xff]  ;;  %v1870_v21 = vpack.c.bf16 %v1206_v18, %v1204_v16 }
 0x141   : > { %1714 = vmatprep.subr.mxu1 %v2043_v0  ;;  %v1380_v16 = vld [vmem:[#allocation4 + $0xf8] sm:$0xff] }
 0x142   : > { %v711_v26 = vpop.f32.mrb[0].mxu1 }
 0x143   : > { %1712 = vmatmul.mubr.msk.f32.vlgmr.msra.gmra.mrb[2].mxu1 %vm715_vm1, %v641_v23  ;;  %v712_v27 = vadd.f32 %v711_v26, %v570_v25  ;;  %v1708_v28 = vpop.f32.mrb[1].mxu1 }
 0x144   : > { %885 = vrot.lane.b32.xlu1 %v641_v23, %s2046_s18  ;;  %1716 = vmatprep.mubr.msk.f32.mxu1 %vm2045_vm0, %v2043_v0  ;;  %v1072_v23 = vld [vmem:[%s2522_s4 + $0x70] sm:$0xff] }
 0x145   : > { %1715 = vmatpush3.msra.mxu1 %v712_v27  ;;  %v1842_v25 = vpack.c.bf16 %v1073_v24, %v1072_v23  ;;  %v1208_v23 = vld [vmem:[#allocation2 + $0xe0] sm:$0xff]  ;;  %v1210_v24 = vld [vmem:[#allocation2 + $0xf0] sm:$0xff] }
 0x146   : > { %1719 = vmatprep.subr.mxu1 %v2043_v0 }
 0x1b2   : > { %v888_v42 = vpop.permute.xlu1 %887 }
 0x1b6   : > { %v886_v44 = vpop.permute.xlu1 %885 }
 0x216   : > { %v788_v29 = vpop.f32.mrb[2].mxu1 }
 0x217   : > { %v792_v31 = vmul.f32 0.125, %v788_v29  ;;  %v1713_v32 = vpop.f32.mrb[3].mxu1 }
 0x219   : > { %v799_v33 = vadd.f32 %v1584_v30, %v792_v31 }
 0x21b   : > { %v801_v34 = vsel %vm800_vm2, %v799_v33, -inf }
 0x21c   : > { %802 = vmax.xlane.f32.xlu0 %v801_v34 }
 0x2a9   : > { %v803_v35 = vpop.xlane.xlu0 %802 }
 0x2aa   : > { %v804_v36 = vsub.f32 %v799_v33, %v803_v35  ;;  %v1183_v35 = vld [vmem:[#allocation2 + $0x18] sm:$0xff] }
 0x2ac   : > { %v805_v37 = vmul.f32 1.442695, %v804_v36  ;;  %v1180_v36 = vld [vmem:[#allocation2] sm:$0xff] }
 0x2ae   : > { %1945 = vpow2.f32 %v805_v37 }
 0x2b8   : > { %v1946_v38 = vpop.eup %1945 }
 0x2b9   : > { %v807_v39 = vsel %vm800_vm2, %v1946_v38, 0.0 }
 0x2ba   : > { %808 = vadd.xlane.f32.xlu0 %v807_v39  ;;  %v1185_v39 = vld [vmem:[#allocation2 + $0x28] sm:$0xff] }
 0x347   : > { %v809_v40 = vpop.xlane.xlu0 %808 }
 0x348   : > { %1947 = vrcp.f32 %v809_v40  ;;  %v1187_v40 = vld [vmem:[#allocation2 + $0x38] sm:$0xff] }
 0x352   : > { %v1948_v41 = vpop.eup %1947 }
 0x353   : > { %v811_v43 = vmul.f32 %v1948_v41, %v1946_v38  ;;  %v1182_v38 = vld [vmem:[#allocation2 + $0x10] sm:$0xff] }
 0x354   : > { %v1846_v41 = vpack.c.bf16 %v1182_v38, %v1180_v36  ;;  %v1350_v38 = vld [vmem:[#allocation4 + $0x8] sm:$0xff] }
 0x355   : > { %1717 = vmatmul.mubr.msk.f32.vlgmr.msra.gmra.mrb[4].mxu1 %vm800_vm2, %v811_v43  ;;  %v1184_v43 = vld [vmem:[#allocation2 + $0x20] sm:$0xff] }
 0x356   : > { %1720 = vmatpush3.xpose.msk.msra.mxu1 %vm715_vm1, %v888_v42  ;;  %1721 = vmatprep.mubr.msk.f32.mxu1 %vm2045_vm0, %v2043_v0  ;;  %v1848_v42 = vpack.c.bf16 %v1187_v40, %v1185_v39  ;;  %v1367_v40 = vld [vmem:[#allocation4 + $0x90] sm:$0xff] }
 0x357   : > { %1724 = vmatprep.subr.mxu1 %v2043_v0 }
 0x359   : > { %1722 = vmatmul.mubr.msk.f32.vlgmr.msra.gmra.mrb[6].mxu1 %vm715_vm1, %v886_v44  ;;  %v1186_v44 = vld [vmem:[#allocation2 + $0x30] sm:$0xff] }
 0x35a   : > { %1726 = vmatprep.mubr.msk.f32.mxu1 %vm2045_vm0, %v2043_v0 }
 0x428   : > { %v2415_v45 = vpop.f32.mrb[4].mxu1 }
 0x429   : > { %v1718_v46 = vpop.f32.mrb[5].mxu1 }
 0x42a   : > { %v1191_v46 = vld [vmem:[#allocation2 + $0x58] sm:$0xff] }
 0x42c   : > { %v959_v47 = vpop.f32.mrb[6].mxu1 }
 0x42d   : > { %v963_v48 = vmul.f32 0.125, %v959_v47  ;;  %v1723_v49 = vpop.f32.mrb[7].mxu1  ;;  %v1850_v47 = vpack.c.bf16 %v1186_v44, %v1184_v43  ;;  %v1351_v43 = vld [vmem:[#allocation4 + $0x10] sm:$0xff]  ;;  %v1352_v44 = vld [vmem:[#allocation4 + $0x18] sm:$0xff] }
 0x42e   : > { %v1190_v49 = vld [vmem:[#allocation2 + $0x50] sm:$0xff] }
 0x42f   : > { %v964_v50 = vadd.f32 %v1584_v30, %v963_v48  ;;  %v1589_v30 = vld [vmem:[%s2523_s5] ss:$0 sm:$0xff] }
 0x431   : > { %v965_v51 = vsel %vm800_vm2, %v964_v50, -inf }
 0x432   : > { %966 = vmax.xlane.f32.xlu0 %v965_v51 }
 0x448   : > { %977 = vrot.lane.b32.xlu0 %v712_v27, %s2046_s18 }
 0x4bf   : > { %v967_v52 = vpop.xlane.xlu0 %966 }
 0x4c0   : > { %v968_v53 = vsub.f32 %v964_v50, %v967_v52 }
 0x4c2   : > { %v969_v54 = vmul.f32 1.442695, %v968_v53 }
 0x4c3   : > { %v978_v55 = vpop.permute.xlu0 %977 }
 0x4c4   : > { %1949 = vpow2.f32 %v969_v54  ;;  %1725 = vmatpush3.msra.mxu1 %v978_v55  ;;  %v1193_v55 = vld [vmem:[#allocation2 + $0x68] sm:$0xff] }
 0x4ce   : > { %v1950_v56 = vpop.eup %1949 }
 0x4cf   : > { %v971_v57 = vsel %vm800_vm2, %v1950_v56, 0.0 }
 0x4d0   : > { %972 = vadd.xlane.f32.xlu1 %v971_v57 }
 0x55d   : > { %v973_v58 = vpop.xlane.xlu1 %972 }
 0x55e   : > { %1951 = vrcp.f32 %v973_v58  ;;  %v1192_v58 = vld [vmem:[#allocation2 + $0x60] sm:$0xff] }
 0x568   : > { %v1952_v59 = vpop.eup %1951 }
 0x569   : > { %v975_v60 = vmul.f32 %v1952_v59, %v1950_v56  ;;  %v1195_v56 = vld [vmem:[#allocation2 + $0x78] sm:$0xff]  ;;  %v1194_v59 = vld [vmem:[#allocation2 + $0x70] sm:$0xff] }
 0x56a   : > { %v1856_v57 = vpack.c.bf16 %v1195_v56, %v1193_v55  ;;  %v1356_v55 = vld [vmem:[#allocation4 + $0x38] sm:$0xff] }
 0x56b   : > { %1727 = vmatmul.mubr.msk.f32.vlgmr.msra.gmra.mrb[8].mxu1 %vm800_vm2, %v975_v60  ;;  %v1858_v60 = vpack.c.bf16 %v1194_v59, %v1192_v58  ;;  %v1374_v58 = vld [vmem:[#allocation4 + $0xc8] sm:$0xff] }
 0x56c   : > { %1288 = vmatprep.mubr.f32.mxu1 %v2043_v0  ;;  %v1062_v0 = vld [vmem:[%s2522_s4 + $0x20] sm:$0xff] }
 0x56d   : > { %v1827_v6 = vpack.c.bf16 %v1063_v5, %v1062_v0  ;;  %v1862_v0 = vpack.c.bf16 %v1198_v3, %v1196_v2  ;;  %v1203_v5 = vld [vmem:[#allocation2 + $0xb8] sm:$0xff] }
 0x56e   : > { %v1864_v9 = vpack.c.bf16 %v1203_v5, %v1201_v4  ;;  %v1376_v2 = vld [vmem:[#allocation4 + $0xd8] sm:$0xff]  ;;  %v1359_v4 = vld [vmem:[#allocation4 + $0x50] sm:$0xff] }
 0x56f   : > { %1828 = vmatpush3.bf16.msra.mxu0 %v1827_v6  ;;  %v1200_v6 = vld [vmem:[#allocation2 + $0xa0] sm:$0xff] }
 0x570   : > { %1829 = vmatprep.subr.bf16.mxu0 %v2044_v1  ;;  %v1866_v12 = vpack.c.bf16 %v1202_v7, %v1200_v6  ;;  %v1377_v6 = vld [vmem:[#allocation4 + $0xe0] sm:$0xff]  ;;  %v1378_v7 = vld [vmem:[#allocation4 + $0xe8] sm:$0xff] }
 0x573   : > { %1831 = vmatpush3.bf16.msra.mxu0 %v1830_v10  ;;  %v1205_v10 = vld [vmem:[#allocation2 + $0xc8] sm:$0xff] }
 0x574   : > { %1832 = vmatprep.subr.bf16.mxu0 %v2044_v1 }
 0x577   : > { %1834 = vmatpush3.bf16.msra.mxu0 %v1833_v13  ;;  %v1868_v13 = vpack.c.bf16 %v1207_v11, %v1205_v10  ;;  %v1361_v10 = vld [vmem:[#allocation4 + $0x60] sm:$0xff]  ;;  %v1362_v11 = vld [vmem:[#allocation4 + $0x68] sm:$0xff] }
 0x578   : > { %1835 = vmatprep.subr.bf16.mxu0 %v2044_v1 }
 0x57b   : > { %1837 = vmatpush3.bf16.msra.mxu0 %v1836_v19  ;;  %v1209_v19 = vld [vmem:[#allocation2 + $0xe8] sm:$0xff] }
 0x57c   : > { %1838 = vmatprep.subr.bf16.mxu0 %v2044_v1 }
 0x57f   : > { %1840 = vmatpush3.bf16.msra.mxu0 %v1839_v22  ;;  %v1872_v22 = vpack.c.bf16 %v1211_v20, %v1209_v19  ;;  %v1363_v19 = vld [vmem:[#allocation4 + $0x70] sm:$0xff]  ;;  %v1364_v20 = vld [vmem:[#allocation4 + $0x78] sm:$0xff] }
 0x580   : > { %1841 = vmatprep.subr.bf16.mxu0 %v2044_v1  ;;  %v1181_v1 = vld [vmem:[#allocation2 + $0x8] sm:$0xff] }
 0x581   : > { %v1844_v37 = vpack.c.bf16 %v1183_v35, %v1181_v1  ;;  %v1365_v1 = vld [vmem:[#allocation4 + $0x80] sm:$0xff]  ;;  %v1366_v35 = vld [vmem:[#allocation4 + $0x88] sm:$0xff] }
 0x582   : > { %v1876_v36 = vpack.c.bf16 %v1366_v35, %v1365_v1 }
 0x583   : > { %1843 = vmatpush3.bf16.msra.mxu0 %v1842_v25  ;;  %1845 = vmatprep.subr.bf16.mxu1 %v1844_v37  ;;  %v1874_v25 = vpack.c.bf16 %v1210_v24, %v1208_v23  ;;  %v1349_v37 = vld [vmem:[#allocation4] sm:$0xff] }
 0x584   : > { %1847 = vmatpush1.bf16.msra.mxu1 %v1846_v41  ;;  %v1878_v39 = vpack.c.bf16 %v1350_v38, %v1349_v37  ;;  %1877 = vmatprep.subr.bf16.mxu0 %v1876_v36  ;;  %v1368_v41 = vld [vmem:[#allocation4 + $0x98] sm:$0xff] }
 0x585   : > { %1849 = vmatprep.subr.bf16.mxu1 %v1848_v42  ;;  %v1880_v42 = vpack.c.bf16 %v1368_v41, %v1367_v40 }
 0x588   : > { %1851 = vmatpush1.bf16.msra.mxu1 %v1850_v47  ;;  %v1370_v47 = vld [vmem:[#allocation4 + $0xa8] sm:$0xff] }
 0x63e   : > { %v1049_v26 = vpop.f32.mrb[8].mxu1 }
 0x63f   : > { %1054 = vrot.lane.b32.xlu0 %v1049_v26, %s2046_s18  ;;  %v1728_v27 = vpop.f32.mrb[9].mxu1  ;;  %s506_s18 = scalar_lea.vmem %s2532_s14, %s1580_s28 }
 0x6b1   : > { %v1055_v28 = vpop.permute.xlu0 %1054 }
 0x6b2   : > { %v1057_v29 = vsel %vm715_vm1, %v2415_v45, %v1055_v28  ;;  %v1189_v45 = vld [vmem:[#allocation2 + $0x48] sm:$0xff] }
 0x6b3   : > { %1762 = vmatmul.mubr.f32.vlgmr.msra.gmra.mrb[2].mxu0 %v1057_v29  ;;  %v1852_v48 = vpack.c.bf16 %v1191_v46, %v1189_v45  ;;  %v1882_v45 = vpack.c.bf16 %v1352_v44, %v1351_v43  ;;  %v1369_v46 = vld [vmem:[#allocation4 + $0xa0] sm:$0xff] }
 0x6b4   : > { %1879 = vmatpush3.bf16.msra.mxu0 %v1878_v39 }
 0x6b5   : > { %1853 = vmatprep.subr.bf16.mxu1 %v1852_v48  ;;  %1881 = vmatprep.subr.bf16.mxu0 %v1880_v42  ;;  %v1884_v48 = vpack.c.bf16 %v1370_v47, %v1369_v46 }
 0x6b8   : > { %1883 = vmatpush3.bf16.msra.mxu0 %v1882_v45 }
 0x6b9   : > { %1885 = vmatprep.subr.bf16.mxu0 %v1884_v48 }
 0x786   : > { %v1147_v31 = vpop.f32.mrb[2].mxu0 }
 0x787   : > { %v1148_v32 = vadd.f32 %v1589_v30, %v1147_v31  ;;  %v1763_v33 = vpop.f32.mrb[3].mxu0  ;;  %v1590_v30 = vld [vmem:[%s2524_s6] ss:$0 sm:$0xff] }
 0x789   : > { %v1151_v34 = vadd.f32 %v1148_v32, %v2361_v8  ;;  %v1188_v8 = vld [vmem:[#allocation2 + $0x40] sm:$0xff] }
 0x78a   : > { %v1854_v50 = vpack.c.bf16 %v1190_v49, %v1188_v8  ;;  %v1591_v32 = vld [vmem:[%s2525_s7] ss:$0 sm:$0xff]  ;;  %v1354_v49 = vld [vmem:[#allocation4 + $0x28] sm:$0xff] }
 0x78b   : > { %1154 = vadd.xlane.f32.xlu0 %v1151_v34  ;;  %v1353_v8 = vld [vmem:[#allocation4 + $0x20] sm:$0xff] }
 0x78c   : > { %1855 = vmatpush1.bf16.msra.mxu1 %v1854_v50  ;;  %v1886_v50 = vpack.c.bf16 %v1354_v49, %v1353_v8 }
 0x78d   : > { %1857 = vmatprep.subr.bf16.mxu1 %v1856_v57  ;;  %v1373_v57 = vld [vmem:[#allocation4 + $0xc0] sm:$0xff] }
 0x78e   : > { %1887 = vmatpush3.bf16.msra.mxu0 %v1886_v50  ;;  %v1892_v59 = vpack.c.bf16 %v1374_v58, %v1373_v57 }
 0x790   : > { %1859 = vmatpush1.bf16.msra.mxu1 %v1858_v60  ;;  %v1357_v60 = vld [vmem:[#allocation4 + $0x40] sm:$0xff] }
 0x791   : > { %1861 = vmatprep.subr.bf16.mxu1 %v1860_v63  ;;  %v1894_v62 = vpack.c.bf16 %v1358_v61, %v1357_v60  ;;  %v1375_v63 = vld [vmem:[#allocation4 + $0xd0] sm:$0xff] }
 0x792   : > { %v1896_v3 = vpack.c.bf16 %v1376_v2, %v1375_v63 }
 0x794   : > { %1863 = vmatpush1.bf16.msra.mxu1 %v1862_v0  ;;  %v1360_v0 = vld [vmem:[#allocation4 + $0x58] sm:$0xff] }
 0x795   : > { %1865 = vmatprep.subr.bf16.mxu1 %v1864_v9  ;;  %v1898_v5 = vpack.c.bf16 %v1360_v0, %v1359_v4  ;;  %v1900_v9 = vpack.c.bf16 %v1378_v7, %v1377_v6 }
 0x798   : > { %1867 = vmatpush1.bf16.msra.mxu1 %v1866_v12  ;;  %v1902_v12 = vpack.c.bf16 %v1362_v11, %v1361_v10 }
 0x799   : > { %1869 = vmatprep.subr.bf16.mxu1 %v1868_v13  ;;  %v1379_v13 = vld [vmem:[#allocation4 + $0xf0] sm:$0xff] }
 0x79a   : > { %v1904_v18 = vpack.c.bf16 %v1380_v16, %v1379_v13  ;;  %v1592_v16 = vld [vmem:[%s2529_s11] ss:$0 sm:$0xff] }
 0x79c   : > { %1871 = vmatpush1.bf16.msra.mxu1 %v1870_v21  ;;  %v1906_v21 = vpack.c.bf16 %v1364_v20, %v1363_v19 }
 0x79d   : > { %1873 = vmatprep.subr.bf16.mxu1 %v1872_v22  ;;  %v1212_v22 = vld [vmem:[%s2527_s9] sm:$0x3] }
 0x79e   : > { %v1217_v23 = vrot.slane %v1212_v22, %v561_v17  ;;  %v1221_v24 = vrot.slane %v1212_v22, %v565_v15 }
 0x7a0   : > { %1875 = vmatpush1.bf16.msra.mxu1 %v1874_v25 }
 0x818   : > { %v1155_v51 = vpop.xlane.xlu0 %1154 }
 0x819   : > { %v1157_v52 = vmul.f32 0.0078125, %v1155_v51  ;;  %v1371_v51 = vld [vmem:[#allocation4 + $0xb0] sm:$0xff] }
 0x81b   : > { %v1158_v53 = vsub.f32 %v1151_v34, %v1157_v52  ;;  %v1372_v52 = vld [vmem:[#allocation4 + $0xb8] sm:$0xff] }
 0x81d   : > { %v1159_v54 = vmul.f32 %v1158_v53, %v1158_v53 }
 0x81f   : > { %1160 = vadd.xlane.f32.xlu1 %v1159_v54  ;;  %v1355_v54 = vld [vmem:[#allocation4 + $0x30] sm:$0xff] }
 0x820   : > { %v1890_v56 = vpack.c.bf16 %v1356_v55, %v1355_v54 }
 0x8ac   : > { %v1161_v26 = vpop.xlane.xlu1 %1160 }
 0x8ad   : > { %v1162_v27 = vmul.f32 0.0078125, %v1161_v26 }
 0x8af   : > { %v1163_v28 = vadd.f32 1e-12, %v1162_v27 }
 0x8b1   : > { %1953 = vrsqrt.f32 %v1163_v28 }
 0x8bb   : > { %v1954_v29 = vpop.eup %1953 }
 0x8bc   : > { %v1165_v31 = vmul.f32 %v1954_v29, %v1158_v53  ;;  %v1888_v53 = vpack.c.bf16 %v1372_v52, %v1371_v51 }
 0x8be   : > { %v1172_v33 = vmul.f32 %v1590_v30, %v1165_v31  ;;  %1889 = vmatprep.subr.bf16.mxu0 %v1888_v53 }
 0x8bf   : > { %1891 = vmatpush3.bf16.msra.mxu0 %v1890_v56 }
 0x8c0   : > { %v2490_v34 = vadd.f32 %v1591_v32, %v1172_v33  ;;  %1893 = vmatprep.subr.bf16.mxu0 %v1892_v59 }
 0x8c2   : > { %1289 = vmatmul.mubr.f32.vlgmr.msra.gmra.mrb[10].mxu1 %v2490_v34 }
 0x8c3   : > { %1895 = vmatpush3.bf16.msra.mxu0 %v1894_v62 }
 0x8c4   : > { %1897 = vmatprep.subr.bf16.mxu0 %v1896_v3 }
 0x8c7   : > { %1899 = vmatpush3.bf16.msra.mxu0 %v1898_v5 }
 0x8c8   : > { %1901 = vmatprep.subr.bf16.mxu0 %v1900_v9 }
 0x8cb   : > { %1903 = vmatpush3.bf16.msra.mxu0 %v1902_v12 }
 0x8cc   : > { %1905 = vmatprep.subr.bf16.mxu0 %v1904_v18 }
 0x8cf   : > { %1907 = vmatpush3.bf16.msra.mxu0 %v1906_v21 }
 0x995   : > { %v1290_v25 = vpop.f32.mrb[10].mxu1 }
 0x996   : > { %v1291_v26 = vadd.f32 %v1290_v25, %v1217_v23  ;;  %v1292_v27 = vpop.f32.mrb[11].mxu1 }
 0x997   : > { %v1293_v28 = vadd.f32 %v1292_v27, %v1221_v24 }
 0x998   : > { %v1297_v29 = vmul.f32 0.70710677, %v1291_v26  ;;  %v1295_v10 = vmul.f32 0.5, %v1291_v26 }
 0x999   : > { %v1298_v30 = vmul.f32 0.70710677, %v1293_v28  ;;  %v1296_v7 = vmul.f32 0.5, %v1293_v28 }
 0x99a   : > { %v1299_v31 = vand.u32 2147483647, %v1297_v29  ;;  %vm1339_vm3 = vcmp.ge.f32.partialorder %v1297_v29, 0.0 }
 0x99b   : > { %v1300_v32 = vand.u32 2147483647, %v1298_v30  ;;  %vm1340_vm4 = vcmp.ge.f32.partialorder %v1298_v30, 0.0  ;;  %v1593_v30 = vld [vmem:[%s2530_s12] ss:$0 sm:$0xff] }
 0x99c   : > { %v1301_v33 = vmul.f32 0.3275911, %v1299_v31  ;;  %v1327_v37 = vmul.f32 %v1299_v31, %v1299_v31 }
 0x99d   : > { %v1302_v1 = vmul.f32 0.3275911, %v1300_v32  ;;  %v1328_v38 = vmul.f32 %v1300_v32, %v1300_v32 }
 0x99e   : > { %v1303_v35 = vadd.f32 1.0, %v1301_v33  ;;  %v1329_v39 = vsub.f32 0.0, %v1327_v37 }
 0x99f   : > { %v1304_v36 = vadd.f32 1.0, %v1302_v1  ;;  %v1330_v40 = vsub.f32 0.0, %v1328_v38 }
 0x9a0   : > { %1955 = vrcp.f32 %v1303_v35  ;;  %v1331_v43 = vmul.f32 1.442695, %v1329_v39 }
 0x9a1   : > { %1957 = vrcp.f32 %v1304_v36  ;;  %v1333_v46 = vmul.f32 1.442695, %v1330_v40 }
 0x9a2   : > { %1959 = vpow2.f32 %v1331_v43 }
 0x9a3   : > { %1961 = vpow2.f32 %v1333_v46 }
 0x9aa   : > { %v1956_v17 = vpop.eup %1955 }
 0x9ab   : > { %v1958_v14 = vpop.eup %1957  ;;  %v1309_v15 = vmul.f32 1.0614054, %v1956_v17 }
 0x9ac   : > { %v1310_v41 = vmul.f32 1.0614054, %v1958_v14  ;;  %v1960_v58 = vpop.eup %1959 }
 0x9ad   : > { %v1311_v42 = vadd.f32 -1.4531521, %v1309_v15  ;;  %v1962_v60 = vpop.eup %1961 }
 0x9ae   : > { %v1312_v44 = vadd.f32 -1.4531521, %v1310_v41 }
 0x9af   : > { %v1313_v45 = vmul.f32 %v1956_v17, %v1311_v42 }
 0x9b0   : > { %v1314_v47 = vmul.f32 %v1958_v14, %v1312_v44 }
 0x9b1   : > { %v1315_v48 = vadd.f32 1.4214138, %v1313_v45 }
 0x9b2   : > { %v1316_v8 = vadd.f32 1.4214138, %v1314_v47 }
 0x9b3   : > { %v1317_v49 = vmul.f32 %v1956_v17, %v1315_v48 }
 0x9b4   : > { %v1318_v50 = vmul.f32 %v1958_v14, %v1316_v8 }
 0x9b5   : > { %v1319_v51 = vadd.f32 -0.28449672, %v1317_v49 }
 0x9b6   : > { %v1320_v52 = vadd.f32 -0.28449672, %v1318_v50 }
 0x9b7   : > { %v1321_v53 = vmul.f32 %v1956_v17, %v1319_v51 }
 0x9b8   : > { %v1322_v54 = vmul.f32 %v1958_v14, %v1320_v52 }
 0x9b9   : > { %v1323_v55 = vadd.f32 0.2548296, %v1321_v53 }
 0x9ba   : > { %v1324_v56 = vadd.f32 0.2548296, %v1322_v54 }
 0x9bb   : > { %v1325_v57 = vmul.f32 %v1956_v17, %v1323_v55 }
 0x9bc   : > { %v1326_v59 = vmul.f32 %v1958_v14, %v1324_v56 }
 0x9bd   : > { %v1335_v61 = vmul.f32 %v1960_v58, %v1325_v57 }
 0x9be   : > { %v1336_v62 = vmul.f32 %v1962_v60, %v1326_v59 }
 0x9bf   : > { %v1337_v63 = vsub.f32 1.0, %v1335_v61 }
 0x9c0   : > { %v1338_v2 = vsub.f32 1.0, %v1336_v62 }
 0x9c1   : > { %v1341_v3 = vsub.f32 0.0, %v1337_v63 }
 0x9c2   : > { %v1342_v4 = vsub.f32 0.0, %v1338_v2 }
 0x9c3   : > { %v1343_v0 = vsel %vm1339_vm3, %v1337_v63, %v1341_v3 }
 0x9c4   : > { %v1345_v5 = vadd.f32 1.0, %v1343_v0  ;;  %v1344_v6 = vsel %vm1340_vm4, %v1338_v2, %v1342_v4 }
 0x9c5   : > { %v1346_v9 = vadd.f32 1.0, %v1344_v6 }
 0x9c6   : > { %v1347_v12 = vmul.f32 %v1345_v5, %v1295_v10 }
 0x9c7   : > { %v1348_v11 = vmul.f32 %v1346_v9, %v1296_v7 }
 0x9c9   : > { %1452 = vmatprep.mubr.f32.mxu0 %v1348_v11 }
 0x9ca   : > { %1453 = vmatmul.mubr.f32.vlgmr.msra.gmra.mrb[4].mxu0 %v1347_v12 }
 0xa9d   : > { %v1671_v13 = vpop.f32.mrb[4].mxu0 }
 0xa9e   : > { %v1672_v18 = vpop.f32.mrb[5].mxu0 }
 0xa9f   : > { %v1673_v19 = vadd.f32 %v1672_v18, %v1671_v13 }
 0xaa1   : > { %v1455_v20 = vadd.f32 %v1673_v19, %v1592_v16 }
 0xaa3   : > { %v1458_v21 = vadd.f32 %v1455_v20, %v2490_v34  ;;  %v1594_v34 = vld [vmem:[%s2531_s13] ss:$0 sm:$0xff] }
 0xaa5   : > { %1461 = vadd.xlane.f32.xlu1 %v1458_v21 }
 0xb32   : > { %v1462_v22 = vpop.xlane.xlu1 %1461 }
 0xb33   : > { %v1463_v23 = vmul.f32 0.0078125, %v1462_v22 }
 0xb35   : > { %v1464_v24 = vsub.f32 %v1458_v21, %v1463_v23 }
 0xb37   : > { %v1465_v25 = vmul.f32 %v1464_v24, %v1464_v24 }
 0xb39   : > { %1466 = vadd.xlane.f32.xlu1 %v1465_v25 }
 0xbc6   : > { %v1467_v26 = vpop.xlane.xlu1 %1466 }
 0xbc7   : > { %v1468_v27 = vmul.f32 0.0078125, %v1467_v26 }
 0xbc9   : > { %v1469_v28 = vadd.f32 1e-12, %v1468_v27 }
 0xbcb   : > { %1963 = vrsqrt.f32 %v1469_v28 }
 0xbd5   : > { %v1964_v29 = vpop.eup %1963 }
 0xbd6   : > { %v1471_v31 = vmul.f32 %v1964_v29, %v1464_v24 }
 0xbd8   : > { %v1478_v32 = vmul.f32 %v1593_v30, %v1471_v31 }
 0xbda   : > { %v1485_v33 = vadd.f32 %v1594_v34, %v1478_v32 }
 0xbdc   : > { %1486 = vst [vmem:[%s506_s18] sm:$0xff] %v1485_v33 }
 0xbdd PF: > { %s2544_s29 = sld [smem:[#allocation8_spill]] }
 0xbe3   : > { %s26_s29 = sadd.s32 1, %s2544_s29  }
 0xbe4   : > { %p23_p9 = scmp.ge.s32.totalorder %s26_s29, 4  }
 0xbe6   :  { %25 = sbr.rel (!%p23_p9) target bundleno = 2 (0x2), region = 118 }
 0xbed   :  { %1506 = vsyncpa [#allocation3], 1 }
 0xbee   :  { %1508 = vsyncpa [#allocation3 + $0x1], 1 }
 0xbef   :  { %1509 = vsyncpa [#allocation5], 1 }

// kernel: news_clf_forward.6
= control target key start
LH: loop header
LB: loop body
LE: loop exit
PB: predicated region body
PF: predicated region fallthrough
CT: control target
= control target key end

     0   :  { %s1971_s29 = smov 0   ;;  %s2491_s0 = inlined_call_operand.vmem [shape: f32[2,8,128], index: 0, kind: input, shape index: {}]   ;;  %s2492_s1 = inlined_call_operand.vmem [shape: f32[2,1,8], index: 1, kind: input, shape index: {}]   ;;  %s2493_s2 = inlined_call_operand.vmem [shape: f32[128,384], index: 2, kind: input, shape index: {}]   ;;  %s2494_s3 = inlined_call_operand.vmem [shape: f32[1,384], index: 3, kind: input, shape index: {}]   ;;  %s2495_s4 = inlined_call_operand.vmem [shape: f32[128,128], index: 4, kind: input, shape index: {}]   ;;  %s2496_s5 = inlined_call_operand.vmem [shape: f32[1,128], index: 5, kind: input, shape index: {}]   ;;  %s2497_s6 = inlined_call_operand.vmem [shape: f32[1,128], index: 6, kind: input, shape index: {}]   ;;  %s2498_s7 = inlined_call_operand.vmem [shape: f32[1,128], index: 7, kind: input, shape index: {}]   ;;  %s2499_s8 = inlined_call_operand.vmem [shape: f32[128,256], index: 8, kind: input, shape index: {}]   ;;  %s2500_s9 = inlined_call_operand.vmem [shape: f32[1,256], index: 9, kind: input, shape index: {}]   ;;  %s2501_s10 = inlined_call_operand.vmem [shape: f32[256,128], index: 10, kind: input, shape index: {}]   ;;  %s2502_s11 = inlined_call_operand.vmem [shape: f32[1,128], index: 11, kind: input, shape index: {}]   ;;  %s2503_s12 = inlined_call_operand.vmem [shape: f32[1,128], index: 12, kind: input, shape index: {}]   ;;  %s2504_s13 = inlined_call_operand.vmem [shape: f32[1,128], index: 13, kind: input, shape index: {}]   ;;  %s2505_s14 = inlined_call_operand.vmem [shape: f32[2,8,128], index: 14, kind: output, shape index: {}]  }
   0x1 LB: > { %s1519_s30 = sadd.s32 4294967295, %s1890_s29   ;;  %p1523_p0 = scmp.ge.s32.totalorder %s1890_s29, 1  ;;  %s1890_s29 = sphi %s1971_s29, %s24_s29  }
   0x2   : > { %p419_p1 = scmp.lt.s32.totalorder %s1890_s29, 3 }
   0x4   : > { %p420_p2 = pnand %p1523_p0, %p419_p1 }
   0x5   : > { %v480_v0 = vld [vmem:[%s2493_s2 + $0x8] sm:$0xff] (!%p420_p2)  ;;  %v483_v1 = vld [vmem:[%s2493_s2 + $0x20] sm:$0xff] (!%p420_p2)  ;;  %v482_v4 = vld [vmem:[%s2493_s2 + $0x18] sm:$0xff] (!%p420_p2)  ;;  %v1892_v7 = vmov (!%p420_p2), 0.0   ;;  %v1893_v8 = vmov (!%p420_p2), 0.0|0.0   ;;  %p2080_p3 = scmp.lt.s32.totalorder (!%p420_p2), %s1519_s30, 1 }
   0x6   : > { %423 = sbr.rel (%p420_p2) target bundleno = 2972 (0xb9c), region = 76  ;;  %v479_v2 = vld [vmem:[%s2493_s2] sm:$0xff] (!%p420_p2)  ;;  %v1708_v3 = vpack.c.bf16 (!%p420_p2), %v483_v1, %v480_v0  ;;  %v486_v5 = vld [vmem:[%s2493_s2 + $0x38] sm:$0xff] (!%p420_p2)  ;;  %v489_v6 = vld [vmem:[%s2493_s2 + $0x50] sm:$0xff] (!%p420_p2)  ;;  %608 = vmatprep.mubr.f32.mxu0 (!%p420_p2), %v1892_v7  ;;  %1740 = vmatprep.subr.bf16.mxu1 (!%p420_p2), %v1893_v8  ;;  %vm1894_vm0 = vmmov (!%p420_p2), 0   ;;  %vm685_vm1 = vcmask (!%p420_p2), 523264  }
   0x7   : > { %v1710_v9 = vpack.c.bf16 (!%p420_p2), %v482_v4, %v479_v2  ;;  %v1712_v10 = vpack.c.bf16 (!%p420_p2), %v489_v6, %v486_v5  ;;  %v485_v11 = vld [vmem:[%s2493_s2 + $0x30] sm:$0xff] (!%p420_p2)  ;;  %v488_v12 = vld [vmem:[%s2493_s2 + $0x48] sm:$0xff] (!%p420_p2)  ;;  %v495_v14 = vld [vmem:[%s2493_s2 + $0x80] sm:$0xff] (!%p420_p2)  ;;  %1650 = vmatprep.mubr.msk.f32.mxu1 (!%p420_p2), %vm1894_vm0, %v1892_v7  ;;  %s1895_s21 = smov (!%p420_p2), 64   ;;  %vm770_vm2 = vcmask (!%p420_p2), 64512  }
   0x8   : > { %v492_v13 = vld [vmem:[%s2493_s2 + $0x68] sm:$0xff] (!%p420_p2)  ;;  %1709 = vmatprep.subr.bf16.mxu0 (!%p420_p2), %v1708_v3  ;;  %v1714_v15 = vpack.c.bf16 (!%p420_p2), %v488_v12, %v485_v11  ;;  %v491_v17 = vld [vmem:[%s2493_s2 + $0x60] sm:$0xff] (!%p420_p2)  ;;  %v494_v18 = vld [vmem:[%s2493_s2 + $0x78] sm:$0xff] (!%p420_p2) }
   0x9   : > { %1711 = vmatpush1.bf16.msra.mxu0 (!%p420_p2), %v1710_v9  ;;  %v1716_v16 = vpack.c.bf16 (!%p420_p2), %v495_v14, %v492_v13  ;;  %v498_v19 = vld [vmem:[%s2493_s2 + $0x98] sm:$0xff] (!%p420_p2)  ;;  %v501_v20 = vld [vmem:[%s2493_s2 + $0xb0] sm:$0xff] (!%p420_p2)  ;;  %v1718_v21 = vpack.c.bf16 (!%p420_p2), %v494_v18, %v491_v17  ;;  %v500_v24 = vld [vmem:[%s2493_s2 + $0xa8] sm:$0xff] (!%p420_p2)  ;;  %v529_v13 = vlaneseq (!%p420_p2) }
   0xa   : > { %1713 = vmatprep.subr.bf16.mxu0 (!%p420_p2), %v1712_v10  ;;  %v1720_v22 = vpack.c.bf16 (!%p420_p2), %v501_v20, %v498_v19  ;;  %v497_v23 = vld [vmem:[%s2493_s2 + $0x90] sm:$0xff] (!%p420_p2)  ;;  %v504_v25 = vld [vmem:[%s2493_s2 + $0xc8] sm:$0xff] (!%p420_p2)  ;;  %v507_v26 = vld [vmem:[%s2493_s2 + $0xe0] sm:$0xff] (!%p420_p2) }
   0xb   : > { %v481_v27 = vld [vmem:[%s2493_s2 + $0x10] sm:$0xff] (!%p420_p2)  ;;  %v484_v28 = vld [vmem:[%s2493_s2 + $0x28] sm:$0xff] (!%p420_p2)  ;;  %v487_v29 = vld [vmem:[%s2493_s2 + $0x40] sm:$0xff] (!%p420_p2)  ;;  %v1722_v30 = vpack.c.bf16 (!%p420_p2), %v500_v24, %v497_v23  ;;  %v1724_v33 = vpack.c.bf16 (!%p420_p2), %v507_v26, %v504_v25  ;;  %v2162_v14 = vshrl.u32 (!%p420_p2), %v529_v13, 7 }
   0xc   : > { %v1741_v31 = vpack.c.bf16 (!%p420_p2), %v484_v28, %v481_v27  ;;  %v490_v32 = vld [vmem:[%s2493_s2 + $0x58] sm:$0xff] (!%p420_p2)  ;;  %v503_v34 = vld [vmem:[%s2493_s2 + $0xc0] sm:$0xff] (!%p420_p2)  ;;  %v513_v37 = vld [vmem:[%s2493_s2 + $0x110] sm:$0xff] (!%p420_p2) }
   0xd   : > { %1715 = vmatpush1.bf16.msra.mxu0 %v1714_v15  ;;  %v506_v35 = vld [vmem:[%s2493_s2 + $0xd8] sm:$0xff]  ;;  %v1744_v38 = vpack.c.bf16 %v490_v32, %v487_v29  ;;  %v493_v39 = vld [vmem:[%s2493_s2 + $0x70] sm:$0xff]  ;;  %v496_v40 = vld [vmem:[%s2493_s2 + $0x88] sm:$0xff]  ;;  %s2508_s30 = smov (!%p2080_p3, %s1519_s30), 1  ;;  %v535_v15 = vsub.s32 1, %v2162_v14  ;;  %v531_v17 = vsub.s32 0, %v2162_v14 }
   0xe   : > { %1717 = vmatprep.subr.bf16.mxu0 %v1716_v16  ;;  %v510_v36 = vld [vmem:[%s2493_s2 + $0xf8] sm:$0xff]  ;;  %1742 = vmatpush3.bf16.msra.mxu1 %v1741_v31  ;;  %v1726_v41 = vpack.c.bf16 %v506_v35, %v503_v34  ;;  %v509_v43 = vld [vmem:[%s2493_s2 + $0xf0] sm:$0xff]  ;;  %v512_v44 = vld [vmem:[%s2493_s2 + $0x108] sm:$0xff]  ;;  %v1747_v47 = vpack.c.bf16 %v496_v40, %v493_v39  ;;  %s1524_s16 = sshll.u32 %s2508_s30, 3  ;;  %v539_v24 = vsub.s32 2, %v2162_v14  ;;  %s472_s25 = scalar_lea.vmem %s2492_s1, %s2508_s30 }
   0xf   : > { %1743 = vmatprep.subr.bf16.mxu1 %v1893_v8  ;;  %v1728_v42 = vpack.c.bf16 %v513_v37, %v510_v36  ;;  %v516_v45 = vld [vmem:[%s2493_s2 + $0x128] sm:$0xff]  ;;  %v519_v46 = vld [vmem:[%s2493_s2 + $0x140] sm:$0xff]  ;;  %v502_v49 = vld [vmem:[%s2493_s2 + $0xb8] sm:$0xff]  ;;  %v1730_v50 = vpack.c.bf16 %v512_v44, %v509_v43  ;;  %s469_s24 = scalar_lea.vmem %s2491_s0, %s1524_s16  ;;  %s476_s22 = scalar_lea.vmem %s2505_s14, %s1524_s16 }
  0x10   : > { %v499_v48 = vld [vmem:[%s2493_s2 + $0xa0] sm:$0xff]  ;;  %v1732_v51 = vpack.c.bf16 %v519_v46, %v516_v45  ;;  %v518_v53 = vld [vmem:[%s2493_s2 + $0x138] sm:$0xff]  ;;  %v525_v55 = vld [vmem:[%s2493_s2 + $0x170] sm:$0xff] }
  0x11   : > { %1719 = vmatpush1.bf16.msra.mxu0 %v1718_v21  ;;  %v515_v52 = vld [vmem:[%s2493_s2 + $0x120] sm:$0xff]  ;;  %v522_v54 = vld [vmem:[%s2493_s2 + $0x158] sm:$0xff]  ;;  %v1750_v56 = vpack.c.bf16 %v502_v49, %v499_v48  ;;  %v505_v57 = vld [vmem:[%s2493_s2 + $0xd0] sm:$0xff] }
  0x12   : > { %1721 = vmatprep.subr.bf16.mxu0 %v1720_v22  ;;  %1745 = vmatpush3.bf16.msra.mxu1 %v1744_v38  ;;  %v508_v58 = vld [vmem:[%s2493_s2 + $0xe8] sm:$0xff]  ;;  %v1734_v59 = vpack.c.bf16 %v518_v53, %v515_v52  ;;  %v1736_v60 = vpack.c.bf16 %v525_v55, %v522_v54  ;;  %v521_v61 = vld [vmem:[%s2493_s2 + $0x150] sm:$0xff]  ;;  %v511_v0 = vld [vmem:[%s2493_s2 + $0x100] sm:$0xff] }
  0x13   : > { %1746 = vmatprep.subr.bf16.mxu1 %v1893_v8  ;;  %v524_v62 = vld [vmem:[%s2493_s2 + $0x168] sm:$0xff]  ;;  %v1753_v63 = vpack.c.bf16 %v508_v58, %v505_v57  ;;  %v514_v1 = vld [vmem:[%s2493_s2 + $0x118] sm:$0xff]  ;;  %v517_v4 = vld [vmem:[%s2493_s2 + $0x130] sm:$0xff] }
  0x14   : > { %v1738_v2 = vpack.c.bf16 %v524_v62, %v521_v61  ;;  %v1756_v3 = vpack.c.bf16 %v514_v1, %v511_v0  ;;  %v520_v5 = vld [vmem:[%s2493_s2 + $0x148] sm:$0xff]  ;;  %v2142_v6 = vld [vmem:[%s469_s24] sm:$0xff]  ;;  %v526_v11 = vld [vmem:[%s2493_s2 + $0x178] sm:$0xff] }
  0x15   : > { %1723 = vmatpush1.bf16.msra.mxu0 %v1722_v30  ;;  %v1759_v9 = vpack.c.bf16 %v520_v5, %v517_v4  ;;  %v523_v10 = vld [vmem:[%s2493_s2 + $0x160] sm:$0xff]  ;;  %v1029_v62 = vld [vmem:[%s2495_s4 + $0x8] sm:$0xff]  ;;  %v1031_v1 = vld [vmem:[%s2495_s4 + $0x18] sm:$0xff] }
  0x16   : > { %1725 = vmatprep.subr.bf16.mxu0 %v1724_v33  ;;  %1748 = vmatpush3.bf16.msra.mxu1 %v1747_v47  ;;  %v1762_v12 = vpack.c.bf16 %v526_v11, %v523_v10  ;;  %v527_v16 = vld [vmem:[%s2494_s3] sm:$0x7]  ;;  %v1034_v5 = vld [vmem:[%s2495_s4 + $0x30] sm:$0xff] }
  0x17   : > { %1749 = vmatprep.subr.bf16.mxu1 %v1893_v8  ;;  %v536_v18 = vrot.slane %v527_v16, %v535_v15  ;;  %v532_v20 = vrot.slane %v527_v16, %v531_v17  ;;  %v540_v25 = vrot.slane %v527_v16, %v539_v24  ;;  %v1528_v30 = vld [vmem:[%s472_s25] ss:$0 sm:$0xff]  ;;  %v1038_v16 = vld [vmem:[%s2495_s4 + $0x50] sm:$0xff]  ;;  %v1043_v24 = vld [vmem:[%s2495_s4 + $0x78] sm:$0xff] }
  0x18   : > { %v1028_v61 = vld [vmem:[%s2495_s4] sm:$0xff] }
  0x19   : > { %1727 = vmatpush1.bf16.msra.mxu0 %v1726_v41  ;;  %v1765_v0 = vpack.c.bf16 %v1029_v62, %v1028_v61  ;;  %v1036_v11 = vld [vmem:[%s2495_s4 + $0x40] sm:$0xff]  ;;  %v1167_v61 = vld [vmem:[%s2499_s8 + $0x88] sm:$0xff]  ;;  %v1169_v62 = vld [vmem:[%s2499_s8 + $0x98] sm:$0xff] }
  0x1a   : > { %1729 = vmatprep.subr.bf16.mxu0 %v1728_v42  ;;  %1751 = vmatpush3.bf16.msra.mxu1 %v1750_v56 }
  0x1b   : > { %1752 = vmatprep.subr.bf16.mxu1 %v1893_v8 }
  0x1d   : > { %1731 = vmatpush1.bf16.msra.mxu0 %v1730_v50 }
  0x1e   : > { %1733 = vmatprep.subr.bf16.mxu0 %v1732_v51  ;;  %1754 = vmatpush3.bf16.msra.mxu1 %v1753_v63  ;;  %v1030_v63 = vld [vmem:[%s2495_s4 + $0x10] sm:$0xff] }
  0x1f   : > { %1755 = vmatprep.subr.bf16.mxu1 %v1893_v8 }
  0x21   : > { %1735 = vmatpush1.bf16.msra.mxu0 %v1734_v59 }
  0x22   : > { %1737 = vmatprep.subr.bf16.mxu0 %v1736_v60  ;;  %1757 = vmatpush3.bf16.msra.mxu1 %v1756_v3  ;;  %v1033_v3 = vld [vmem:[%s2495_s4 + $0x28] sm:$0xff] }
  0x23   : > { %1758 = vmatprep.subr.bf16.mxu1 %v1893_v8 }
  0x25   : > { %1739 = vmatpush1.bf16.msra.mxu0 %v1738_v2  ;;  %v1768_v2 = vpack.c.bf16 %v1031_v1, %v1030_v63  ;;  %v1804_v63 = vpack.c.bf16 %v1169_v62, %v1167_v61  ;;  %v1168_v1 = vld [vmem:[%s2499_s8 + $0x90] sm:$0xff]  ;;  %v1328_v61 = vld [vmem:[%s2501_s10 + $0x48] sm:$0xff] }
  0x26   : > { %1764 = vmatprep.subr.bf16.mxu0 %v1893_v8  ;;  %1760 = vmatpush3.bf16.msra.mxu1 %v1759_v9  ;;  %v1035_v9 = vld [vmem:[%s2495_s4 + $0x38] sm:$0xff] }
  0x27   : > { %1761 = vmatprep.subr.bf16.mxu1 %v1893_v8  ;;  %v1774_v10 = vpack.c.bf16 %v1035_v9, %v1034_v5  ;;  %v1172_v5 = vld [vmem:[%s2499_s8 + $0xb0] sm:$0xff] }
  0x28   : > { %609 = vmatmul.mubr.f32.vlgmr.msra.gmra.mrb[0].mxu0 %v2142_v6 }
  0x29   : > { %1705 = vmatprep.mubr.msk.f32.mxu0 %vm1894_vm0, %v1892_v7  ;;  %1766 = vmatpush3.bf16.msra.mxu0 %v1765_v0  ;;  %v1166_v0 = vld [vmem:[%s2499_s8 + $0x80] sm:$0xff] }
  0x2a   : > { %1763 = vmatpush3.bf16.msra.mxu1 %v1762_v12  ;;  %1767 = vmatprep.subr.bf16.mxu0 %v1893_v8  ;;  %v1037_v12 = vld [vmem:[%s2495_s4 + $0x48] sm:$0xff] }
  0x2b   : > { %1653 = vmatprep.subr.mxu1 %v1892_v7  ;;  %v1777_v13 = vpack.c.bf16 %v1037_v12, %v1036_v11  ;;  %v1177_v11 = vld [vmem:[%s2499_s8 + $0xd8] sm:$0xff] }
  0x2d   : > { %1651 = vmatmul.mubr.f32.vlgmr.msra.gmra.mrb[0].mxu1 %v2142_v6  ;;  %1769 = vmatpush3.bf16.msra.mxu0 %v1768_v2  ;;  %v1171_v2 = vld [vmem:[%s2499_s8 + $0xa8] sm:$0xff] }
  0x2e   : > { %1655 = vmatprep.mubr.msk.f32.mxu1 %vm1894_vm0, %v1892_v7  ;;  %1770 = vmatprep.subr.bf16.mxu0 %v1893_v8 }
  0xfb   : > { %v610_v19 = vpop.f32.mrb[0].mxu0 }
  0xfc   : > { %v612_v21 = vpop.f32.mrb[1].mxu0  ;;  %v611_v23 = vadd.f32 %v610_v19, %v532_v20  ;;  %v1040_v20 = vld [vmem:[%s2495_s4 + $0x60] sm:$0xff] }
  0xfd   : > { %v613_v22 = vadd.f32 %v612_v21, %v536_v18  ;;  %v1039_v18 = vld [vmem:[%s2495_s4 + $0x58] sm:$0xff]  ;;  %v1041_v21 = vld [vmem:[%s2495_s4 + $0x68] sm:$0xff] }
  0xfe   : > { %v1780_v19 = vpack.c.bf16 %v1039_v18, %v1038_v16  ;;  %v1174_v16 = vld [vmem:[%s2499_s8 + $0xc0] sm:$0xff]  ;;  %v1176_v18 = vld [vmem:[%s2499_s8 + $0xd0] sm:$0xff] }
  0xff   : > { %857 = vrot.lane.b32.xlu1 %v613_v22, %s1895_s21  ;;  %1654 = vmatpush3.xpose.msk.msra.mxu1 %vm685_vm1, %v613_v22  ;;  %v1783_v22 = vpack.c.bf16 %v1041_v21, %v1040_v20  ;;  %v1181_v20 = vld [vmem:[%s2499_s8 + $0xf8] sm:$0xff]  ;;  %v1814_v21 = vpack.c.bf16 %v1176_v18, %v1174_v16 }
 0x100   : > { %1658 = vmatprep.subr.mxu1 %v1892_v7  ;;  %v681_v26 = vpop.f32.mrb[0].mxu1  ;;  %v1350_v16 = vld [vmem:[%s2501_s10 + $0xf8] sm:$0xff] }
 0x101   : > { %v682_v27 = vadd.f32 %v681_v26, %v540_v25  ;;  %v1652_v28 = vpop.f32.mrb[1].mxu1 }
 0x102   : > { %1656 = vmatmul.mubr.msk.f32.vlgmr.msra.gmra.mrb[2].mxu1 %vm685_vm1, %v611_v23 }
 0x103   : > { %855 = vrot.lane.b32.xlu1 %v611_v23, %s1895_s21  ;;  %1660 = vmatprep.mubr.msk.f32.mxu1 %vm1894_vm0, %v1892_v7  ;;  %v1042_v23 = vld [vmem:[%s2495_s4 + $0x70] sm:$0xff] }
 0x104   : > { %1659 = vmatpush3.msra.mxu1 %v682_v27  ;;  %v1786_v25 = vpack.c.bf16 %v1043_v24, %v1042_v23  ;;  %v1178_v23 = vld [vmem:[%s2499_s8 + $0xe0] sm:$0xff]  ;;  %v1180_v24 = vld [vmem:[%s2499_s8 + $0xf0] sm:$0xff] }
 0x105   : > { %1663 = vmatprep.subr.mxu1 %v1892_v7 }
 0x171   : > { %v858_v42 = vpop.permute.xlu1 %857 }
 0x175   : > { %v856_v44 = vpop.permute.xlu1 %855 }
 0x1d5   : > { %v758_v29 = vpop.f32.mrb[2].mxu1 }
 0x1d6   : > { %v762_v31 = vmul.f32 0.125, %v758_v29  ;;  %v1657_v32 = vpop.f32.mrb[3].mxu1 }
 0x1d8   : > { %v769_v33 = vadd.f32 %v1528_v30, %v762_v31 }
 0x1da   : > { %v771_v34 = vsel %vm770_vm2, %v769_v33, -inf }
 0x1db   : > { %772 = vmax.xlane.f32.xlu0 %v771_v34 }
 0x268   : > { %v773_v35 = vpop.xlane.xlu0 %772 }
 0x269   : > { %v774_v36 = vsub.f32 %v769_v33, %v773_v35  ;;  %v1153_v35 = vld [vmem:[%s2499_s8 + $0x18] sm:$0xff] }
 0x26b   : > { %v775_v37 = vmul.f32 1.442695, %v774_v36  ;;  %v1150_v36 = vld [vmem:[%s2499_s8] sm:$0xff] }
 0x26d   : > { %1864 = vpow2.f32 %v775_v37 }
 0x277   : > { %v1865_v38 = vpop.eup %1864 }
 0x278   : > { %v777_v39 = vsel %vm770_vm2, %v1865_v38, 0.0 }
 0x279   : > { %778 = vadd.xlane.f32.xlu0 %v777_v39  ;;  %v1157_v39 = vld [vmem:[%s2499_s8 + $0x38] sm:$0xff] }
 0x306   : > { %v779_v40 = vpop.xlane.xlu0 %778 }
 0x307   : > { %1866 = vrcp.f32 %v779_v40 }
 0x311   : > { %v1867_v41 = vpop.eup %1866 }
 0x312   : > { %v781_v43 = vmul.f32 %v1867_v41, %v1865_v38  ;;  %v1152_v38 = vld [vmem:[%s2499_s8 + $0x10] sm:$0xff] }
 0x313   : > { %v1790_v40 = vpack.c.bf16 %v1152_v38, %v1150_v36  ;;  %v1320_v38 = vld [vmem:[%s2501_s10 + $0x8] sm:$0xff] }
 0x314   : > { %1661 = vmatmul.mubr.msk.f32.vlgmr.msra.gmra.mrb[4].mxu1 %vm770_vm2, %v781_v43  ;;  %v1156_v43 = vld [vmem:[%s2499_s8 + $0x30] sm:$0xff] }
 0x315   : > { %1664 = vmatpush3.xpose.msk.msra.mxu1 %vm685_vm1, %v858_v42  ;;  %1665 = vmatprep.mubr.msk.f32.mxu1 %vm1894_vm0, %v1892_v7  ;;  %v1154_v42 = vld [vmem:[%s2499_s8 + $0x20] sm:$0xff] }
 0x316   : > { %1668 = vmatprep.subr.mxu1 %v1892_v7 }
 0x318   : > { %1666 = vmatmul.mubr.msk.f32.vlgmr.msra.gmra.mrb[6].mxu1 %vm685_vm1, %v856_v44  ;;  %v1159_v44 = vld [vmem:[%s2499_s8 + $0x48] sm:$0xff] }
 0x319   : > { %1670 = vmatprep.mubr.msk.f32.mxu1 %vm1894_vm0, %v1892_v7 }
 0x3e7   : > { %v2196_v45 = vpop.f32.mrb[4].mxu1 }
 0x3e8   : > { %v1662_v46 = vpop.f32.mrb[5].mxu1 }
 0x3e9   : > { %v1794_v46 = vpack.c.bf16 %v1156_v43, %v1154_v42  ;;  %v1321_v42 = vld [vmem:[%s2501_s10 + $0x10] sm:$0xff]  ;;  %v1322_v43 = vld [vmem:[%s2501_s10 + $0x18] sm:$0xff] }
 0x3eb   : > { %v929_v47 = vpop.f32.mrb[6].mxu1 }
 0x3ec   : > { %v933_v48 = vmul.f32 0.125, %v929_v47  ;;  %v1667_v49 = vpop.f32.mrb[7].mxu1 }
 0x3ed   : > { %v1160_v49 = vld [vmem:[%s2499_s8 + $0x50] sm:$0xff] }
 0x3ee   : > { %v934_v50 = vadd.f32 %v1528_v30, %v933_v48  ;;  %v1533_v30 = vld [vmem:[%s2496_s5] ss:$0 sm:$0xff] }
 0x3ef   : > { %v1158_v48 = vld [vmem:[%s2499_s8 + $0x40] sm:$0xff] }
 0x3f0   : > { %v935_v51 = vsel %vm770_vm2, %v934_v50, -inf }
 0x3f1   : > { %936 = vmax.xlane.f32.xlu0 %v935_v51 }
 0x407   : > { %947 = vrot.lane.b32.xlu0 %v682_v27, %s1895_s21 }
 0x47e   : > { %v937_v52 = vpop.xlane.xlu0 %936 }
 0x47f   : > { %v938_v53 = vsub.f32 %v934_v50, %v937_v52  ;;  %v1798_v50 = vpack.c.bf16 %v1160_v49, %v1158_v48  ;;  %v1323_v48 = vld [vmem:[%s2501_s10 + $0x20] sm:$0xff]  ;;  %v1324_v49 = vld [vmem:[%s2501_s10 + $0x28] sm:$0xff] }
 0x481   : > { %v939_v54 = vmul.f32 1.442695, %v938_v53 }
 0x482   : > { %v948_v55 = vpop.permute.xlu0 %947 }
 0x483   : > { %1868 = vpow2.f32 %v939_v54  ;;  %1669 = vmatpush3.msra.mxu1 %v948_v55  ;;  %v1163_v55 = vld [vmem:[%s2499_s8 + $0x68] sm:$0xff] }
 0x48d   : > { %v1869_v56 = vpop.eup %1868 }
 0x48e   : > { %v941_v57 = vsel %vm770_vm2, %v1869_v56, 0.0 }
 0x48f   : > { %942 = vadd.xlane.f32.xlu1 %v941_v57 }
 0x51c   : > { %v943_v58 = vpop.xlane.xlu1 %942 }
 0x51d   : > { %1870 = vrcp.f32 %v943_v58  ;;  %v1162_v58 = vld [vmem:[%s2499_s8 + $0x60] sm:$0xff] }
 0x527   : > { %v1871_v59 = vpop.eup %1870 }
 0x528   : > { %v945_v60 = vmul.f32 %v1871_v59, %v1869_v56  ;;  %v1165_v56 = vld [vmem:[%s2499_s8 + $0x78] sm:$0xff]  ;;  %v1164_v59 = vld [vmem:[%s2499_s8 + $0x70] sm:$0xff] }
 0x529   : > { %v1800_v57 = vpack.c.bf16 %v1165_v56, %v1163_v55  ;;  %v1326_v55 = vld [vmem:[%s2501_s10 + $0x38] sm:$0xff] }
 0x52a   : > { %1671 = vmatmul.mubr.msk.f32.vlgmr.msra.gmra.mrb[8].mxu1 %vm770_vm2, %v945_v60  ;;  %v1802_v60 = vpack.c.bf16 %v1164_v59, %v1162_v58  ;;  %v1344_v58 = vld [vmem:[%s2501_s10 + $0xc8] sm:$0xff] }
 0x52b   : > { %1258 = vmatprep.mubr.f32.mxu1 %v1892_v7  ;;  %v1032_v7 = vld [vmem:[%s2495_s4 + $0x20] sm:$0xff] }
 0x52c   : > { %v1771_v4 = vpack.c.bf16 %v1033_v3, %v1032_v7  ;;  %v1806_v7 = vpack.c.bf16 %v1168_v1, %v1166_v0  ;;  %v1173_v3 = vld [vmem:[%s2499_s8 + $0xb8] sm:$0xff] }
 0x52d   : > { %v1808_v9 = vpack.c.bf16 %v1173_v3, %v1171_v2  ;;  %v1346_v0 = vld [vmem:[%s2501_s10 + $0xd8] sm:$0xff]  ;;  %v1329_v2 = vld [vmem:[%s2501_s10 + $0x50] sm:$0xff] }
 0x52e   : > { %1772 = vmatpush3.bf16.msra.mxu0 %v1771_v4  ;;  %v1170_v4 = vld [vmem:[%s2499_s8 + $0xa0] sm:$0xff] }
 0x52f   : > { %1773 = vmatprep.subr.bf16.mxu0 %v1893_v8  ;;  %v1810_v12 = vpack.c.bf16 %v1172_v5, %v1170_v4  ;;  %v1347_v4 = vld [vmem:[%s2501_s10 + $0xe0] sm:$0xff]  ;;  %v1348_v5 = vld [vmem:[%s2501_s10 + $0xe8] sm:$0xff] }
 0x532   : > { %1775 = vmatpush3.bf16.msra.mxu0 %v1774_v10  ;;  %v1175_v10 = vld [vmem:[%s2499_s8 + $0xc8] sm:$0xff] }
 0x533   : > { %1776 = vmatprep.subr.bf16.mxu0 %v1893_v8 }
 0x536   : > { %1778 = vmatpush3.bf16.msra.mxu0 %v1777_v13  ;;  %v1812_v13 = vpack.c.bf16 %v1177_v11, %v1175_v10  ;;  %v1331_v10 = vld [vmem:[%s2501_s10 + $0x60] sm:$0xff]  ;;  %v1332_v11 = vld [vmem:[%s2501_s10 + $0x68] sm:$0xff] }
 0x537   : > { %1779 = vmatprep.subr.bf16.mxu0 %v1893_v8 }
 0x53a   : > { %1781 = vmatpush3.bf16.msra.mxu0 %v1780_v19  ;;  %v1179_v19 = vld [vmem:[%s2499_s8 + $0xe8] sm:$0xff] }
 0x53b   : > { %1782 = vmatprep.subr.bf16.mxu0 %v1893_v8 }
 0x53e   : > { %1784 = vmatpush3.bf16.msra.mxu0 %v1783_v22  ;;  %v1816_v22 = vpack.c.bf16 %v1181_v20, %v1179_v19  ;;  %v1333_v19 = vld [vmem:[%s2501_s10 + $0x70] sm:$0xff]  ;;  %v1334_v20 = vld [vmem:[%s2501_s10 + $0x78] sm:$0xff] }
 0x53f   : > { %1785 = vmatprep.subr.bf16.mxu0 %v1893_v8  ;;  %v1151_v8 = vld [vmem:[%s2499_s8 + $0x8] sm:$0xff] }
 0x540   : > { %v1788_v37 = vpack.c.bf16 %v1153_v35, %v1151_v8  ;;  %v1335_v8 = vld [vmem:[%s2501_s10 + $0x80] sm:$0xff]  ;;  %v1336_v35 = vld [vmem:[%s2501_s10 + $0x88] sm:$0xff] }
 0x541   : > { %v1820_v36 = vpack.c.bf16 %v1336_v35, %v1335_v8 }
 0x542   : > { %1787 = vmatpush3.bf16.msra.mxu0 %v1786_v25  ;;  %1789 = vmatprep.subr.bf16.mxu1 %v1788_v37  ;;  %v1818_v25 = vpack.c.bf16 %v1180_v24, %v1178_v23  ;;  %v1319_v37 = vld [vmem:[%s2501_s10] sm:$0xff] }
 0x543   : > { %1791 = vmatpush1.bf16.msra.mxu1 %v1790_v40  ;;  %1821 = vmatprep.subr.bf16.mxu0 %v1820_v36  ;;  %v1338_v40 = vld [vmem:[%s2501_s10 + $0x98] sm:$0xff] }
 0x5fd   : > { %v1019_v26 = vpop.f32.mrb[8].mxu1 }
 0x5fe   : > { %1024 = vrot.lane.b32.xlu0 %v1019_v26, %s1895_s21  ;;  %v1672_v27 = vpop.f32.mrb[9].mxu1 }
 0x670   : > { %v1025_v28 = vpop.permute.xlu0 %1024 }
 0x671   : > { %v1027_v29 = vsel %vm685_vm1, %v2196_v45, %v1025_v28  ;;  %v1161_v45 = vld [vmem:[%s2499_s8 + $0x58] sm:$0xff] }
 0x672   : > { %1706 = vmatmul.mubr.f32.vlgmr.msra.gmra.mrb[2].mxu0 %v1027_v29  ;;  %v1796_v47 = vpack.c.bf16 %v1161_v45, %v1159_v44  ;;  %v1826_v44 = vpack.c.bf16 %v1322_v43, %v1321_v42  ;;  %v1339_v45 = vld [vmem:[%s2501_s10 + $0xa0] sm:$0xff] }
 0x745   : > { %v1117_v31 = vpop.f32.mrb[2].mxu0 }
 0x746   : > { %v1118_v32 = vadd.f32 %v1533_v30, %v1117_v31  ;;  %v1707_v33 = vpop.f32.mrb[3].mxu0  ;;  %v1534_v30 = vld [vmem:[%s2497_s6] ss:$0 sm:$0xff] }
 0x748   : > { %v1121_v34 = vadd.f32 %v1118_v32, %v2142_v6  ;;  %v1155_v6 = vld [vmem:[%s2499_s8 + $0x28] sm:$0xff]  ;;  %v1535_v32 = vld [vmem:[%s2498_s7] ss:$0 sm:$0xff] }
 0x749   : > { %v1792_v41 = vpack.c.bf16 %v1157_v39, %v1155_v6  ;;  %v1822_v6 = vpack.c.bf16 %v1320_v38, %v1319_v37  ;;  %v1337_v39 = vld [vmem:[%s2501_s10 + $0x90] sm:$0xff] }
 0x74a   : > { %1124 = vadd.xlane.f32.xlu0 %v1121_v34 }
 0x74b   : > { %1793 = vmatprep.subr.bf16.mxu1 %v1792_v41  ;;  %1823 = vmatpush3.bf16.msra.mxu0 %v1822_v6  ;;  %v1824_v41 = vpack.c.bf16 %v1338_v40, %v1337_v39 }
 0x74c   : > { %1795 = vmatpush1.bf16.msra.mxu1 %v1794_v46  ;;  %v1340_v46 = vld [vmem:[%s2501_s10 + $0xa8] sm:$0xff] }
 0x74d   : > { %1797 = vmatprep.subr.bf16.mxu1 %v1796_v47  ;;  %1825 = vmatprep.subr.bf16.mxu0 %v1824_v41  ;;  %v1828_v47 = vpack.c.bf16 %v1340_v46, %v1339_v45 }
 0x74f   : > { %1827 = vmatpush3.bf16.msra.mxu0 %v1826_v44 }
 0x750   : > { %1799 = vmatpush1.bf16.msra.mxu1 %v1798_v50  ;;  %v1830_v50 = vpack.c.bf16 %v1324_v49, %v1323_v48  ;;  %1829 = vmatprep.subr.bf16.mxu0 %v1828_v47 }
 0x751   : > { %1801 = vmatprep.subr.bf16.mxu1 %v1800_v57  ;;  %v1343_v57 = vld [vmem:[%s2501_s10 + $0xc0] sm:$0xff] }
 0x752   : > { %v1836_v59 = vpack.c.bf16 %v1344_v58, %v1343_v57 }
 0x753   : > { %1831 = vmatpush3.bf16.msra.mxu0 %v1830_v50 }
 0x754   : > { %1803 = vmatpush1.bf16.msra.mxu1 %v1802_v60  ;;  %v1327_v60 = vld [vmem:[%s2501_s10 + $0x40] sm:$0xff] }
 0x755   : > { %1805 = vmatprep.subr.bf16.mxu1 %v1804_v63  ;;  %v1838_v62 = vpack.c.bf16 %v1328_v61, %v1327_v60  ;;  %v1345_v63 = vld [vmem:[%s2501_s10 + $0xd0] sm:$0xff] }
 0x756   : > { %v1840_v1 = vpack.c.bf16 %v1346_v0, %v1345_v63 }
 0x758   : > { %1807 = vmatpush1.bf16.msra.mxu1 %v1806_v7  ;;  %v1330_v7 = vld [vmem:[%s2501_s10 + $0x58] sm:$0xff] }
 0x759   : > { %1809 = vmatprep.subr.bf16.mxu1 %v1808_v9  ;;  %v1842_v3 = vpack.c.bf16 %v1330_v7, %v1329_v2  ;;  %v1844_v9 = vpack.c.bf16 %v1348_v5, %v1347_v4 }
 0x75c   : > { %1811 = vmatpush1.bf16.msra.mxu1 %v1810_v12  ;;  %v1846_v12 = vpack.c.bf16 %v1332_v11, %v1331_v10 }
 0x75d   : > { %1813 = vmatprep.subr.bf16.mxu1 %v1812_v13  ;;  %v1349_v13 = vld [vmem:[%s2501_s10 + $0xf0] sm:$0xff] }
 0x75e   : > { %v1848_v18 = vpack.c.bf16 %v1350_v16, %v1349_v13  ;;  %v1536_v16 = vld [vmem:[%s2502_s11] ss:$0 sm:$0xff] }
 0x760   : > { %1815 = vmatpush1.bf16.msra.mxu1 %v1814_v21  ;;  %v1850_v21 = vpack.c.bf16 %v1334_v20, %v1333_v19 }
 0x761   : > { %1817 = vmatprep.subr.bf16.mxu1 %v1816_v22  ;;  %v1182_v22 = vld [vmem:[%s2500_s9] sm:$0x3] }
 0x762   : > { %v1187_v23 = vrot.slane %v1182_v22, %v531_v17  ;;  %v1191_v24 = vrot.slane %v1182_v22, %v535_v15 }
 0x764   : > { %1819 = vmatpush1.bf16.msra.mxu1 %v1818_v25 }
 0x7d7   : > { %v1125_v51 = vpop.xlane.xlu0 %1124 }
 0x7d8   : > { %v1127_v52 = vmul.f32 0.0078125, %v1125_v51  ;;  %v1341_v51 = vld [vmem:[%s2501_s10 + $0xb0] sm:$0xff] }
 0x7da   : > { %v1128_v53 = vsub.f32 %v1121_v34, %v1127_v52  ;;  %v1342_v52 = vld [vmem:[%s2501_s10 + $0xb8] sm:$0xff] }
 0x7dc   : > { %v1129_v54 = vmul.f32 %v1128_v53, %v1128_v53 }
 0x7de   : > { %1130 = vadd.xlane.f32.xlu1 %v1129_v54  ;;  %v1325_v54 = vld [vmem:[%s2501_s10 + $0x30] sm:$0xff] }
 0x7df   : > { %v1834_v56 = vpack.c.bf16 %v1326_v55, %v1325_v54 }
 0x86b   : > { %v1131_v26 = vpop.xlane.xlu1 %1130 }
 0x86c   : > { %v1132_v27 = vmul.f32 0.0078125, %v1131_v26 }
 0x86e   : > { %v1133_v28 = vadd.f32 1e-12, %v1132_v27 }
 0x870   : > { %1872 = vrsqrt.f32 %v1133_v28 }
 0x87a   : > { %v1873_v29 = vpop.eup %1872 }
 0x87b   : > { %v1135_v31 = vmul.f32 %v1873_v29, %v1128_v53  ;;  %v1832_v53 = vpack.c.bf16 %v1342_v52, %v1341_v51 }
 0x87d   : > { %v1142_v33 = vmul.f32 %v1534_v30, %v1135_v31  ;;  %1833 = vmatprep.subr.bf16.mxu0 %v1832_v53 }
 0x87e   : > { %1835 = vmatpush3.bf16.msra.mxu0 %v1834_v56 }
 0x87f   : > { %v2367_v34 = vadd.f32 %v1535_v32, %v1142_v33  ;;  %1837 = vmatprep.subr.bf16.mxu0 %v1836_v59 }
 0x881   : > { %1259 = vmatmul.mubr.f32.vlgmr.msra.gmra.mrb[10].mxu1 %v2367_v34 }
 0x882   : > { %1839 = vmatpush3.bf16.msra.mxu0 %v1838_v62 }
 0x883   : > { %1841 = vmatprep.subr.bf16.mxu0 %v1840_v1 }
 0x886   : > { %1843 = vmatpush3.bf16.msra.mxu0 %v1842_v3 }
 0x887   : > { %1845 = vmatprep.subr.bf16.mxu0 %v1844_v9 }
 0x88a   : > { %1847 = vmatpush3.bf16.msra.mxu0 %v1846_v12 }
 0x88b   : > { %1849 = vmatprep.subr.bf16.mxu0 %v1848_v18 }
 0x88e   : > { %1851 = vmatpush3.bf16.msra.mxu0 %v1850_v21 }
 0x954   : > { %v1260_v25 = vpop.f32.mrb[10].mxu1 }
 0x955   : > { %v1261_v26 = vadd.f32 %v1260_v25, %v1187_v23  ;;  %v1262_v27 = vpop.f32.mrb[11].mxu1 }
 0x956   : > { %v1263_v28 = vadd.f32 %v1262_v27, %v1191_v24 }
 0x957   : > { %v1267_v29 = vmul.f32 0.70710677, %v1261_v26  ;;  %v1265_v10 = vmul.f32 0.5, %v1261_v26 }
 0x958   : > { %v1268_v30 = vmul.f32 0.70710677, %v1263_v28  ;;  %v1266_v5 = vmul.f32 0.5, %v1263_v28 }
 0x959   : > { %v1269_v31 = vand.u32 2147483647, %v1267_v29  ;;  %vm1309_vm3 = vcmp.ge.f32.partialorder %v1267_v29, 0.0 }
 0x95a   : > { %v1270_v32 = vand.u32 2147483647, %v1268_v30  ;;  %vm1310_vm4 = vcmp.ge.f32.partialorder %v1268_v30, 0.0  ;;  %v1537_v30 = vld [vmem:[%s2503_s12] ss:$0 sm:$0xff] }
 0x95b   : > { %v1271_v33 = vmul.f32 0.3275911, %v1269_v31  ;;  %v1297_v37 = vmul.f32 %v1269_v31, %v1269_v31 }
 0x95c   : > { %v1272_v8 = vmul.f32 0.3275911, %v1270_v32  ;;  %v1298_v38 = vmul.f32 %v1270_v32, %v1270_v32 }
 0x95d   : > { %v1273_v35 = vadd.f32 1.0, %v1271_v33  ;;  %v1299_v6 = vsub.f32 0.0, %v1297_v37 }
 0x95e   : > { %v1274_v36 = vadd.f32 1.0, %v1272_v8  ;;  %v1300_v39 = vsub.f32 0.0, %v1298_v38 }
 0x95f   : > { %1874 = vrcp.f32 %v1273_v35  ;;  %v1301_v42 = vmul.f32 1.442695, %v1299_v6 }
 0x960   : > { %1876 = vrcp.f32 %v1274_v36  ;;  %v1303_v45 = vmul.f32 1.442695, %v1300_v39 }
 0x961   : > { %1878 = vpow2.f32 %v1301_v42 }
 0x962   : > { %1880 = vpow2.f32 %v1303_v45 }
 0x969   : > { %v1875_v17 = vpop.eup %1874 }
 0x96a   : > { %v1877_v14 = vpop.eup %1876  ;;  %v1279_v15 = vmul.f32 1.0614054, %v1875_v17 }
 0x96b   : > { %v1280_v40 = vmul.f32 1.0614054, %v1877_v14  ;;  %v1879_v58 = vpop.eup %1878 }
 0x96c   : > { %v1281_v41 = vadd.f32 -1.4531521, %v1279_v15  ;;  %v1881_v60 = vpop.eup %1880 }
 0x96d   : > { %v1282_v43 = vadd.f32 -1.4531521, %v1280_v40 }
 0x96e   : > { %v1283_v44 = vmul.f32 %v1875_v17, %v1281_v41 }
 0x96f   : > { %v1284_v46 = vmul.f32 %v1877_v14, %v1282_v43 }
 0x970   : > { %v1285_v47 = vadd.f32 1.4214138, %v1283_v44 }
 0x971   : > { %v1286_v48 = vadd.f32 1.4214138, %v1284_v46 }
 0x972   : > { %v1287_v49 = vmul.f32 %v1875_v17, %v1285_v47 }
 0x973   : > { %v1288_v50 = vmul.f32 %v1877_v14, %v1286_v48 }
 0x974   : > { %v1289_v51 = vadd.f32 -0.28449672, %v1287_v49 }
 0x975   : > { %v1290_v52 = vadd.f32 -0.28449672, %v1288_v50 }
 0x976   : > { %v1291_v53 = vmul.f32 %v1875_v17, %v1289_v51 }
 0x977   : > { %v1292_v54 = vmul.f32 %v1877_v14, %v1290_v52 }
 0x978   : > { %v1293_v55 = vadd.f32 0.2548296, %v1291_v53 }
 0x979   : > { %v1294_v56 = vadd.f32 0.2548296, %v1292_v54 }
 0x97a   : > { %v1295_v57 = vmul.f32 %v1875_v17, %v1293_v55 }
 0x97b   : > { %v1296_v59 = vmul.f32 %v1877_v14, %v1294_v56 }
 0x97c   : > { %v1305_v61 = vmul.f32 %v1879_v58, %v1295_v57 }
 0x97d   : > { %v1306_v62 = vmul.f32 %v1881_v60, %v1296_v59 }
 0x97e   : > { %v1307_v63 = vsub.f32 1.0, %v1305_v61 }
 0x97f   : > { %v1308_v0 = vsub.f32 1.0, %v1306_v62 }
 0x980   : > { %v1311_v1 = vsub.f32 0.0, %v1307_v63 }
 0x981   : > { %v1312_v2 = vsub.f32 0.0, %v1308_v0 }
 0x982   : > { %v1313_v7 = vsel %vm1309_vm3, %v1307_v63, %v1311_v1 }
 0x983   : > { %v1315_v3 = vadd.f32 1.0, %v1313_v7  ;;  %v1314_v4 = vsel %vm1310_vm4, %v1308_v0, %v1312_v2 }
 0x984   : > { %v1316_v9 = vadd.f32 1.0, %v1314_v4 }
 0x985   : > { %v1317_v12 = vmul.f32 %v1315_v3, %v1265_v10 }
 0x986   : > { %v1318_v11 = vmul.f32 %v1316_v9, %v1266_v5 }
 0x988   : > { %1422 = vmatprep.mubr.f32.mxu0 %v1318_v11 }
 0x989   : > { %1423 = vmatmul.mubr.f32.vlgmr.msra.gmra.mrb[4].mxu0 %v1317_v12 }
 0xa5c   : > { %v1615_v13 = vpop.f32.mrb[4].mxu0 }
 0xa5d   : > { %v1616_v18 = vpop.f32.mrb[5].mxu0 }
 0xa5e   : > { %v1617_v19 = vadd.f32 %v1616_v18, %v1615_v13 }
 0xa60   : > { %v1425_v20 = vadd.f32 %v1617_v19, %v1536_v16 }
 0xa62   : > { %v1428_v21 = vadd.f32 %v1425_v20, %v2367_v34  ;;  %v1538_v34 = vld [vmem:[%s2504_s13] ss:$0 sm:$0xff] }
 0xa64   : > { %1431 = vadd.xlane.f32.xlu1 %v1428_v21 }
 0xaf1   : > { %v1432_v22 = vpop.xlane.xlu1 %1431 }
 0xaf2   : > { %v1433_v23 = vmul.f32 0.0078125, %v1432_v22 }
 0xaf4   : > { %v1434_v24 = vsub.f32 %v1428_v21, %v1433_v23 }
 0xaf6   : > { %v1435_v25 = vmul.f32 %v1434_v24, %v1434_v24 }
 0xaf8   : > { %1436 = vadd.xlane.f32.xlu1 %v1435_v25 }
 0xb85   : > { %v1437_v26 = vpop.xlane.xlu1 %1436 }
 0xb86   : > { %v1438_v27 = vmul.f32 0.0078125, %v1437_v26 }
 0xb88   : > { %v1439_v28 = vadd.f32 1e-12, %v1438_v27 }
 0xb8a   : > { %1882 = vrsqrt.f32 %v1439_v28 }
 0xb94   : > { %v1883_v29 = vpop.eup %1882 }
 0xb95   : > { %v1441_v31 = vmul.f32 %v1883_v29, %v1434_v24 }
 0xb97   : > { %v1448_v32 = vmul.f32 %v1537_v30, %v1441_v31 }
 0xb99   : > { %v1455_v33 = vadd.f32 %v1538_v34, %v1448_v32 }
 0xb9b   : > { %1456 = vst [vmem:[%s476_s22] sm:$0xff] %v1455_v33 }
 0xb9c PF: > { %s24_s29 = sadd.s32 1, %s1890_s29  }
 0xb9d   : > { %p21_p4 = scmp.ge.s32.totalorder %s24_s29, 4  }
 0xb9f   :  { %23 = sbr.rel (!%p21_p4) target bundleno = 1 (0x1), region = 109 }

</bundles_post_ra>
